<compile_context>
chip_gen: v6e
topology: v6e:2x2x1
jax: 0.10.0
libtpu: 0.0.40
codegen_flags: <defaults>
</compile_context>

<pallas_src>
import jax
import jax.numpy as jnp
from jax.experimental import pallas as pl
from jax.experimental.pallas import tpu as pltpu


def encoder_residual_kernel(x_ref, w5_ref, b5_ref, gamma_ref, beta_ref,
                            w3_ref, b3_ref, fc1_ref, fc2_ref, s_ref, st_ref,
                            out_ref, pad5_ref, pad3_ref):
    N, H, WC = x_ref.shape
    C = s_ref.shape[1]
    W = WC // C
    NH = N * H
    M = NH * W
    bf16 = jnp.bfloat16
    f32 = jnp.float32

    x = x_ref[...]                                               # (N, H, W*C) f32

    # ---- fused Conv5x5(pad=2) o Conv1x1 : banded-weight row matmuls ------------
    pad5_ref[...] = jnp.zeros(pad5_ref.shape, bf16)
    pad5_ref[:, 2:2 + H, 2 * C:(2 + W) * C] = x.astype(bf16)
    h = jnp.zeros((NH, WC), f32)
    for ky in range(5):                                          # unrolled, 5 fat matmuls
        rows = pad5_ref[:, ky:ky + H, :].reshape(NH, (W + 4) * C)
        h = h + jnp.dot(rows, w5_ref[ky], preferred_element_type=f32)
    h = h + b5_ref[...]                                          # (NH, W*C) f32

    # ---- BatchNorm2d (training batch stats over N,H,W; biased var; eps=1e-5) ---
    mean_c = jnp.dot(jnp.sum(h, axis=0, keepdims=True), s_ref[...],
                     preferred_element_type=f32) / M             # (1, C)
    mean_t = jnp.dot(mean_c, st_ref[...], preferred_element_type=f32)   # (1, W*C)
    d = h - mean_t
    var_c = jnp.dot(jnp.sum(d * d, axis=0, keepdims=True), s_ref[...],
                    preferred_element_type=f32) / M              # biased variance, (1, C)
    scale_c = gamma_ref[...] * jax.lax.rsqrt(var_c + 1e-5)
    shift_c = beta_ref[...] - mean_c * scale_c
    h = (h * jnp.dot(scale_c, st_ref[...], preferred_element_type=f32)
           + jnp.dot(shift_c, st_ref[...], preferred_element_type=f32))

    # ---- Swish ------------------------------------------------------------------
    h = h * jax.nn.sigmoid(h)

    # ---- Conv3x3 (pad=1), banded --------------------------------------------------
    pad3_ref[...] = jnp.zeros(pad3_ref.shape, bf16)
    pad3_ref[:, 1:1 + H, C:(1 + W) * C] = h.astype(bf16).reshape(N, H, WC)
    h3 = jnp.zeros((NH, WC), f32)
    for ky in range(3):
        rows = pad3_ref[:, ky:ky + H, :].reshape(NH, (W + 2) * C)
        h3 = h3 + jnp.dot(rows, w3_ref[ky], preferred_element_type=f32)
    h3 = (h3 + b3_ref[...]).reshape(N, H, WC)                    # lane-dense (N, H, W*C)

    # ---- SELayer: pool -> FC(bf16) -> ReLU -> FC(bf16) -> sigmoid -> scale -------
    pool = jnp.dot(jnp.sum(h3, axis=1), s_ref[...],
                   preferred_element_type=f32) / (H * W)         # (N, C)
    y = jnp.maximum(jnp.dot(pool.astype(bf16), fc1_ref[...],
                            preferred_element_type=f32), 0.0)
    y = jax.nn.sigmoid(jnp.dot(y.astype(bf16), fc2_ref[...],
                               preferred_element_type=f32))      # (N, C)
    y_t = jnp.dot(y, st_ref[...], preferred_element_type=f32)    # (N, W*C)

    # ---- residual -----------------------------------------------------------------
    out_ref[...] = (x + 0.1 * (h3 * y_t[:, None, :])).astype(out_ref.dtype)


def _banded_conv_weights(w_hwio, W, pad):
    """(kw, kw, Cin, Cout) HWIO conv weights -> (kw, (W+2*pad)*Cin, W*Cout) block-banded
    per-ky matmul weights: all kx taps are folded into the contraction dimension so the
    kernel multiplies whole padded rows (lane-dense) by this matrix."""
    kw, _, cin, cout = w_hwio.shape
    per_ky = []
    for ky in range(kw):
        b = jnp.zeros(((W + 2 * pad) * cin, W * cout), jnp.float32)
        for kx in range(kw):
            place = jnp.zeros((W + 2 * pad, W), jnp.float32).at[
                jnp.arange(W) + kx, jnp.arange(W)].set(1.0)
            b = b + jnp.kron(place, w_hwio[ky, kx].astype(jnp.float32))
        per_ky.append(b)
    return jnp.stack(per_ky)


def encoder_residual_block_nhwc(x_nhwc, params):
    """x_nhwc: (N, H, W, C) float32, contiguous NHWC. Returns (N, H, W, C)."""
    N, H, W, C = x_nhwc.shape
    bf16 = jnp.bfloat16

    # Fold Conv1x1 into Conv5x5 (exact: no nonlinearity between them); compose in f32.
    w5c = jnp.einsum("yxio,od->yxid", params["w1"].astype(jnp.float32),
                     params["w2"].astype(jnp.float32))
    b5c = params["b1"] @ params["w2"] + params["b2"]                       # (1, C)

    w5_band = _banded_conv_weights(w5c, W, pad=2).astype(bf16)             # (5, (W+4)C, WC)
    w3_band = _banded_conv_weights(params["w3"], W, pad=1).astype(bf16)    # (3, (W+2)C, WC)
    b5_t = jnp.tile(b5c, (1, W))                                           # (1, W*C)
    b3_t = jnp.tile(params["b3"], (1, W))

    # 0/1 selectors: S sums the W lane-groups per channel; S^T tiles a (., C) vector
    # back out to the lane-dense (., W*C) layout.  Both built once, host-side.
    sel = jnp.kron(jnp.ones((W, 1), jnp.float32), jnp.eye(C, dtype=jnp.float32))    # (W*C, C)
    sel_t = jnp.kron(jnp.ones((1, W), jnp.float32), jnp.eye(C, dtype=jnp.float32))  # (C, W*C)

    x3 = x_nhwc.reshape(N, H, W * C)   # free metadata reshape of contiguous NHWC

    args = (x3, w5_band, b5_t, params["gamma"], params["beta"],
            w3_band, b3_t, params["fc1"].astype(bf16), params["fc2"].astype(bf16),
            sel, sel_t)

    # VMEM budget: clamp to the actual per-core capacity (v7x: 64 MiB, v5e/v6e: 128 MiB).
    try:
        vmem_cap = int(pltpu.get_tpu_info().vmem_capacity_bytes)
    except Exception:
        vmem_cap = 64 << 20
    io_bytes = sum(int(a.size) * a.dtype.itemsize for a in args) + int(x3.size) * 4
    scratch_bytes = (N * (H + 4) * (W + 4) * C + N * (H + 2) * (W + 2) * C) * 2
    vmem_limit = int(min(int(0.85 * vmem_cap),
                         max(16 << 20, 2 * (io_bytes + scratch_bytes) + (8 << 20))))

    # TODO(synk): for non-toy shapes, add a "parallel" grid over batch / H-row blocks
    # (halo'd index_map; uses both v7x TensorCores and bounds VMEM), split BatchNorm into
    # a stats pass + apply pass, and switch the shape-specialized banded weights to an
    # im2col slab so FLOPs stay O(kw^2) per pixel.  At these sizes everything fits VMEM.
    out3 = pl.pallas_call(
        encoder_residual_kernel,
        out_shape=jax.ShapeDtypeStruct((N, H, W * C), x_nhwc.dtype),
        in_specs=[pl.BlockSpec(memory_space=pltpu.MemorySpace.VMEM)] * len(args),
        out_specs=pl.BlockSpec(memory_space=pltpu.MemorySpace.VMEM),
        scratch_shapes=[pltpu.VMEM((N, H + 4, (W + 4) * C), jnp.bfloat16),
                        pltpu.VMEM((N, H + 2, (W + 2) * C), jnp.bfloat16)],
        input_output_aliases={0: 0},
        compiler_params=pltpu.CompilerParams(vmem_limit_bytes=vmem_limit),
    )(*args)
    return out3.reshape(N, H, W, C)


def encoder_residual_block(x_nchw, params):
    """NCHW wrapper matching the PyTorch module. In an NHWC model, call
    encoder_residual_block_nhwc directly and skip both full-tensor transposes."""
    x = jnp.transpose(x_nchw, (0, 2, 3, 1))
    out = encoder_residual_block_nhwc(x, params)
    return jnp.transpose(out, (0, 3, 1, 2))


def _reference(x_nchw, params):
    """Pure-JAX reference (NHWC internally), for correctness check."""
    x = jnp.transpose(x_nchw, (0, 2, 3, 1))
    dn = ("NHWC", "HWIO", "NHWC")
    h = jax.lax.conv_general_dilated(x, params["w1"], (1, 1), "SAME",
                                     dimension_numbers=dn) + params["b1"]
    h = jax.lax.conv_general_dilated(h, params["w2"].reshape(1, 1, *params["w2"].shape),
                                     (1, 1), "SAME", dimension_numbers=dn) + params["b2"]
    mean = jnp.mean(h, axis=(0, 1, 2), keepdims=True)
    var = jnp.mean((h - mean) ** 2, axis=(0, 1, 2), keepdims=True)
    h = (h - mean) * jax.lax.rsqrt(var + 1e-5) * params["gamma"] + params["beta"]
    h = h * jax.nn.sigmoid(h)
    h = jax.lax.conv_general_dilated(h, params["w3"], (1, 1), "SAME",
                                     dimension_numbers=dn) + params["b3"]
    y = jnp.mean(h, axis=(1, 2))
    y = jnp.maximum(y @ params["fc1"], 0.0)
    y = jax.nn.sigmoid(y @ params["fc2"])
    se = h * y[:, None, None, :]
    return jnp.transpose(x + 0.1 * se, (0, 3, 1, 2))


def make_params(key, dim, reduction=16):
    cr = max(dim // reduction, 1)
    ks = jax.random.split(key, 9)
    s = 0.1
    return {
        "w1": s * jax.random.normal(ks[0], (5, 5, dim, dim), jnp.float32),
        "b1": s * jax.random.normal(ks[1], (1, dim), jnp.float32),
        "w2": s * jax.random.normal(ks[2], (dim, dim), jnp.float32),
        "b2": s * jax.random.normal(ks[3], (1, dim), jnp.float32),
        "gamma": 1.0 + s * jax.random.normal(ks[4], (1, dim), jnp.float32),
        "beta": s * jax.random.normal(ks[5], (1, dim), jnp.float32),
        "w3": s * jax.random.normal(ks[6], (3, 3, dim, dim), jnp.float32),
        "b3": s * jax.random.normal(ks[7], (1, dim), jnp.float32),
        "fc1": s * jax.random.normal(ks[8], (dim, cr), jnp.float32),
        "fc2": s * jax.random.normal(jax.random.fold_in(key, 99), (cr, dim), jnp.float32),
    }


if __name__ == "__main__":
    key = jax.random.PRNGKey(0)
    N, C, H, W = 2, 32, 8, 8          # dim=32 so SE hidden = 32 // 16 = 2
    kx, kp = jax.random.split(key)
    x = jax.random.normal(kx, (N, C, H, W), jnp.float32)
    params = make_params(kp, C)

    ref = jax.block_until_ready(_reference(x, params))
    out = jax.block_until_ready(encoder_residual_block(x, params))
    assert out.shape == (N, C, H, W)
    err = float(jnp.max(jnp.abs(out - ref)))
    # bf16 MXU matmuls (with the composed 5x5∘1x1 weights) and f32 accumulation.
    assert jnp.allclose(out, ref, rtol=1e-2, atol=1e-2), f"max abs err {err}"
    print("KERNEL_OK")
</pallas_src>

<mosaic_0001>
module attributes {stable_mosaic.version = 11 : i64} {
  func.func @encoder_residual_kernel(%arg0: memref<2x8x256xf32, #tpu.memory_space<vmem>>, %arg1: memref<5x384x256xbf16, #tpu.memory_space<vmem>>, %arg2: memref<1x256xf32, #tpu.memory_space<vmem>>, %arg3: memref<1x32xf32, #tpu.memory_space<vmem>>, %arg4: memref<1x32xf32, #tpu.memory_space<vmem>>, %arg5: memref<3x320x256xbf16, #tpu.memory_space<vmem>>, %arg6: memref<1x256xf32, #tpu.memory_space<vmem>>, %arg7: memref<32x2xbf16, #tpu.memory_space<vmem>>, %arg8: memref<2x32xbf16, #tpu.memory_space<vmem>>, %arg9: memref<256x32xf32, #tpu.memory_space<vmem>>, %arg10: memref<32x256xf32, #tpu.memory_space<vmem>>, %arg11: memref<2x8x256xf32, #tpu.memory_space<vmem>>, %arg12: memref<2x12x384xbf16, #tpu.memory_space<vmem>>, %arg13: memref<2x10x320xbf16, #tpu.memory_space<vmem>>) attributes {dimension_semantics = [], scalar_prefetch = 0 : i64, scratch_operands = 2 : i64, tpu.core_type = #tpu.core_type<tc>} {
    %c0 = arith.constant 0 : index
    %c0_0 = arith.constant 0 : index
    %c0_1 = arith.constant 0 : index
    %0 = vector.load %arg0[%c0, %c0_0, %c0_1] : memref<2x8x256xf32, #tpu.memory_space<vmem>>, vector<2x8x256xf32>
    %cst = arith.constant 0.000000e+00 : bf16
    %1 = vector.broadcast %cst : bf16 to vector<2x12x384xbf16>
    %c0_2 = arith.constant 0 : index
    %c0_3 = arith.constant 0 : index
    %c0_4 = arith.constant 0 : index
    %2 = vector.load %arg12[%c0_2, %c0_3, %c0_4] : memref<2x12x384xbf16, #tpu.memory_space<vmem>>, vector<2x12x384xbf16>
    tpu.vector_store %arg12[%c0_2, %c0_3, %c0_4], %1 {strides = array<i32>} : memref<2x12x384xbf16, #tpu.memory_space<vmem>>, vector<2x12x384xbf16>,
    %3 = arith.truncf %0 : vector<2x8x256xf32> to vector<2x8x256xbf16>
    %c0_5 = arith.constant 0 : index
    %c2 = arith.constant 2 : index
    %c64 = arith.constant 64 : index
    %4 = vector.load %arg12[%c0_5, %c2, %c64] : memref<2x12x384xbf16, #tpu.memory_space<vmem>>, vector<2x8x256xbf16>
    tpu.vector_store %arg12[%c0_5, %c2, %c64], %3 {strides = array<i32>} : memref<2x12x384xbf16, #tpu.memory_space<vmem>>, vector<2x8x256xbf16>,
    %cst_6 = arith.constant 0.000000e+00 : f32
    %5 = vector.broadcast %cst_6 : f32 to vector<16x256xf32>
    %c0_7 = arith.constant 0 : index
    %c0_8 = arith.constant 0 : index
    %c0_9 = arith.constant 0 : index
    %6 = vector.load %arg12[%c0_7, %c0_8, %c0_9] : memref<2x12x384xbf16, #tpu.memory_space<vmem>>, vector<2x8x384xbf16>
    %7 = vector.shape_cast %6 : vector<2x8x384xbf16> to vector<16x384xbf16>
    %c0_10 = arith.constant 0 : index
    %c0_11 = arith.constant 0 : index
    %c0_12 = arith.constant 0 : index
    %8 = vector.load %arg1[%c0_10, %c0_11, %c0_12] : memref<5x384x256xbf16, #tpu.memory_space<vmem>>, vector<1x384x256xbf16>
    %9 = vector.shape_cast %8 : vector<1x384x256xbf16> to vector<384x256xbf16>
    %cst_13 = arith.constant dense<0.000000e+00> : vector<16x256xf32>
    %10 = tpu.matmul %7, %9, %cst_13 {dimension_numbers = #tpu.dot_dimension_numbers<[1], [0], [0], [1], [0, 0, 1, 1], [], []>} : vector<16x384xbf16>, vector<384x256xbf16>, vector<16x256xf32> -> vector<16x256xf32>
    %11 = arith.addf %5, %10 : vector<16x256xf32>
    %c0_14 = arith.constant 0 : index
    %c1 = arith.constant 1 : index
    %c0_15 = arith.constant 0 : index
    %12 = vector.load %arg12[%c0_14, %c1, %c0_15] : memref<2x12x384xbf16, #tpu.memory_space<vmem>>, vector<2x8x384xbf16>
    %13 = vector.shape_cast %12 : vector<2x8x384xbf16> to vector<16x384xbf16>
    %c1_16 = arith.constant 1 : index
    %c0_17 = arith.constant 0 : index
    %c0_18 = arith.constant 0 : index
    %14 = vector.load %arg1[%c1_16, %c0_17, %c0_18] : memref<5x384x256xbf16, #tpu.memory_space<vmem>>, vector<1x384x256xbf16>
    %15 = vector.shape_cast %14 : vector<1x384x256xbf16> to vector<384x256xbf16>
    %cst_19 = arith.constant dense<0.000000e+00> : vector<16x256xf32>
    %16 = tpu.matmul %13, %15, %cst_19 {dimension_numbers = #tpu.dot_dimension_numbers<[1], [0], [0], [1], [0, 0, 1, 1], [], []>} : vector<16x384xbf16>, vector<384x256xbf16>, vector<16x256xf32> -> vector<16x256xf32>
    %17 = arith.addf %11, %16 : vector<16x256xf32>
    %c0_20 = arith.constant 0 : index
    %c2_21 = arith.constant 2 : index
    %c0_22 = arith.constant 0 : index
    %18 = vector.load %arg12[%c0_20, %c2_21, %c0_22] : memref<2x12x384xbf16, #tpu.memory_space<vmem>>, vector<2x8x384xbf16>
    %19 = vector.shape_cast %18 : vector<2x8x384xbf16> to vector<16x384xbf16>
    %c2_23 = arith.constant 2 : index
    %c0_24 = arith.constant 0 : index
    %c0_25 = arith.constant 0 : index
    %20 = vector.load %arg1[%c2_23, %c0_24, %c0_25] : memref<5x384x256xbf16, #tpu.memory_space<vmem>>, vector<1x384x256xbf16>
    %21 = vector.shape_cast %20 : vector<1x384x256xbf16> to vector<384x256xbf16>
    %cst_26 = arith.constant dense<0.000000e+00> : vector<16x256xf32>
    %22 = tpu.matmul %19, %21, %cst_26 {dimension_numbers = #tpu.dot_dimension_numbers<[1], [0], [0], [1], [0, 0, 1, 1], [], []>} : vector<16x384xbf16>, vector<384x256xbf16>, vector<16x256xf32> -> vector<16x256xf32>
    %23 = arith.addf %17, %22 : vector<16x256xf32>
    %c0_27 = arith.constant 0 : index
    %c3 = arith.constant 3 : index
    %c0_28 = arith.constant 0 : index
    %24 = vector.load %arg12[%c0_27, %c3, %c0_28] : memref<2x12x384xbf16, #tpu.memory_space<vmem>>, vector<2x8x384xbf16>
    %25 = vector.shape_cast %24 : vector<2x8x384xbf16> to vector<16x384xbf16>
    %c3_29 = arith.constant 3 : index
    %c0_30 = arith.constant 0 : index
    %c0_31 = arith.constant 0 : index
    %26 = vector.load %arg1[%c3_29, %c0_30, %c0_31] : memref<5x384x256xbf16, #tpu.memory_space<vmem>>, vector<1x384x256xbf16>
    %27 = vector.shape_cast %26 : vector<1x384x256xbf16> to vector<384x256xbf16>
    %cst_32 = arith.constant dense<0.000000e+00> : vector<16x256xf32>
    %28 = tpu.matmul %25, %27, %cst_32 {dimension_numbers = #tpu.dot_dimension_numbers<[1], [0], [0], [1], [0, 0, 1, 1], [], []>} : vector<16x384xbf16>, vector<384x256xbf16>, vector<16x256xf32> -> vector<16x256xf32>
    %29 = arith.addf %23, %28 : vector<16x256xf32>
    %c0_33 = arith.constant 0 : index
    %c4 = arith.constant 4 : index
    %c0_34 = arith.constant 0 : index
    %30 = vector.load %arg12[%c0_33, %c4, %c0_34] : memref<2x12x384xbf16, #tpu.memory_space<vmem>>, vector<2x8x384xbf16>
    %31 = vector.shape_cast %30 : vector<2x8x384xbf16> to vector<16x384xbf16>
    %c4_35 = arith.constant 4 : index
    %c0_36 = arith.constant 0 : index
    %c0_37 = arith.constant 0 : index
    %32 = vector.load %arg1[%c4_35, %c0_36, %c0_37] : memref<5x384x256xbf16, #tpu.memory_space<vmem>>, vector<1x384x256xbf16>
    %33 = vector.shape_cast %32 : vector<1x384x256xbf16> to vector<384x256xbf16>
    %cst_38 = arith.constant dense<0.000000e+00> : vector<16x256xf32>
    %34 = tpu.matmul %31, %33, %cst_38 {dimension_numbers = #tpu.dot_dimension_numbers<[1], [0], [0], [1], [0, 0, 1, 1], [], []>} : vector<16x384xbf16>, vector<384x256xbf16>, vector<16x256xf32> -> vector<16x256xf32>
    %35 = arith.addf %29, %34 : vector<16x256xf32>
    %c0_39 = arith.constant 0 : index
    %c0_40 = arith.constant 0 : index
    %36 = vector.load %arg2[%c0_39, %c0_40] : memref<1x256xf32, #tpu.memory_space<vmem>>, vector<1x256xf32>
    %37 = vector.broadcast %36 : vector<1x256xf32> to vector<16x256xf32>
    %38 = arith.addf %35, %37 : vector<16x256xf32>
    %cst_41 = arith.constant dense<0.000000e+00> : vector<256xf32>
    %39 = vector.multi_reduction <add>, %38, %cst_41 [0] : vector<16x256xf32> to vector<256xf32>
    %40 = vector.shape_cast %39 : vector<256xf32> to vector<1x256xf32>
    %c0_42 = arith.constant 0 : index
    %c0_43 = arith.constant 0 : index
    %41 = vector.load %arg9[%c0_42, %c0_43] : memref<256x32xf32, #tpu.memory_space<vmem>>, vector<256x32xf32>
    %cst_44 = arith.constant dense<0.000000e+00> : vector<1x32xf32>
    %42 = tpu.matmul %40, %41, %cst_44 {dimension_numbers = #tpu.dot_dimension_numbers<[1], [0], [0], [1], [0, 0, 1, 1], [], []>} : vector<1x256xf32>, vector<256x32xf32>, vector<1x32xf32> -> vector<1x32xf32>
    %cst_45 = arith.constant 1.280000e+02 : f32
    %43 = vector.broadcast %cst_45 : f32 to vector<1x32xf32>
    %44 = arith.divf %42, %43 : vector<1x32xf32>
    %c0_46 = arith.constant 0 : index
    %c0_47 = arith.constant 0 : index
    %45 = vector.load %arg10[%c0_46, %c0_47] : memref<32x256xf32, #tpu.memory_space<vmem>>, vector<32x256xf32>
    %cst_48 = arith.constant dense<0.000000e+00> : vector<1x256xf32>
    %46 = tpu.matmul %44, %45, %cst_48 {dimension_numbers = #tpu.dot_dimension_numbers<[1], [0], [0], [1], [0, 0, 1, 1], [], []>} : vector<1x32xf32>, vector<32x256xf32>, vector<1x256xf32> -> vector<1x256xf32>
    %47 = vector.broadcast %46 : vector<1x256xf32> to vector<16x256xf32>
    %48 = arith.subf %38, %47 : vector<16x256xf32>
    %49 = arith.mulf %48, %48 : vector<16x256xf32>
    %cst_49 = arith.constant dense<0.000000e+00> : vector<256xf32>
    %50 = vector.multi_reduction <add>, %49, %cst_49 [0] : vector<16x256xf32> to vector<256xf32>
    %51 = vector.shape_cast %50 : vector<256xf32> to vector<1x256xf32>
    %c0_50 = arith.constant 0 : index
    %c0_51 = arith.constant 0 : index
    %52 = vector.load %arg9[%c0_50, %c0_51] : memref<256x32xf32, #tpu.memory_space<vmem>>, vector<256x32xf32>
    %cst_52 = arith.constant dense<0.000000e+00> : vector<1x32xf32>
    %53 = tpu.matmul %51, %52, %cst_52 {dimension_numbers = #tpu.dot_dimension_numbers<[1], [0], [0], [1], [0, 0, 1, 1], [], []>} : vector<1x256xf32>, vector<256x32xf32>, vector<1x32xf32> -> vector<1x32xf32>
    %cst_53 = arith.constant 1.280000e+02 : f32
    %54 = vector.broadcast %cst_53 : f32 to vector<1x32xf32>
    %55 = arith.divf %53, %54 : vector<1x32xf32>
    %c0_54 = arith.constant 0 : index
    %c0_55 = arith.constant 0 : index
    %56 = vector.load %arg3[%c0_54, %c0_55] : memref<1x32xf32, #tpu.memory_space<vmem>>, vector<1x32xf32>
    %cst_56 = arith.constant 9.99999974E-6 : f32
    %57 = vector.broadcast %cst_56 : f32 to vector<1x32xf32>
    %58 = arith.addf %55, %57 : vector<1x32xf32>
    %59 = math.rsqrt %58 : vector<1x32xf32>
    %60 = arith.mulf %56, %59 : vector<1x32xf32>
    %c0_57 = arith.constant 0 : index
    %c0_58 = arith.constant 0 : index
    %61 = vector.load %arg4[%c0_57, %c0_58] : memref<1x32xf32, #tpu.memory_space<vmem>>, vector<1x32xf32>
    %62 = arith.mulf %44, %60 : vector<1x32xf32>
    %63 = arith.subf %61, %62 : vector<1x32xf32>
    %c0_59 = arith.constant 0 : index
    %c0_60 = arith.constant 0 : index
    %64 = vector.load %arg10[%c0_59, %c0_60] : memref<32x256xf32, #tpu.memory_space<vmem>>, vector<32x256xf32>
    %cst_61 = arith.constant dense<0.000000e+00> : vector<1x256xf32>
    %65 = tpu.matmul %60, %64, %cst_61 {dimension_numbers = #tpu.dot_dimension_numbers<[1], [0], [0], [1], [0, 0, 1, 1], [], []>} : vector<1x32xf32>, vector<32x256xf32>, vector<1x256xf32> -> vector<1x256xf32>
    %66 = vector.broadcast %65 : vector<1x256xf32> to vector<16x256xf32>
    %67 = arith.mulf %38, %66 : vector<16x256xf32>
    %c0_62 = arith.constant 0 : index
    %c0_63 = arith.constant 0 : index
    %68 = vector.load %arg10[%c0_62, %c0_63] : memref<32x256xf32, #tpu.memory_space<vmem>>, vector<32x256xf32>
    %cst_64 = arith.constant dense<0.000000e+00> : vector<1x256xf32>
    %69 = tpu.matmul %63, %68, %cst_64 {dimension_numbers = #tpu.dot_dimension_numbers<[1], [0], [0], [1], [0, 0, 1, 1], [], []>} : vector<1x32xf32>, vector<32x256xf32>, vector<1x256xf32> -> vector<1x256xf32>
    %70 = vector.broadcast %69 : vector<1x256xf32> to vector<16x256xf32>
    %71 = arith.addf %67, %70 : vector<16x256xf32>
    %72 = arith.negf %71 : vector<16x256xf32>
    %73 = math.exp %72 : vector<16x256xf32>
    %cst_65 = arith.constant 1.000000e+00 : f32
    %74 = vector.broadcast %cst_65 : f32 to vector<16x256xf32>
    %75 = arith.addf %74, %73 : vector<16x256xf32>
    %76 = arith.divf %74, %75 : vector<16x256xf32>
    %77 = arith.mulf %71, %76 : vector<16x256xf32>
    %cst_66 = arith.constant 0.000000e+00 : bf16
    %78 = vector.broadcast %cst_66 : bf16 to vector<2x10x320xbf16>
    %c0_67 = arith.constant 0 : index
    %c0_68 = arith.constant 0 : index
    %c0_69 = arith.constant 0 : index
    %79 = vector.load %arg13[%c0_67, %c0_68, %c0_69] : memref<2x10x320xbf16, #tpu.memory_space<vmem>>, vector<2x10x320xbf16>
    tpu.vector_store %arg13[%c0_67, %c0_68, %c0_69], %78 {strides = array<i32>} : memref<2x10x320xbf16, #tpu.memory_space<vmem>>, vector<2x10x320xbf16>,
    %80 = arith.truncf %77 : vector<16x256xf32> to vector<16x256xbf16>
    %81 = vector.shape_cast %80 : vector<16x256xbf16> to vector<2x8x256xbf16>
    %c0_70 = arith.constant 0 : index
    %c1_71 = arith.constant 1 : index
    %c32 = arith.constant 32 : index
    %82 = vector.load %arg13[%c0_70, %c1_71, %c32] : memref<2x10x320xbf16, #tpu.memory_space<vmem>>, vector<2x8x256xbf16>
    tpu.vector_store %arg13[%c0_70, %c1_71, %c32], %81 {strides = array<i32>} : memref<2x10x320xbf16, #tpu.memory_space<vmem>>, vector<2x8x256xbf16>,
    %cst_72 = arith.constant 0.000000e+00 : f32
    %83 = vector.broadcast %cst_72 : f32 to vector<16x256xf32>
    %c0_73 = arith.constant 0 : index
    %c0_74 = arith.constant 0 : index
    %c0_75 = arith.constant 0 : index
    %84 = vector.load %arg13[%c0_73, %c0_74, %c0_75] : memref<2x10x320xbf16, #tpu.memory_space<vmem>>, vector<2x8x320xbf16>
    %85 = vector.shape_cast %84 : vector<2x8x320xbf16> to vector<16x320xbf16>
    %c0_76 = arith.constant 0 : index
    %c0_77 = arith.constant 0 : index
    %c0_78 = arith.constant 0 : index
    %86 = vector.load %arg5[%c0_76, %c0_77, %c0_78] : memref<3x320x256xbf16, #tpu.memory_space<vmem>>, vector<1x320x256xbf16>
    %87 = vector.shape_cast %86 : vector<1x320x256xbf16> to vector<320x256xbf16>
    %cst_79 = arith.constant dense<0.000000e+00> : vector<16x256xf32>
    %88 = tpu.matmul %85, %87, %cst_79 {dimension_numbers = #tpu.dot_dimension_numbers<[1], [0], [0], [1], [0, 0, 1, 1], [], []>} : vector<16x320xbf16>, vector<320x256xbf16>, vector<16x256xf32> -> vector<16x256xf32>
    %89 = arith.addf %83, %88 : vector<16x256xf32>
    %c0_80 = arith.constant 0 : index
    %c1_81 = arith.constant 1 : index
    %c0_82 = arith.constant 0 : index
    %90 = vector.load %arg13[%c0_80, %c1_81, %c0_82] : memref<2x10x320xbf16, #tpu.memory_space<vmem>>, vector<2x8x320xbf16>
    %91 = vector.shape_cast %90 : vector<2x8x320xbf16> to vector<16x320xbf16>
    %c1_83 = arith.constant 1 : index
    %c0_84 = arith.constant 0 : index
    %c0_85 = arith.constant 0 : index
    %92 = vector.load %arg5[%c1_83, %c0_84, %c0_85] : memref<3x320x256xbf16, #tpu.memory_space<vmem>>, vector<1x320x256xbf16>
    %93 = vector.shape_cast %92 : vector<1x320x256xbf16> to vector<320x256xbf16>
    %cst_86 = arith.constant dense<0.000000e+00> : vector<16x256xf32>
    %94 = tpu.matmul %91, %93, %cst_86 {dimension_numbers = #tpu.dot_dimension_numbers<[1], [0], [0], [1], [0, 0, 1, 1], [], []>} : vector<16x320xbf16>, vector<320x256xbf16>, vector<16x256xf32> -> vector<16x256xf32>
    %95 = arith.addf %89, %94 : vector<16x256xf32>
    %c0_87 = arith.constant 0 : index
    %c2_88 = arith.constant 2 : index
    %c0_89 = arith.constant 0 : index
    %96 = vector.load %arg13[%c0_87, %c2_88, %c0_89] : memref<2x10x320xbf16, #tpu.memory_space<vmem>>, vector<2x8x320xbf16>
    %97 = vector.shape_cast %96 : vector<2x8x320xbf16> to vector<16x320xbf16>
    %c2_90 = arith.constant 2 : index
    %c0_91 = arith.constant 0 : index
    %c0_92 = arith.constant 0 : index
    %98 = vector.load %arg5[%c2_90, %c0_91, %c0_92] : memref<3x320x256xbf16, #tpu.memory_space<vmem>>, vector<1x320x256xbf16>
    %99 = vector.shape_cast %98 : vector<1x320x256xbf16> to vector<320x256xbf16>
    %cst_93 = arith.constant dense<0.000000e+00> : vector<16x256xf32>
    %100 = tpu.matmul %97, %99, %cst_93 {dimension_numbers = #tpu.dot_dimension_numbers<[1], [0], [0], [1], [0, 0, 1, 1], [], []>} : vector<16x320xbf16>, vector<320x256xbf16>, vector<16x256xf32> -> vector<16x256xf32>
    %101 = arith.addf %95, %100 : vector<16x256xf32>
    %c0_94 = arith.constant 0 : index
    %c0_95 = arith.constant 0 : index
    %102 = vector.load %arg6[%c0_94, %c0_95] : memref<1x256xf32, #tpu.memory_space<vmem>>, vector<1x256xf32>
    %103 = vector.broadcast %102 : vector<1x256xf32> to vector<16x256xf32>
    %104 = arith.addf %101, %103 : vector<16x256xf32>
    %105 = vector.shape_cast %104 : vector<16x256xf32> to vector<2x8x256xf32>
    %cst_96 = arith.constant dense<0.000000e+00> : vector<2x256xf32>
    %106 = vector.multi_reduction <add>, %105, %cst_96 [1] : vector<2x8x256xf32> to vector<2x256xf32>
    %c0_97 = arith.constant 0 : index
    %c0_98 = arith.constant 0 : index
    %107 = vector.load %arg9[%c0_97, %c0_98] : memref<256x32xf32, #tpu.memory_space<vmem>>, vector<256x32xf32>
    %cst_99 = arith.constant dense<0.000000e+00> : vector<2x32xf32>
    %108 = tpu.matmul %106, %107, %cst_99 {dimension_numbers = #tpu.dot_dimension_numbers<[1], [0], [0], [1], [0, 0, 1, 1], [], []>} : vector<2x256xf32>, vector<256x32xf32>, vector<2x32xf32> -> vector<2x32xf32>
    %cst_100 = arith.constant 6.400000e+01 : f32
    %109 = vector.broadcast %cst_100 : f32 to vector<2x32xf32>
    %110 = arith.divf %108, %109 : vector<2x32xf32>
    %111 = arith.truncf %110 : vector<2x32xf32> to vector<2x32xbf16>
    %c0_101 = arith.constant 0 : index
    %c0_102 = arith.constant 0 : index
    %112 = vector.load %arg7[%c0_101, %c0_102] : memref<32x2xbf16, #tpu.memory_space<vmem>>, vector<32x2xbf16>
    %cst_103 = arith.constant dense<0.000000e+00> : vector<2x2xf32>
    %113 = tpu.matmul %111, %112, %cst_103 {dimension_numbers = #tpu.dot_dimension_numbers<[1], [0], [0], [1], [0, 0, 1, 1], [], []>} : vector<2x32xbf16>, vector<32x2xbf16>, vector<2x2xf32> -> vector<2x2xf32>
    %cst_104 = arith.constant 0.000000e+00 : f32
    %114 = vector.broadcast %cst_104 : f32 to vector<2x2xf32>
    %115 = arith.maximumf %113, %114 : vector<2x2xf32>
    %116 = arith.truncf %115 : vector<2x2xf32> to vector<2x2xbf16>
    %c0_105 = arith.constant 0 : index
    %c0_106 = arith.constant 0 : index
    %117 = vector.load %arg8[%c0_105, %c0_106] : memref<2x32xbf16, #tpu.memory_space<vmem>>, vector<2x32xbf16>
    %cst_107 = arith.constant dense<0.000000e+00> : vector<2x32xf32>
    %118 = tpu.matmul %116, %117, %cst_107 {dimension_numbers = #tpu.dot_dimension_numbers<[1], [0], [0], [1], [0, 0, 1, 1], [], []>} : vector<2x2xbf16>, vector<2x32xbf16>, vector<2x32xf32> -> vector<2x32xf32>
    %119 = arith.negf %118 : vector<2x32xf32>
    %120 = math.exp %119 : vector<2x32xf32>
    %cst_108 = arith.constant 1.000000e+00 : f32
    %121 = vector.broadcast %cst_108 : f32 to vector<2x32xf32>
    %122 = arith.addf %121, %120 : vector<2x32xf32>
    %123 = arith.divf %121, %122 : vector<2x32xf32>
    %c0_109 = arith.constant 0 : index
    %c0_110 = arith.constant 0 : index
    %124 = vector.load %arg10[%c0_109, %c0_110] : memref<32x256xf32, #tpu.memory_space<vmem>>, vector<32x256xf32>
    %cst_111 = arith.constant dense<0.000000e+00> : vector<2x256xf32>
    %125 = tpu.matmul %123, %124, %cst_111 {dimension_numbers = #tpu.dot_dimension_numbers<[1], [0], [0], [1], [0, 0, 1, 1], [], []>} : vector<2x32xf32>, vector<32x256xf32>, vector<2x256xf32> -> vector<2x256xf32>
    %126 = vector.shape_cast %125 : vector<2x256xf32> to vector<2x1x256xf32>
    %127 = vector.broadcast %126 : vector<2x1x256xf32> to vector<2x8x256xf32>
    %128 = arith.mulf %105, %127 : vector<2x8x256xf32>
    %cst_112 = arith.constant 1.000000e-01 : f32
    %129 = vector.broadcast %cst_112 : f32 to vector<2x8x256xf32>
    %130 = arith.mulf %129, %128 : vector<2x8x256xf32>
    %131 = arith.addf %0, %130 : vector<2x8x256xf32>
    %c0_113 = arith.constant 0 : index
    %c0_114 = arith.constant 0 : index
    %c0_115 = arith.constant 0 : index
    %132 = vector.load %arg11[%c0_113, %c0_114, %c0_115] : memref<2x8x256xf32, #tpu.memory_space<vmem>>, vector<2x8x256xf32>
    tpu.vector_store %arg11[%c0_113, %c0_114, %c0_115], %131 {strides = array<i32>} : memref<2x8x256xf32, #tpu.memory_space<vmem>>, vector<2x8x256xf32>,
    return
  }
}

</mosaic_0001>

<bundles_post_ra>
// kernel: tpu_custom_call.1
= control target key start
LH: loop header
LB: loop body
LE: loop exit
PB: predicated region body
PF: predicated region fallthrough
CT: control target
= control target key end

     0   :  { %16 = vsyncpa [#allocation5], 0  ;;  %s6645_s0 = inlined_call_operand.hbm [shape: f32[2,8,256], index: 0, kind: input, shape index: {}, may-alias: {0,11}]   ;;  %s6646_s1 = inlined_call_operand.hbm [shape: bf16[5,384,256], index: 1, kind: input, shape index: {}]   ;;  %s6647_s2 = inlined_call_operand.vmem [shape: f32[1,256], index: 2, kind: input, shape index: {}]   ;;  %s6648_s3 = inlined_call_operand.vmem [shape: f32[1,32], index: 3, kind: input, shape index: {}]   ;;  %s6649_s4 = inlined_call_operand.vmem [shape: f32[1,32], index: 4, kind: input, shape index: {}]   ;;  %s6650_s5 = inlined_call_operand.hbm [shape: bf16[3,320,256], index: 5, kind: input, shape index: {}]   ;;  %s6651_s6 = inlined_call_operand.vmem [shape: f32[1,256], index: 6, kind: input, shape index: {}]   ;;  %s6652_s7 = inlined_call_operand.vmem [shape: bf16[32,2], index: 7, kind: input, shape index: {}]   ;;  %s6653_s8 = inlined_call_operand.vmem [shape: bf16[2,32], index: 8, kind: input, shape index: {}]   ;;  %s6654_s9 = inlined_call_operand.vmem [shape: f32[256,32], index: 9, kind: input, shape index: {}]   ;;  %s6655_s10 = inlined_call_operand.vmem [shape: f32[32,256], index: 10, kind: input, shape index: {}]   ;;  %s6656_s11 = inlined_call_operand.hbm [shape: f32[2,8,256], index: 11, kind: output, shape index: {}, may-alias: {0,11}]  }
   0x1   :  { %17 = vsyncpa [#allocation8], 0 }
   0x2   :  { %18 = vsyncpa [#allocation6], 0  ;;  %s5707_s17 = smov [#allocation7]  }
   0x3   :  { %s36_s18 = sshll.u32 %s5707_s17, 4  ;;  %s37_s18 = int_to_ptr.vmem [resolvable:$true] %s36_s18 }
   0x4   :  { %s5629_s19 = scalar_lea.vmem %s37_s18, 30720  ;;  %p5634_p1 = scmp.lt.s32.totalorder %s37_s18, %s37_s18 }
   0x5   :  { %p5630_p0 = scmp.ne.s32.totalorder %s37_s18, %s5629_s19  ;;  %p5635_p2 = scmp.lt.s32.totalorder %s5629_s19, %s5629_s19 }
   0x7   :  { %p5636_p3 = por %p5635_p2, %p5634_p1 }
   0x9   :  { %p5637_p4 = pnand %p5636_p3, %p5630_p0 }
   0xb   :  { %5640 = shalt.err (!%p5637_p4)
}
   0xc   :  { %s5708_s20 = smov 128   ;;  %s5709_s21 = smov 8  }
   0xd   :  { %42 = dma.hbm_to_vmem [thread:$0]  %s6646_s1, 30720, %s37_s18, [#allocation8], %s5708_s20, %s5708_s20, %s5709_s21  }
   0xe   :  { %s5710_s24 = smov [#allocation4]  }
   0xf   :  { %s24_s25 = sshll.u32 %s5710_s24, 4  ;;  %s25_s25 = int_to_ptr.vmem [resolvable:$true] %s24_s25 }
  0x10   :  { %s5649_s26 = scalar_lea.vmem %s25_s25, 512  ;;  %p5654_p6 = scmp.lt.s32.totalorder %s25_s25, %s25_s25 }
  0x11   :  { %p5650_p5 = scmp.ne.s32.totalorder %s25_s25, %s5649_s26  ;;  %p5655_p7 = scmp.lt.s32.totalorder %s5649_s26, %s5649_s26 }
  0x13   :  { %p5656_p8 = por %p5655_p7, %p5654_p6 }
  0x15   :  { %p5657_p9 = pnand %p5656_p8, %p5650_p5 }
  0x17   :  { %5660 = shalt.err (!%p5657_p9)
}
  0x18   :  { %s5711_s27 = smov 256   ;;  %s5712_s28 = smov 16  }
  0x19   :  { %30 = dma.hbm_to_vmem [thread:$0]  %s6645_s0, 512, %s25_s25, [#allocation5], %s5711_s27, %s5711_s27, %s5712_s28  }
  0x1a   :  { %s5713_s1 = smov [#allocation9]  }
  0x1b   :  { %s54_s12 = sshll.u32 %s5713_s1, 4  ;;  %s55_s12 = int_to_ptr.vmem [resolvable:$true] %s54_s12 }
  0x1c   :  { %s5669_s13 = scalar_lea.vmem %s55_s12, 15360  ;;  %p5674_p11 = scmp.lt.s32.totalorder %s55_s12, %s55_s12 }
  0x1d   :  { %p5670_p10 = scmp.ne.s32.totalorder %s55_s12, %s5669_s13  ;;  %p5675_p12 = scmp.lt.s32.totalorder %s5669_s13, %s5669_s13 }
  0x1f   :  { %p5676_p13 = por %p5675_p12, %p5674_p11 }
  0x21   :  { %p5677_p0 = pnand %p5676_p13, %p5670_p10 }
  0x23   :  { %5680 = shalt.err (!%p5677_p0)
}
  0x24   :  { %60 = dma.hbm_to_vmem [thread:$0]  %s6650_s5, 15360, %s55_s12, [#allocation8], %s5708_s20, %s5708_s20, %s5709_s21  }
  0x25   :  { %5701 = dma.done.wait [#allocation5], 512  }
  0x26   :  { %5702 = vsyncadd [#allocation5], 4294966784 }
  0x27   :  { %5703 = dma.done.wait [#allocation8], 46080  }
  0x28   :  { %5704 = vsyncadd [#allocation8], 4294921216  ;;  %v6657_v0 = vmov 0   ;;  %vm146_vm0 = vcmask 516096   ;;  %v81_v1 = vld [vmem:[#allocation4] sm:$0xff]  ;;  %v82_v2 = vld [vmem:[#allocation4 + $0x8] sm:$0xff] }
  0x29   :  { %85 = vst [vmem:[#allocation2] sm:$0xff] %v6657_v0  ;;  %86 = vst [vmem:[#allocation2 + $0x8] sm:$0xf] %v6657_v0  ;;  %643 = vmatprep.mubr.bf16.mxu1 %v6657_v0  ;;  %v83_v3 = vld [vmem:[#allocation4 + $0x10] sm:$0xff]  ;;  %v4907_v4 = vpack.c.bf16 %v82_v2, %v81_v1  ;;  %v84_v5 = vld [vmem:[#allocation4 + $0x18] sm:$0xff]  ;;  %s5715_s0 = smov 64  }
  0x2a   :  { %87 = vst [vmem:[#allocation2 + $0xc] sm:$0x33] %v6657_v0  ;;  %88 = vst [vmem:[#allocation2 + $0x14] sm:$0x3] %v6657_v0  ;;  %v4908_v6 = vpack.c.bf16 %v84_v5, %v83_v3  ;;  %v5049_v7 = vld [vmem:[#allocation7 + $0x1f4] ss:$8 sps:$4 sm:$0xff]  }
  0x2b   :  { %89 = vst [vmem:[#allocation2 + $0x18] sm:$0xff] %v6657_v0  ;;  %90 = vst [vmem:[#allocation2 + $0x20] sm:$0xf] %v6657_v0  ;;  %v5051_v8 = vld [vmem:[#allocation7 + $0x1f0] ss:$8 sps:$4 sm:$0xff]   ;;  %v107_v9 = vrot.slane %v4907_v4, 7  ;;  %568 = vmatprep.subr.bf16.mxu0 %v5049_v7 }
  0x2c   :  { %91 = vst [vmem:[#allocation2 + $0x24] sm:$0x33] %v6657_v0  ;;  %92 = vst [vmem:[#allocation2 + $0x2c] sm:$0x3] %v6657_v0  ;;  %v5052_v10 = vld [vmem:[#allocation7 + $0x1e4] ss:$8 sps:$4 sm:$0xff]   ;;  %569 = vmatpush1.bf16.msra.mxu0 %v5051_v8 }
  0x2d   :  { %2838 = vst [vmem:[#allocation3 + $0xc] sm:$0x11] %v6657_v0  ;;  %2842 = vst [vmem:[#allocation3 + $0x24] sm:$0x11] %v6657_v0  ;;  %v109_v11 = vrot.slane %v4908_v6, 7  ;;  %111 = vrot.lane.b32.xlu0 %v107_v9, %s5715_s0  ;;  %v108_v12 = vrot.slane %v107_v9, 4  ;;  %570 = vmatprep.subr.bf16.mxu0 %v5052_v10 }
  0x2e   :  { %2839 = vst.msk [vmem:[#allocation3 + $0x14] sm:$0x1] %vm146_vm0, %v6657_v0  ;;  %2843 = vst.msk [vmem:[#allocation3 + $0x2c] sm:$0x1] %vm146_vm0, %v6657_v0  ;;  %v5054_v13 = vld [vmem:[#allocation7 + $0x1e0] ss:$8 sps:$4 sm:$0xff]  }
  0x2f   :  { %v5055_v14 = vld [vmem:[#allocation7 + $0x1d4] ss:$8 sps:$4 sm:$0xff]   ;;  %113 = vrot.lane.b32.xlu1 %v108_v12, %s5715_s0  ;;  %v110_v15 = vrot.slane %v109_v11, 4  ;;  %v5057_v16 = vld [vmem:[#allocation7 + $0x1d0] ss:$8 sps:$4 sm:$0xff]   ;;  %vm136_vm1 = vcmask 1043969  }
  0x30   :  { %571 = vmatpush1.bf16.msra.mxu0 %v5054_v13  ;;  %v5058_v17 = vld [vmem:[#allocation7 + $0x1c4] ss:$8 sps:$4 sm:$0xff]   ;;  %v5060_v18 = vld [vmem:[#allocation7 + $0x1c0] ss:$8 sps:$4 sm:$0xff]   ;;  %v5073_v19 = vld [vmem:[#allocation7 + $0x2f4] ss:$8 sps:$4 sm:$0xff]  }
  0x31   :  { %115 = vrot.lane.b32.xlu0 %v109_v11, %s5715_s0  ;;  %572 = vmatprep.subr.bf16.mxu0 %v5055_v14  ;;  %v5075_v20 = vld [vmem:[#allocation7 + $0x2f0] ss:$8 sps:$4 sm:$0xff]   ;;  %v5061_v21 = vld [vmem:[#allocation7 + $0x1b4] ss:$8 sps:$4 sm:$0xff]   ;;  %v5079_v22 = vld [vmem:[#allocation7 + $0x2e4] ss:$8 sps:$4 sm:$0xff]  }
  0x32   :  { %611 = vmatprep.subr.bf16.mxu1 %v5073_v19  ;;  %v5081_v23 = vld [vmem:[#allocation7 + $0x2e0] ss:$8 sps:$4 sm:$0xff]   ;;  %v5063_v24 = vld [vmem:[#allocation7 + $0x1b0] ss:$8 sps:$4 sm:$0xff]   ;;  %v5064_v25 = vld [vmem:[#allocation7 + $0x1a4] ss:$8 sps:$4 sm:$0xff]  }
  0x33   :  { %117 = vrot.lane.b32.xlu1 %v110_v15, %s5715_s0  ;;  %612 = vmatpush1.bf16.msra.mxu1 %v5075_v20  ;;  %v5085_v26 = vld [vmem:[#allocation7 + $0x2d4] ss:$8 sps:$4 sm:$0xff]   ;;  %v5087_v27 = vld [vmem:[#allocation7 + $0x2d0] ss:$8 sps:$4 sm:$0xff]   ;;  %v5091_v28 = vld [vmem:[#allocation7 + $0x2c4] ss:$8 sps:$4 sm:$0xff]  }
  0x34   :  { %573 = vmatpush1.bf16.msra.mxu0 %v5057_v16  ;;  %613 = vmatprep.subr.bf16.mxu1 %v5079_v22  ;;  %v5066_v29 = vld [vmem:[#allocation7 + $0x1a0] ss:$8 sps:$4 sm:$0xff]   ;;  %v5067_v30 = vld [vmem:[#allocation7 + $0x194] ss:$8 sps:$4 sm:$0xff]   ;;  %v5069_v33 = vld [vmem:[#allocation7 + $0x190] ss:$8 sps:$4 sm:$0xff]  }
  0x35   :  { %574 = vmatprep.subr.bf16.mxu0 %v5058_v17  ;;  %v5093_v31 = vld [vmem:[#allocation7 + $0x2c0] ss:$8 sps:$4 sm:$0xff]   ;;  %v5097_v32 = vld [vmem:[#allocation7 + $0x2b4] ss:$8 sps:$4 sm:$0xff]   ;;  %v5070_v34 = vld [vmem:[#allocation7 + $0x184] ss:$8 sps:$4 sm:$0xff]  }
  0x36   :  { %v5099_v35 = vld [vmem:[#allocation7 + $0x2b0] ss:$8 sps:$4 sm:$0xff]   ;;  %v5103_v36 = vld [vmem:[#allocation7 + $0x2a4] ss:$8 sps:$4 sm:$0xff]   ;;  %v5072_v37 = vld [vmem:[#allocation7 + $0x180] ss:$8 sps:$4 sm:$0xff]  }
  0x37   :  { %614 = vmatpush1.bf16.msra.mxu1 %v5081_v23  ;;  %v5076_v38 = vld [vmem:[#allocation7 + $0x274] ss:$8 sps:$4 sm:$0xff]   ;;  %v5105_v39 = vld [vmem:[#allocation7 + $0x2a0] ss:$8 sps:$4 sm:$0xff]   ;;  %v5078_v41 = vld [vmem:[#allocation7 + $0x270] ss:$8 sps:$4 sm:$0xff]  }
  0x38   :  { %575 = vmatpush1.bf16.msra.mxu0 %v5060_v18  ;;  %615 = vmatprep.subr.bf16.mxu1 %v5085_v26  ;;  %v5109_v40 = vld [vmem:[#allocation7 + $0x294] ss:$8 sps:$4 sm:$0xff]   ;;  %v5082_v42 = vld [vmem:[#allocation7 + $0x264] ss:$8 sps:$4 sm:$0xff]   ;;  %v5111_v43 = vld [vmem:[#allocation7 + $0x290] ss:$8 sps:$4 sm:$0xff]  }
  0x39   :  { %576 = vmatprep.subr.bf16.mxu0 %v5061_v21  ;;  %v5115_v44 = vld [vmem:[#allocation7 + $0x284] ss:$8 sps:$4 sm:$0xff]   ;;  %v5084_v45 = vld [vmem:[#allocation7 + $0x260] ss:$8 sps:$4 sm:$0xff]   ;;  %v5088_v46 = vld [vmem:[#allocation7 + $0x254] ss:$8 sps:$4 sm:$0xff]  }
  0x3a   :  { %v5117_v47 = vld [vmem:[#allocation7 + $0x280] ss:$8 sps:$4 sm:$0xff]   ;;  %v5123_v48 = vld [vmem:[#allocation7 + $0x74] ss:$8 sps:$4 sm:$0xff]   ;;  %v5090_v49 = vld [vmem:[#allocation7 + $0x250] ss:$8 sps:$4 sm:$0xff]  }
  0x3b   :  { %616 = vmatpush1.bf16.msra.mxu1 %v5087_v27  ;;  %v5094_v50 = vld [vmem:[#allocation7 + $0x244] ss:$8 sps:$4 sm:$0xff]   ;;  %v5096_v51 = vld [vmem:[#allocation7 + $0x240] ss:$8 sps:$4 sm:$0xff]   ;;  %v5100_v52 = vld [vmem:[#allocation7 + $0x234] ss:$8 sps:$4 sm:$0xff]  }
  0x3c   :  { %577 = vmatpush1.bf16.msra.mxu0 %v5063_v24  ;;  %617 = vmatprep.subr.bf16.mxu1 %v5091_v28  ;;  %v5102_v53 = vld [vmem:[#allocation7 + $0x230] ss:$8 sps:$4 sm:$0xff]   ;;  %v5106_v54 = vld [vmem:[#allocation7 + $0x224] ss:$8 sps:$4 sm:$0xff]   ;;  %v5108_v55 = vld [vmem:[#allocation7 + $0x220] ss:$8 sps:$4 sm:$0xff]  }
  0x3d   :  { %578 = vmatprep.subr.bf16.mxu0 %v5064_v25  ;;  %v5112_v56 = vld [vmem:[#allocation7 + $0x214] ss:$8 sps:$4 sm:$0xff]   ;;  %v5114_v57 = vld [vmem:[#allocation7 + $0x210] ss:$8 sps:$4 sm:$0xff]   ;;  %v5118_v58 = vld [vmem:[#allocation7 + $0x204] ss:$8 sps:$4 sm:$0xff]  }
  0x3e   :  { %v5120_v59 = vld [vmem:[#allocation7 + $0x200] ss:$8 sps:$4 sm:$0xff]   ;;  %v5127_v60 = vld [vmem:[#allocation7 + $0x174] ss:$8 sps:$4 sm:$0xff]   ;;  %vm137_vm2 = vcmask 1047557   ;;  %vm6683_vm3 = vcmask 523264  }
  0x3f   :  { %618 = vmatpush1.bf16.msra.mxu1 %v5093_v31  ;;  %vm140_vm4 = vcmask 519169   ;;  %vm142_vm5 = vcmask 1040896   ;;  %vm143_vm6 = vcmask 1044484   ;;  %vm5808_vm7 = vmor %vm137_vm2, %vm136_vm1  ;;  %vm208_vm9 = vsmask.f32 3328 }
  0x40   :  { %579 = vmatpush1.bf16.msra.mxu0 %v5066_v29  ;;  %619 = vmatprep.subr.bf16.mxu1 %v5097_v32  ;;  %vm144_vm8 = vmor %vm143_vm6, %vm142_vm5  ;;  %vm209_vm10 = vsmask.f32 7440  ;;  %vm1008_vm12 = vcmask 1042432   ;;  %vm1009_vm13 = vcmask 1046532   ;;  %vm1900_vm15 = vcmask 1041408  }
  0x41   :  { %580 = vmatprep.subr.bf16.mxu0 %v5067_v30  ;;  %vm5852_vm11 = vmor %vm208_vm9, %vm209_vm10  ;;  %vm1422_vm2 = vsmask.f32 2304  ;;  %vm2895_vm9 = vcmask 1043712   ;;  %vm2896_vm10 = vsmask.f32 7938 }
  0x42   :  { %vm5867_vm14 = vmor %vm1008_vm12, %vm1009_vm13  ;;  %vm2898_vm12 = vcmask 1047556   ;;  %vm2899_vm13 = vsmask.f32 7954 }
  0x43   :  { %620 = vmatpush1.bf16.msra.mxu1 %v5099_v35 }
  0x44   :  { %581 = vmatpush1.bf16.msra.mxu0 %v5069_v33  ;;  %621 = vmatprep.subr.bf16.mxu1 %v5103_v36 }
  0x45   :  { %582 = vmatprep.subr.bf16.mxu0 %v5070_v34 }
  0x47   :  { %622 = vmatpush1.bf16.msra.mxu1 %v5105_v39 }
  0x48   :  { %583 = vmatpush1.bf16.msra.mxu0 %v5072_v37  ;;  %623 = vmatprep.subr.bf16.mxu1 %v5109_v40 }
  0x49   :  { %584 = vmatprep.subr.bf16.mxu0 %v5076_v38 }
  0x4b   :  { %624 = vmatpush1.bf16.msra.mxu1 %v5111_v43 }
  0x4c   :  { %585 = vmatpush2.bf16.msra.mxu0 %v5078_v41  ;;  %625 = vmatprep.subr.bf16.mxu1 %v5115_v44 }
  0x4d   :  { %586 = vmatprep.subr.bf16.mxu0 %v5082_v42 }
  0x4f   :  { %626 = vmatpush1.bf16.msra.mxu1 %v5117_v47 }
  0x50   :  { %587 = vmatpush2.bf16.msra.mxu0 %v5084_v45  ;;  %910 = vmatprep.subr.bf16.mxu1 %v5123_v48  ;;  %v6686_v45 = vmov 0 }
  0x51   :  { %588 = vmatprep.subr.bf16.mxu0 %v5088_v46  ;;  %v6687_v45 = vsel %vm5852_vm11, 4294967295, %v6686_v45 }
  0x52   :  { %6688 = vst [vmem:[#allocation14_spill] sm:$0xff] %v6687_v45 }
  0x54   :  { %589 = vmatpush2.bf16.msra.mxu0 %v5090_v49 }
  0x55   :  { %590 = vmatprep.subr.bf16.mxu0 %v5094_v50 }
  0x58   :  { %591 = vmatpush2.bf16.msra.mxu0 %v5096_v51 }
  0x59   :  { %592 = vmatprep.subr.bf16.mxu0 %v5100_v52 }
  0x5c   :  { %593 = vmatpush2.bf16.msra.mxu0 %v5102_v53 }
  0x5d   :  { %594 = vmatprep.subr.bf16.mxu0 %v5106_v54 }
  0x60   :  { %595 = vmatpush2.bf16.msra.mxu0 %v5108_v55 }
  0x61   :  { %596 = vmatprep.subr.bf16.mxu0 %v5112_v56 }
  0x64   :  { %597 = vmatpush2.bf16.msra.mxu0 %v5114_v57  ;;  %v5121_v57 = vld [vmem:[#allocation7 + $0x70] ss:$8 sps:$4 sm:$0xff]  }
  0x65   :  { %598 = vmatprep.subr.bf16.mxu0 %v5118_v58 }
  0x68   :  { %599 = vmatpush2.bf16.msra.mxu0 %v5120_v59 }
  0x69   :  { %953 = vmatprep.subr.bf16.mxu0 %v5127_v60  ;;  %v6689_v60 = vmov 0 }
  0x6a   :  { %v6690_v60 = vsel %vm5867_vm14, 4294967295, %v6689_v60 }
  0x6b   :  { %6691 = vst [vmem:[#allocation15_spill] sm:$0xff] %v6690_v60  ;;  %v2312_v60 = vlaneseq }
  0x9f   :  { %v112_v61 = vpop.permute.xlu0 %111 }
  0xa0   :  { %v119_v63 = vrot.slane %v112_v61, 4 }
  0xa1   :  { %v114_v1 = vpop.permute.xlu1 %113 }
  0xa2   :  { %v124_v2 = vsel %vm6683_vm3, %v119_v63, %v112_v61  ;;  %141 = vst.msk [vmem:[#allocation2 + $0x8] sm:$0xe] %vm140_vm4, %v119_v63  ;;  %v120_v3 = vrot.slane %v114_v1, 4 }
  0xa3   :  { %139 = vst.msk [vmem:[#allocation2] sm:$0xee] %vm5808_vm7, %v124_v2  ;;  %v116_v4 = vpop.permute.xlu0 %115 }
  0xa4   :  { %v125_v5 = vsel %vm6683_vm3, %v120_v3, %v114_v1  ;;  %147 = vst.msk [vmem:[#allocation2 + $0x14] sm:$0x1] %vm146_vm0, %v120_v3  ;;  %v121_v6 = vrot.slane %v116_v4, 4 }
  0xa5   :  { %145 = vst.msk [vmem:[#allocation2 + $0xc] sm:$0x11] %vm144_vm8, %v125_v5  ;;  %v118_v7 = vpop.permute.xlu1 %117  ;;  %v5125_v5 = vld [vmem:[#allocation7 + $0x170] ss:$8 sps:$4 sm:$0xff]  }
  0xa6   :  { %v126_v8 = vsel %vm6683_vm3, %v121_v6, %v116_v4  ;;  %149 = vst.msk [vmem:[#allocation2 + $0x20] sm:$0xe] %vm140_vm4, %v121_v6  ;;  %v122_v9 = vrot.slane %v118_v7, 4  ;;  %v5130_v6 = vld [vmem:[#allocation7 + $0x64] ss:$8 sps:$4 sm:$0xff]  }
  0xa7   :  { %148 = vst.msk [vmem:[#allocation2 + $0x18] sm:$0xee] %vm5808_vm7, %v126_v8  ;;  %v5133_v8 = vld [vmem:[#allocation7 + $0x164] ss:$8 sps:$4 sm:$0xff]   ;;  %vm1423_vm4 = vsmask.f32 6416 }
  0xa8   :  { %v127_v10 = vsel %vm6683_vm3, %v122_v9, %v118_v7  ;;  %151 = vst.msk [vmem:[#allocation2 + $0x2c] sm:$0x1] %vm146_vm0, %v122_v9  ;;  %vm1901_vm0 = vcmask 1045508   ;;  %vm5946_vm5 = vmor %vm1422_vm2, %vm1423_vm4  ;;  %vm2452_vm7 = vcmask 261120   ;;  %vm2910_vm2 = vcmask 1040640  }
  0xa9   :  { %150 = vst.msk [vmem:[#allocation2 + $0x24] sm:$0x11] %vm144_vm8, %v127_v10  ;;  %v5825_v11 = vld [vmem:[#allocation2 + $0x8] sm:$0xf]  ;;  %vm5894_vm1 = vmor %vm1900_vm15, %vm1901_vm0  ;;  %vm2836_vm8 = vcmask 519168  }
  0xaa   :  { %v226_v12 = vshrl.u32 %v5825_v11, 16  ;;  %v229_v13 = vshll.u32 %v5825_v11, 16  ;;  %v5829_v14 = vld [vmem:[#allocation2] sm:$0xff]  ;;  %v5856_v48 = vld [vmem:[#allocation2 + $0x8] sm:$0xe]  ;;  %vm6340_vm15 = vmand %vm2895_vm9, %vm2896_vm10 }
  0xab   :  { %v5831_v15 = vld [vmem:[#allocation2 + $0x14] sm:$0x1]  ;;  %v212_v16 = vshrl.u32 %v5829_v14, 16  ;;  %v215_v17 = vshll.u32 %v5829_v14, 16  ;;  %v4596_v61 = vrot.slane %v5856_v48, 9  ;;  %vm6344_vm0 = vmand %vm2898_vm12, %vm2899_vm13  ;;  %vm2920_vm12 = vcmask 253952  }
  0xac   :  { %v228_v18 = vrot.slane %v226_v12, 4  ;;  %v231_v19 = vrot.slane %v229_v13, 5  ;;  %v235_v20 = vshll.u32 %v5831_v15, 16  ;;  %v5838_v22 = vld [vmem:[#allocation2 + $0xc] sm:$0x11]  ;;  %v1017_v50 = vrot.slane %v5831_v15, 5 }
  0xad   :  { %v5836_v21 = vld [vmem:[#allocation2 + $0x20] sm:$0xf]  ;;  %v214_v23 = vrot.slane %v212_v16, 4  ;;  %v217_v24 = vrot.slane %v215_v17, 5  ;;  %v221_v37 = vshll.u32 %v5838_v22, 16 }
  0xae   :  { %v232_v25 = vor.u32 %v231_v19, %v228_v18  ;;  %v254_v26 = vshrl.u32 %v5836_v21, 16  ;;  %v257_v27 = vshll.u32 %v5836_v21, 16  ;;  %v5842_v28 = vld [vmem:[#allocation2 + $0x18] sm:$0xff]  ;;  %v237_v38 = vrot.slane %v235_v20, 5  ;;  %v5859_v52 = vld [vmem:[#allocation2 + $0x20] sm:$0xe] }
  0xaf   :  { %v207_v29 = vld [vmem:[#allocation2 + $0x2c] sm:$0x1]  ;;  %v218_v30 = vor.u32 %v217_v24, %v214_v23  ;;  %v240_v31 = vshrl.u32 %v5842_v28, 16  ;;  %v243_v32 = vshll.u32 %v5842_v28, 16  ;;  %v223_v51 = vrot.slane %v221_v37, 5 }
  0xb0   :  { %v256_v33 = vrot.slane %v254_v26, 4  ;;  %v259_v34 = vrot.slane %v257_v27, 5  ;;  %v263_v35 = vshll.u32 %v207_v29, 16  ;;  %v5846_v36 = vld [vmem:[#allocation2 + $0x24] sm:$0x11]  ;;  %v233_v41 = vrot.slane %v232_v25, 4 }
  0xb1   :  { %v242_v39 = vrot.slane %v240_v31, 4  ;;  %v245_v40 = vrot.slane %v243_v32, 5  ;;  %v249_v44 = vshll.u32 %v5846_v36, 16  ;;  %v219_v46 = vrot.slane %v218_v30, 4  ;;  %v5128_v12 = vld [vmem:[#allocation7 + $0x60] ss:$8 sps:$4 sm:$0xff]  }
  0xb2   :  { %v260_v42 = vor.u32 %v259_v34, %v256_v33  ;;  %v265_v43 = vrot.slane %v263_v35, 5  ;;  %v1025_v53 = vrot.slane %v207_v29, 5  ;;  %v4544_v56 = vcombine.low %v5829_v14, %v5842_v28  ;;  %v5136_v15 = vld [vmem:[#allocation7 + $0x54] ss:$8 sps:$4 sm:$0xff]   ;;  %v5131_v16 = vld [vmem:[#allocation7 + $0x160] ss:$8 sps:$4 sm:$0xff]  }
  0xb3   :  { %v246_v47 = vor.u32 %v245_v40, %v242_v39  ;;  %v251_v55 = vrot.slane %v249_v44, 5  ;;  %v238_v58 = vsel %vm5852_vm11, %v233_v41, %v237_v38  ;;  %v224_v63 = vsel %vm5852_vm11, %v219_v46, %v223_v51  ;;  %v5139_v17 = vld [vmem:[#allocation7 + $0x154] ss:$8 sps:$4 sm:$0xff]   ;;  %v5134_v18 = vld [vmem:[#allocation7 + $0x50] ss:$8 sps:$4 sm:$0xff]  }
  0xb4   :  { %v261_v49 = vrot.slane %v260_v42, 4  ;;  %v4598_v2 = vrot.slane %v5859_v52, 9  ;;  %v4545_v7 = vcombine.high %v5829_v14, %v5842_v28  ;;  %v5881_v9 = vsel %vm5867_vm14, %v4596_v61, %v1017_v50  ;;  %v5142_v19 = vld [vmem:[#allocation7 + $0x44] ss:$8 sps:$4 sm:$0xff]   ;;  %v5137_v20 = vld [vmem:[#allocation7 + $0x150] ss:$8 sps:$4 sm:$0xff]  }
  0xb5   :  { %v247_v54 = vrot.slane %v246_v47, 4  ;;  %v5145_v23 = vld [vmem:[#allocation7 + $0x144] ss:$8 sps:$4 sm:$0xff]   ;;  %v5140_v24 = vld [vmem:[#allocation7 + $0x40] ss:$8 sps:$4 sm:$0xff]  }
  0xb6   :  { %v266_v59 = vsel %vm5852_vm11, %v261_v49, %v265_v43  ;;  %v5885_v10 = vsel %vm5867_vm14, %v4598_v2, %v1025_v53  ;;  %v5148_v25 = vld [vmem:[#allocation7 + $0x34] ss:$8 sps:$4 sm:$0xff]   ;;  %v5143_v26 = vld [vmem:[#allocation7 + $0x140] ss:$8 sps:$4 sm:$0xff]   ;;  %v5146_v29 = vld [vmem:[#allocation7 + $0x30] ss:$8 sps:$4 sm:$0xff]  }
  0xb7   :  { %v4495_v62 = vcombine.low %v238_v58, %v266_v59  ;;  %v252_v1 = vsel %vm5852_vm11, %v247_v54, %v251_v55  ;;  %v4601_v13 = vcombine.low %v5881_v9, %v5885_v10  ;;  %v5151_v27 = vld [vmem:[#allocation7 + $0x134] ss:$8 sps:$4 sm:$0xff]   ;;  %v5149_v30 = vld [vmem:[#allocation7 + $0x130] ss:$8 sps:$4 sm:$0xff]   ;;  %v5154_v31 = vld [vmem:[#allocation7 + $0x24] ss:$8 sps:$4 sm:$0xff]  }
  0xb8   :  { %v4493_v3 = vcombine.low %v224_v63, %v252_v1  ;;  %v4494_v4 = vcombine.high %v224_v63, %v252_v1  ;;  %v5157_v32 = vld [vmem:[#allocation7 + $0x124] ss:$8 sps:$4 sm:$0xff]   ;;  %v5152_v33 = vld [vmem:[#allocation7 + $0x20] ss:$8 sps:$4 sm:$0xff]   ;;  %v5890_v34 = vld [vmem:[#allocation2 + $0x14] sm:$0x3] }
  0xb9   :  { %644 = vmatmul.mubr.bf16.vlgmr.msra.gmra.mxu1 %v4495_v62  ;;  %v5892_v35 = vld [vmem:[#allocation2 + $0x2c] sm:$0x3]  ;;  %v5155_v37 = vld [vmem:[#allocation7 + $0x120] ss:$8 sps:$4 sm:$0xff]   ;;  %v5160_v38 = vld [vmem:[#allocation7 + $0x14] ss:$8 sps:$4 sm:$0xff]  }
  0xba   :  { %911 = vmatpush1.bf16.msra.mxu1 %v5121_v57  ;;  %600 = vmatprep.mubr.bf16.mxu0 %v4494_v4  ;;  %v5158_v39 = vld [vmem:[#allocation7 + $0x10] ss:$8 sps:$4 sm:$0xff]   ;;  %v5163_v40 = vld [vmem:[#allocation7 + $0x114] ss:$8 sps:$4 sm:$0xff]   ;;  %v1909_v42 = vrot.slane %v5890_v34, 6  ;;  %v1917_v43 = vrot.slane %v5892_v35, 6 }
  0xbb   :  { %942 = vmatprep.mubr.bf16.mxu1 %v4545_v7  ;;  %601 = vmatmul.mubr.bf16.vlgmr.msra.gmra.mxu0 %v4493_v3  ;;  %v1889_v44 = vld [vmem:[#allocation2 + $0x8] sm:$0xc]  ;;  %v1891_v46 = vld [vmem:[#allocation2 + $0x20] sm:$0xc]  ;;  %v5161_v47 = vld [vmem:[#allocation7 + $0x110] ss:$8 sps:$4 sm:$0xff]  }
  0xbc   :  { %954 = vmatpush1.bf16.msra.mxu0 %v5125_v5  ;;  %912 = vmatprep.subr.bf16.mxu1 %v5130_v6  ;;  %v5166_v49 = vld [vmem:[#allocation7 + $0x4] ss:$8 sps:$4 sm:$0xff]   ;;  %v4702_v50 = vrot.slane %v1889_v44, 10  ;;  %v4704_v51 = vrot.slane %v1891_v46, 10  ;;  %v5164_v53 = vld [vmem:[#allocation7] ss:$8 sps:$4 sm:$0xff]  }
  0xbd   :  { %955 = vmatprep.subr.bf16.mxu0 %v5133_v8  ;;  %985 = vmatprep.mubr.bf16.mxu0 %v6657_v0  ;;  %v5169_v54 = vld [vmem:[#allocation7 + $0x104] ss:$8 sps:$4 sm:$0xff]   ;;  %v5167_v59 = vld [vmem:[#allocation7 + $0x100] ss:$8 sps:$4 sm:$0xff]   ;;  %v5172_v61 = vld [vmem:[#allocation7 + $0xf4] ss:$8 sps:$4 sm:$0xff]  }
  0xbe   :  { %913 = vmatpush1.bf16.msra.mxu1 %v5128_v12  ;;  %v5902_v55 = vsel %vm5894_vm1, %v4702_v50, %v1909_v42  ;;  %v5906_v57 = vsel %vm5894_vm1, %v4704_v51, %v1917_v43  ;;  %v5910_v62 = vld [vmem:[#allocation2 + $0x18] sm:$0xee]  ;;  %v1021_v63 = vrot.slane %v5846_v36, 5  ;;  %v5913_v3 = vld [vmem:[#allocation2] sm:$0xee]  ;;  %v1013_v4 = vrot.slane %v5838_v22, 5 }
  0xbf   :  { %914 = vmatprep.subr.bf16.mxu1 %v5136_v15  ;;  %v4707_v58 = vcombine.low %v5902_v55, %v5906_v57  ;;  %v5170_v1 = vld [vmem:[#allocation7 + $0xf0] ss:$8 sps:$4 sm:$0xff]   ;;  %v5176_v2 = vld [vmem:[#allocation7 + $0x374] ss:$8 sps:$4 sm:$0xff]   ;;  %v4597_v5 = vrot.slane %v5910_v62, 9  ;;  %v4595_v8 = vrot.slane %v5913_v3, 9  ;;  %v4546_v12 = vcombine.low %v5825_v11, %v5836_v21 }
  0xc0   :  { %956 = vmatpush1.bf16.msra.mxu0 %v5131_v16  ;;  %v5174_v6 = vld [vmem:[#allocation7 + $0x370] ss:$8 sps:$4 sm:$0xff]   ;;  %v5179_v7 = vld [vmem:[#allocation7 + $0xe4] ss:$8 sps:$4 sm:$0xff]   ;;  %v5177_v15 = vld [vmem:[#allocation7 + $0xe0] ss:$8 sps:$4 sm:$0xff]  }
  0xc1   :  { %957 = vmatprep.subr.bf16.mxu0 %v5139_v17  ;;  %v5920_v36 = vsel %vm5867_vm14, %v4597_v5, %v1021_v63  ;;  %v5926_v22 = vsel %vm5867_vm14, %v4595_v8, %v1013_v4  ;;  %v5182_v16 = vld [vmem:[#allocation7 + $0x364] ss:$8 sps:$4 sm:$0xff]   ;;  %v5186_v11 = vld [vmem:[#allocation7 + $0x350] ss:$8 sps:$4 sm:$0xff]   ;;  %v5212_v42 = vld [vmem:[#allocation7 + $0x314] ss:$8 sps:$4 sm:$0xff]  }
  0xc2   :  { %915 = vmatpush1.bf16.msra.mxu1 %v5134_v18  ;;  %v4600_v17 = vcombine.high %v5926_v22, %v5920_v36  ;;  %v5180_v18 = vld [vmem:[#allocation7 + $0x360] ss:$8 sps:$4 sm:$0xff]   ;;  %v5191_v21 = vld [vmem:[#allocation7 + $0xc4] ss:$8 sps:$4 sm:$0xff]   ;;  %v5210_v43 = vld [vmem:[#allocation7 + $0x310] ss:$8 sps:$4 sm:$0xff]  }
  0xc3   :  { %916 = vmatprep.subr.bf16.mxu1 %v5142_v19  ;;  %v5185_v19 = vld [vmem:[#allocation7 + $0xd4] ss:$8 sps:$4 sm:$0xff]   ;;  %v5215_v44 = vld [vmem:[#allocation7 + $0x84] ss:$8 sps:$4 sm:$0xff]   ;;  %v5213_v46 = vld [vmem:[#allocation7 + $0x80] ss:$8 sps:$4 sm:$0xff]  }
  0xc4   :  { %958 = vmatpush1.bf16.msra.mxu0 %v5137_v20  ;;  %v5183_v20 = vld [vmem:[#allocation7 + $0xd0] ss:$8 sps:$4 sm:$0xff]   ;;  %v5222_v50 = vld [vmem:[#allocation7 + $0x474] ss:$8 sps:$4 sm:$0xff]   ;;  %v5226_v63 = vld [vmem:[#allocation7 + $0x460] ss:$8 sps:$4 sm:$0xff]  }
  0xc5   :  { %959 = vmatprep.subr.bf16.mxu0 %v5145_v23  ;;  %v5188_v23 = vld [vmem:[#allocation7 + $0x354] ss:$8 sps:$4 sm:$0xff]   ;;  %v5220_v51 = vld [vmem:[#allocation7 + $0x470] ss:$8 sps:$4 sm:$0xff]   ;;  %v5243_v8 = vld [vmem:[#allocation7 + $0x3c4] ss:$8 sps:$4 sm:$0xff]  }
  0xc6   :  { %917 = vmatpush1.bf16.msra.mxu1 %v5140_v24  ;;  %v5189_v24 = vld [vmem:[#allocation7 + $0xc0] ss:$8 sps:$4 sm:$0xff]   ;;  %v5237_v4 = vld [vmem:[#allocation7 + $0x3d4] ss:$8 sps:$4 sm:$0xff]   ;;  %v5232_v5 = vld [vmem:[#allocation7 + $0x450] ss:$8 sps:$4 sm:$0xff]  }
  0xc7   :  { %918 = vmatprep.subr.bf16.mxu1 %v5148_v25  ;;  %v5194_v25 = vld [vmem:[#allocation7 + $0x344] ss:$8 sps:$4 sm:$0xff]   ;;  %v5246_v14 = vld [vmem:[#allocation7 + $0x434] ss:$8 sps:$4 sm:$0xff]   ;;  %v5241_v28 = vld [vmem:[#allocation7 + $0x3c0] ss:$8 sps:$4 sm:$0xff]  }
  0xc8   :  { %960 = vmatpush1.bf16.msra.mxu0 %v5143_v26  ;;  %v5192_v26 = vld [vmem:[#allocation7 + $0x340] ss:$8 sps:$4 sm:$0xff]   ;;  %v5283_v9 = vld [vmem:[#allocation7 + $0x5d0] ss:$8 sps:$4 sm:$0xff]   ;;  %v5291_v10 = vld [vmem:[#allocation7 + $0x5c4] ss:$8 sps:$4 sm:$0xff]  }
  0xc9   :  { %961 = vmatprep.subr.bf16.mxu0 %v5151_v27  ;;  %v5197_v27 = vld [vmem:[#allocation7 + $0xb4] ss:$8 sps:$4 sm:$0xff]   ;;  %v5336_v41 = vld [vmem:[#allocation7 + $0x544] ss:$8 sps:$4 sm:$0xff]   ;;  %vm2911_vm4 = vsmask.f32 256 }
  0xca   :  { %919 = vmatpush1.bf16.msra.mxu1 %v5146_v29  ;;  %v5195_v29 = vld [vmem:[#allocation7 + $0xb0] ss:$8 sps:$4 sm:$0xff]   ;;  %vm6353_vm9 = vmand %vm2910_vm2, %vm2911_vm4  ;;  %vm4276_vm2 = vcmask 15360  }
  0xcb   :  { %920 = vmatprep.subr.bf16.mxu1 %v5154_v31  ;;  %v5198_v31 = vld [vmem:[#allocation7 + $0x330] ss:$8 sps:$4 sm:$0xff]  }
  0xcc   :  { %962 = vmatpush1.bf16.msra.mxu0 %v5149_v30  ;;  %v5200_v30 = vld [vmem:[#allocation7 + $0x334] ss:$8 sps:$4 sm:$0xff]  }
  0xcd   :  { %963 = vmatprep.subr.bf16.mxu0 %v5157_v32  ;;  %v5203_v32 = vld [vmem:[#allocation7 + $0xa4] ss:$8 sps:$4 sm:$0xff]   ;;  %v6013_v55 = vld [vmem:[%s6654_s9 + $0xf0] sm:$0xff] }
  0xce   :  { %921 = vmatpush1.bf16.msra.mxu1 %v5152_v33  ;;  %v5201_v33 = vld [vmem:[#allocation7 + $0xa0] ss:$8 sps:$4 sm:$0xff]   ;;  %v6018_v57 = vld [vmem:[%s6654_s9 + $0x70] sm:$0xff] }
  0xcf   :  { %922 = vmatprep.subr.bf16.mxu1 %v5160_v38  ;;  %v5204_v38 = vld [vmem:[#allocation7 + $0x320] ss:$8 sps:$4 sm:$0xff]  }
  0xd0   :  { %964 = vmatpush1.bf16.msra.mxu0 %v5155_v37  ;;  %v5206_v37 = vld [vmem:[#allocation7 + $0x324] ss:$8 sps:$4 sm:$0xff]  }
  0xd1   :  { %965 = vmatprep.subr.bf16.mxu0 %v5163_v40  ;;  %v5207_v40 = vld [vmem:[#allocation7 + $0x90] ss:$8 sps:$4 sm:$0xff]  }
  0xd2   :  { %923 = vmatpush1.bf16.msra.mxu1 %v5158_v39  ;;  %v5209_v39 = vld [vmem:[#allocation7 + $0x94] ss:$8 sps:$4 sm:$0xff]  }
  0xd3   :  { %924 = vmatprep.subr.bf16.mxu1 %v5166_v49  ;;  %v5216_v49 = vld [vmem:[#allocation7 + $0x300] ss:$8 sps:$4 sm:$0xff]  }
  0xd4   :  { %966 = vmatpush1.bf16.msra.mxu0 %v5161_v47  ;;  %v5218_v47 = vld [vmem:[#allocation7 + $0x304] ss:$8 sps:$4 sm:$0xff]  }
  0xd5   :  { %967 = vmatprep.subr.bf16.mxu0 %v5169_v54  ;;  %v5223_v54 = vld [vmem:[#allocation7 + $0x3f0] ss:$8 sps:$4 sm:$0xff]  }
  0xd6   :  { %925 = vmatpush1.bf16.msra.mxu1 %v5164_v53  ;;  %v5225_v53 = vld [vmem:[#allocation7 + $0x3f4] ss:$8 sps:$4 sm:$0xff]  }
  0xd7   :  { %926 = vmatprep.subr.bf16.mxu1 %v5172_v61  ;;  %v5231_v61 = vld [vmem:[#allocation7 + $0x3e4] ss:$8 sps:$4 sm:$0xff]  }
  0xd8   :  { %968 = vmatpush1.bf16.msra.mxu0 %v5167_v59  ;;  %v5228_v59 = vld [vmem:[#allocation7 + $0x464] ss:$8 sps:$4 sm:$0xff]  }
  0xd9   :  { %1328 = vmatprep.subr.bf16.mxu0 %v5176_v2  ;;  %v5229_v2 = vld [vmem:[#allocation7 + $0x3e0] ss:$8 sps:$4 sm:$0xff]  }
  0xda   :  { %927 = vmatpush2.bf16.msra.mxu1 %v5170_v1  ;;  %v5234_v1 = vld [vmem:[#allocation7 + $0x454] ss:$8 sps:$4 sm:$0xff]  }
  0xdb   :  { %986 = vmatmul.mubr.bf16.vlgmr.msra.gmra.mxu0 %v4546_v12  ;;  %928 = vmatprep.subr.bf16.mxu1 %v5179_v7  ;;  %v5235_v7 = vld [vmem:[#allocation7 + $0x3d0] ss:$8 sps:$4 sm:$0xff]   ;;  %v5238_v12 = vld [vmem:[#allocation7 + $0x440] ss:$8 sps:$4 sm:$0xff]  }
  0xdc   :  { %1329 = vmatpush1.bf16.msra.mxu0 %v5174_v6  ;;  %1360 = vmatprep.mubr.bf16.mxu0 %v4600_v17  ;;  %v5240_v6 = vld [vmem:[#allocation7 + $0x444] ss:$8 sps:$4 sm:$0xff]   ;;  %v5244_v17 = vld [vmem:[#allocation7 + $0x430] ss:$8 sps:$4 sm:$0xff]  }
  0xdd   :  { %1330 = vmatprep.subr.bf16.mxu0 %v5182_v16  ;;  %v1465_v16 = vshll.u32 %v5910_v62, 16 }
  0xde   :  { %929 = vmatpush2.bf16.msra.mxu1 %v5177_v15  ;;  %v1462_v15 = vshrl.u32 %v5910_v62, 16 }
  0xdf   :  { %930 = vmatprep.subr.bf16.mxu1 %v5185_v19  ;;  %v5252_v19 = vld [vmem:[#allocation7 + $0x424] ss:$8 sps:$4 sm:$0xff]  }
  0xe0   :  { %1331 = vmatpush1.bf16.msra.mxu0 %v5180_v18  ;;  %v5936_v18 = vld [vmem:[#allocation2 + $0x24] sm:$0x33] }
  0xe1   :  { %1332 = vmatprep.subr.bf16.mxu0 %v5188_v23  ;;  %v1429_v23 = vshll.u32 %v5913_v3, 16  ;;  %v1471_v62 = vshrl.u32 %v5936_v18, 16 }
  0xe2   :  { %931 = vmatpush2.bf16.msra.mxu1 %v5183_v20  ;;  %v1426_v20 = vshrl.u32 %v5913_v3, 16 }
  0xe3   :  { %932 = vmatprep.subr.bf16.mxu1 %v5191_v21  ;;  %v5940_v21 = vld [vmem:[#allocation2 + $0xc] sm:$0x33] }
  0xe4   :  { %1333 = vmatpush1.bf16.msra.mxu0 %v5186_v11  ;;  %v5247_v11 = vld [vmem:[#allocation7 + $0x3b0] ss:$8 sps:$4 sm:$0xff]   ;;  %v1435_v3 = vshrl.u32 %v5940_v21, 16 }
  0xe5   :  { %1334 = vmatprep.subr.bf16.mxu0 %v5194_v25  ;;  %v1464_v25 = vrot.slane %v1462_v15, 5  ;;  %v5279_v15 = vld [vmem:[#allocation7 + $0x5e4] ss:$8 sps:$4 sm:$0xff]  }
  0xe6   :  { %933 = vmatpush2.bf16.msra.mxu1 %v5189_v24  ;;  %v5255_v24 = vld [vmem:[#allocation7 + $0x3a4] ss:$8 sps:$4 sm:$0xff]  }
  0xe7   :  { %934 = vmatprep.subr.bf16.mxu1 %v5197_v27  ;;  %v1474_v27 = vshll.u32 %v5936_v18, 16 }
  0xe8   :  { %1335 = vmatpush1.bf16.msra.mxu0 %v5192_v26  ;;  %v1467_v26 = vrot.slane %v1465_v16, 6  ;;  %v5274_v16 = vld [vmem:[#allocation7 + $0x4e0] ss:$8 sps:$4 sm:$0xff]  }
  0xe9   :  { %1336 = vmatprep.subr.bf16.mxu0 %v5200_v30  ;;  %v5258_v30 = vld [vmem:[#allocation7 + $0x414] ss:$8 sps:$4 sm:$0xff]  }
  0xea   :  { %935 = vmatpush2.bf16.msra.mxu1 %v5195_v29  ;;  %v5250_v29 = vld [vmem:[#allocation7 + $0x420] ss:$8 sps:$4 sm:$0xff]  }
  0xeb   :  { %936 = vmatprep.subr.bf16.mxu1 %v5203_v32  ;;  %v1431_v32 = vrot.slane %v1429_v23, 6  ;;  %v5294_v23 = vld [vmem:[#allocation7 + $0x4b4] ss:$8 sps:$4 sm:$0xff]  }
  0xec   :  { %1337 = vmatpush1.bf16.msra.mxu0 %v5198_v31  ;;  %v1428_v31 = vrot.slane %v1426_v20, 5  ;;  %v5285_v20 = vld [vmem:[#allocation7 + $0x5d4] ss:$8 sps:$4 sm:$0xff]  }
  0xed   :  { %1338 = vmatprep.subr.bf16.mxu0 %v5206_v37  ;;  %v5253_v37 = vld [vmem:[#allocation7 + $0x3a0] ss:$8 sps:$4 sm:$0xff]  }
  0xee   :  { %937 = vmatpush2.bf16.msra.mxu1 %v5201_v33  ;;  %v1438_v33 = vshll.u32 %v5940_v21, 16 }
  0xef   :  { %938 = vmatprep.subr.bf16.mxu1 %v5209_v39  ;;  %v1468_v39 = vor.u32 %v1467_v26, %v1464_v25  ;;  %v5292_v25 = vld [vmem:[#allocation7 + $0x4b0] ss:$8 sps:$4 sm:$0xff]   ;;  %v1480_v26 = vshrl.u32 %v5859_v52, 16 }
  0xf0   :  { %1339 = vmatpush1.bf16.msra.mxu0 %v5204_v38  ;;  %v5261_v38 = vld [vmem:[#allocation7 + $0x394] ss:$8 sps:$4 sm:$0xff]  }
  0xf1   :  { %1340 = vmatprep.subr.bf16.mxu0 %v5212_v42  ;;  %v1476_v42 = vrot.slane %v1474_v27, 6  ;;  %v5300_v27 = vld [vmem:[#allocation7 + $0x4a4] ss:$8 sps:$4 sm:$0xff]  }
  0xf2   :  { %939 = vmatpush2.bf16.msra.mxu1 %v5207_v40  ;;  %v1473_v40 = vrot.slane %v1471_v62, 5  ;;  %v1483_v62 = vshll.u32 %v5859_v52, 16  ;;  %v5306_v52 = vld [vmem:[#allocation7 + $0x494] ss:$8 sps:$4 sm:$0xff]  }
  0xf3   :  { %940 = vmatprep.subr.bf16.mxu1 %v5215_v44  ;;  %v5264_v44 = vld [vmem:[#allocation7 + $0x404] ss:$8 sps:$4 sm:$0xff]  }
  0xf4   :  { %1341 = vmatpush1.bf16.msra.mxu0 %v5210_v43  ;;  %v5256_v43 = vld [vmem:[#allocation7 + $0x410] ss:$8 sps:$4 sm:$0xff]  }
  0xf5   :  { %1342 = vmatprep.subr.bf16.mxu0 %v5218_v47  ;;  %v1437_v47 = vrot.slane %v1435_v3, 5  ;;  %v5298_v3 = vld [vmem:[#allocation7 + $0x4a0] ss:$8 sps:$4 sm:$0xff]  }
  0xf6   :  { %941 = vmatpush2.bf16.msra.mxu1 %v5213_v46  ;;  %v1432_v46 = vor.u32 %v1431_v32, %v1428_v31  ;;  %v1447_v31 = vshll.u32 %v5856_v48, 16  ;;  %v5303_v32 = vld [vmem:[#allocation7 + $0x5a4] ss:$8 sps:$4 sm:$0xff]  }
  0xf7   :  { %1371 = vmatprep.subr.bf16.mxu1 %v5222_v50  ;;  %v5259_v50 = vld [vmem:[#allocation7 + $0x390] ss:$8 sps:$4 sm:$0xff]  }
  0xf8   :  { %1343 = vmatpush1.bf16.msra.mxu0 %v5216_v49  ;;  %v1440_v49 = vrot.slane %v1438_v33, 6  ;;  %v1482_v33 = vrot.slane %v1480_v26, 5  ;;  %v5330_v26 = vld [vmem:[#allocation7 + $0x554] ss:$8 sps:$4 sm:$0xff]  }
  0xf9   :  { %943 = vmatmul.mubr.bf16.vlgmr.msra.gmra.mxu1 %v4544_v56  ;;  %1344 = vmatprep.subr.bf16.mxu0 %v5225_v53  ;;  %v5249_v56 = vld [vmem:[#allocation7 + $0x3b4] ss:$8 sps:$4 sm:$0xff]   ;;  %v1469_v53 = vrot.slane %v1468_v39, 4  ;;  %v1492_v39 = vshll.u32 %v5892_v35, 16 }
  0xfa   :  { %1372 = vmatpush1.bf16.msra.mxu1 %v5220_v51  ;;  %1403 = vmatprep.mubr.bf16.mxu1 %v6657_v0  ;;  %v5267_v51 = vld [vmem:[#allocation7 + $0x384] ss:$8 sps:$4 sm:$0xff]  }
  0xfb   :  { %1373 = vmatprep.subr.bf16.mxu1 %v5228_v59  ;;  %v5262_v59 = vld [vmem:[#allocation7 + $0x400] ss:$8 sps:$4 sm:$0xff]  }
  0xfc   :  { %1345 = vmatpush2.bf16.msra.mxu0 %v5223_v54  ;;  %v1477_v54 = vor.u32 %v1476_v42, %v1473_v40  ;;  %v5301_v40 = vld [vmem:[#allocation7 + $0x5a0] ss:$8 sps:$4 sm:$0xff]  }
  0xfd   :  { %1346 = vmatprep.subr.bf16.mxu0 %v5231_v61  ;;  %v5270_v61 = vld [vmem:[#allocation7 + $0x4f4] ss:$8 sps:$4 sm:$0xff]  }
  0xfe   :  { %1374 = vmatpush1.bf16.msra.mxu1 %v5226_v63  ;;  %v1433_v63 = vrot.slane %v1432_v46, 4  ;;  %v5309_v46 = vld [vmem:[#allocation7 + $0x594] ss:$8 sps:$4 sm:$0xff]  }
  0xff   :  { %1375 = vmatprep.subr.bf16.mxu1 %v5234_v1  ;;  %v1441_v1 = vor.u32 %v1440_v49, %v1437_v47  ;;  %v5304_v47 = vld [vmem:[#allocation7 + $0x490] ss:$8 sps:$4 sm:$0xff]  }
 0x100   :  { %1347 = vmatpush2.bf16.msra.mxu0 %v5229_v2  ;;  %v5265_v2 = vld [vmem:[#allocation7 + $0x380] ss:$8 sps:$4 sm:$0xff]  }
 0x101   :  { %1348 = vmatprep.subr.bf16.mxu0 %v5237_v4  ;;  %v5325_v4 = vld [vmem:[#allocation7 + $0x660] ss:$8 sps:$4 sm:$0xff]  }
 0x102   :  { %1376 = vmatpush1.bf16.msra.mxu1 %v5232_v5  ;;  %v5952_v5 = vsel %vm5946_vm5, %v1469_v53, %v1477_v54  ;;  %v5312_v53 = vld [vmem:[#allocation7 + $0x484] ss:$8 sps:$4 sm:$0xff]  }
 0x103   :  { %1377 = vmatprep.subr.bf16.mxu1 %v5240_v6  ;;  %v5273_v6 = vld [vmem:[#allocation7 + $0x5f4] ss:$8 sps:$4 sm:$0xff]  }
 0x104   :  { %1349 = vmatpush2.bf16.msra.mxu0 %v5235_v7  ;;  %v5268_v7 = vld [vmem:[#allocation7 + $0x4f0] ss:$8 sps:$4 sm:$0xff]  }
 0x105   :  { %1350 = vmatprep.subr.bf16.mxu0 %v5243_v8  ;;  %v5956_v8 = vsel %vm5946_vm5, %v1433_v63, %v1441_v1  ;;  %v5315_v63 = vld [vmem:[#allocation7 + $0x584] ss:$8 sps:$4 sm:$0xff]   ;;  %v5310_v1 = vld [vmem:[#allocation7 + $0x480] ss:$8 sps:$4 sm:$0xff]  }
 0x106   :  { %1378 = vmatpush1.bf16.msra.mxu1 %v5238_v12  ;;  %v5276_v12 = vld [vmem:[#allocation7 + $0x4e4] ss:$8 sps:$4 sm:$0xff]  }
 0x107   :  { %1379 = vmatprep.subr.bf16.mxu1 %v5246_v14  ;;  %v4651_v14 = vcombine.high %v5956_v8, %v5952_v5 }
 0x108   :  { %1351 = vmatpush2.bf16.msra.mxu0 %v5241_v28  ;;  %v5271_v28 = vld [vmem:[#allocation7 + $0x5f0] ss:$8 sps:$4 sm:$0xff]  }
 0x109   :  { %1352 = vmatprep.subr.bf16.mxu0 %v5249_v56  ;;  %v4599_v56 = vcombine.low %v5926_v22, %v5920_v36  ;;  %v5280_v36 = vld [vmem:[#allocation7 + $0x4d0] ss:$8 sps:$4 sm:$0xff]   ;;  %v5288_v22 = vld [vmem:[#allocation7 + $0x4c4] ss:$8 sps:$4 sm:$0xff]  }
 0x10a   :  { %1380 = vmatpush1.bf16.msra.mxu1 %v5244_v17  ;;  %v5282_v17 = vld [vmem:[#allocation7 + $0x4d4] ss:$8 sps:$4 sm:$0xff]  }
 0x10b   :  { %1381 = vmatprep.subr.bf16.mxu1 %v5252_v19  ;;  %v5277_v19 = vld [vmem:[#allocation7 + $0x5e0] ss:$8 sps:$4 sm:$0xff]  }
 0x10c   :  { %1353 = vmatpush2.bf16.msra.mxu0 %v5247_v11  ;;  %v5289_v11 = vld [vmem:[#allocation7 + $0x5c0] ss:$8 sps:$4 sm:$0xff]  }
 0x10d   :  { %1354 = vmatprep.subr.bf16.mxu0 %v5255_v24  ;;  %v5297_v24 = vld [vmem:[#allocation7 + $0x5b4] ss:$8 sps:$4 sm:$0xff]  }
 0x10e   :  { %1382 = vmatpush1.bf16.msra.mxu1 %v5250_v29  ;;  %v5295_v29 = vld [vmem:[#allocation7 + $0x5b0] ss:$8 sps:$4 sm:$0xff]  }
 0x10f   :  { %1383 = vmatprep.subr.bf16.mxu1 %v5258_v30  ;;  %v1444_v30 = vshrl.u32 %v5856_v48, 16  ;;  %v1456_v48 = vshll.u32 %v5890_v34, 16 }
 0x110   :  { %1355 = vmatpush2.bf16.msra.mxu0 %v5253_v37  ;;  %v1485_v37 = vrot.slane %v1483_v62, 6  ;;  %v5333_v62 = vld [vmem:[#allocation7 + $0x654] ss:$8 sps:$4 sm:$0xff]  }
 0x111   :  { %1356 = vmatprep.subr.bf16.mxu0 %v5261_v38  ;;  %v1489_v38 = vshrl.u32 %v5892_v35, 16  ;;  %v1446_v42 = vrot.slane %v1444_v30, 5  ;;  %v5307_v35 = vld [vmem:[#allocation7 + $0x590] ss:$8 sps:$4 sm:$0xff]   ;;  %v5339_v30 = vld [vmem:[#allocation7 + $0x644] ss:$8 sps:$4 sm:$0xff]  }
 0x112   :  { %1384 = vmatpush1.bf16.msra.mxu1 %v5256_v43  ;;  %v1449_v43 = vrot.slane %v1447_v31, 6  ;;  %v1486_v49 = vor.u32 %v1485_v37, %v1482_v33  ;;  %v5334_v31 = vld [vmem:[#allocation7 + $0x540] ss:$8 sps:$4 sm:$0xff]   ;;  %v5345_v33 = vld [vmem:[#allocation7 + $0x634] ss:$8 sps:$4 sm:$0xff]  }
 0x113   :  { %1385 = vmatprep.subr.bf16.mxu1 %v5264_v44  ;;  %v1453_v44 = vshrl.u32 %v5890_v34, 16  ;;  %v5340_v37 = vld [vmem:[#allocation7 + $0x530] ss:$8 sps:$4 sm:$0xff]  }
 0x114   :  { %1357 = vmatpush2.bf16.msra.mxu0 %v5259_v50  ;;  %v1491_v50 = vrot.slane %v1489_v38, 5  ;;  %v1450_v54 = vor.u32 %v1449_v43, %v1446_v42  ;;  %v5348_v38 = vld [vmem:[#allocation7 + $0x524] ss:$8 sps:$4 sm:$0xff]   ;;  %v5354_v42 = vld [vmem:[#allocation7 + $0x514] ss:$8 sps:$4 sm:$0xff]  }
 0x115   :  { %1358 = vmatprep.subr.bf16.mxu0 %v5267_v51  ;;  %v1494_v51 = vrot.slane %v1492_v39, 6  ;;  %v5343_v39 = vld [vmem:[#allocation7 + $0x630] ss:$8 sps:$4 sm:$0xff]   ;;  %v5349_v43 = vld [vmem:[#allocation7 + $0x620] ss:$8 sps:$4 sm:$0xff]  }
 0x116   :  { %1386 = vmatpush1.bf16.msra.mxu1 %v5262_v59  ;;  %v1455_v59 = vrot.slane %v1453_v44, 5  ;;  %v5357_v44 = vld [vmem:[#allocation7 + $0x614] ss:$8 sps:$4 sm:$0xff]  }
 0x117   :  { %1798 = vmatprep.subr.bf16.mxu1 %v5270_v61  ;;  %v1458_v61 = vrot.slane %v1456_v48, 6  ;;  %v1495_v34 = vor.u32 %v1494_v51, %v1491_v50  ;;  %v5352_v48 = vld [vmem:[#allocation7 + $0x510] ss:$8 sps:$4 sm:$0xff]   ;;  %v5358_v50 = vld [vmem:[#allocation7 + $0x500] ss:$8 sps:$4 sm:$0xff]  }
 0x118   :  { %1359 = vmatpush2.bf16.msra.mxu0 %v5265_v2  ;;  %v1487_v2 = vrot.slane %v1486_v49, 4  ;;  %v5363_v49 = vld [vmem:[#allocation7 + $0x604] ss:$8 sps:$4 sm:$0xff]   ;;  %v5366_v51 = vld [vmem:[#allocation7 + $0x774] ss:$8 sps:$4 sm:$0xff]  }
 0x119   :  { %1404 = vmatmul.mubr.bf16.vlgmr.msra.gmra.mxu1 %v4601_v13  ;;  %1841 = vmatprep.subr.bf16.mxu0 %v5273_v6  ;;  %v5286_v13 = vld [vmem:[#allocation7 + $0x4c0] ss:$8 sps:$4 sm:$0xff]   ;;  %v1890_v6 = vld [vmem:[#allocation2 + $0x18] sm:$0xcc] }
 0x11a   :  { %1799 = vmatpush1.bf16.msra.mxu1 %v5268_v7  ;;  %1830 = vmatprep.mubr.bf16.mxu1 %v4651_v14  ;;  %v5318_v7 = vld [vmem:[#allocation7 + $0x574] ss:$8 sps:$4 sm:$0xff]   ;;  %v5313_v14 = vld [vmem:[#allocation7 + $0x580] ss:$8 sps:$4 sm:$0xff]  }
 0x11b   :  { %1361 = vmatmul.mubr.bf16.vlgmr.msra.gmra.mxu0 %v4599_v56  ;;  %1800 = vmatprep.subr.bf16.mxu1 %v5276_v12  ;;  %v1913_v12 = vrot.slane %v5936_v18, 6  ;;  %v1459_v56 = vor.u32 %v1458_v61, %v1455_v59  ;;  %v4650_v59 = vcombine.low %v5956_v8, %v5952_v5  ;;  %v5372_v61 = vld [vmem:[#allocation7 + $0x764] ss:$8 sps:$4 sm:$0xff]   ;;  %v5379_v8 = vld [vmem:[#allocation7 + $0x6d0] ss:$8 sps:$4 sm:$0xff]  }
 0x11c   :  { %1842 = vmatpush1.bf16.msra.mxu0 %v5271_v28  ;;  %1873 = vmatprep.mubr.bf16.mxu0 %v6657_v0  ;;  %v1451_v28 = vrot.slane %v1450_v54, 4  ;;  %v5364_v54 = vld [vmem:[#allocation7 + $0x770] ss:$8 sps:$4 sm:$0xff]   ;;  %v5384_v5 = vld [vmem:[#allocation7 + $0x744] ss:$8 sps:$4 sm:$0xff]  }
 0x11d   :  { %1843 = vmatprep.subr.bf16.mxu0 %v5279_v15  ;;  %v1888_v15 = vld [vmem:[#allocation2] sm:$0xcc] }
 0x11e   :  { %1801 = vmatpush1.bf16.msra.mxu1 %v5274_v16  ;;  %v5321_v16 = vld [vmem:[#allocation7 + $0x674] ss:$8 sps:$4 sm:$0xff]  }
 0x11f   :  { %1802 = vmatprep.subr.bf16.mxu1 %v5282_v17  ;;  %v1905_v17 = vrot.slane %v5940_v21, 6 }
 0x120   :  { %1844 = vmatpush1.bf16.msra.mxu0 %v5277_v19  ;;  %v4703_v19 = vrot.slane %v1890_v6, 10  ;;  %v5373_v6 = vld [vmem:[#allocation7 + $0x6e0] ss:$8 sps:$4 sm:$0xff]  }
 0x121   :  { %1845 = vmatprep.subr.bf16.mxu0 %v5285_v20  ;;  %v5316_v20 = vld [vmem:[#allocation7 + $0x570] ss:$8 sps:$4 sm:$0xff]  }
 0x122   :  { %1803 = vmatpush1.bf16.msra.mxu1 %v5280_v36  ;;  %v1496_v36 = vsel %vm5946_vm5, %v1487_v2, %v1495_v34  ;;  %v5980_v18 = vsel %vm5894_vm1, %v4703_v19, %v1913_v12  ;;  %v5370_v2 = vld [vmem:[#allocation7 + $0x760] ss:$8 sps:$4 sm:$0xff]   ;;  %v5378_v34 = vld [vmem:[#allocation7 + $0x754] ss:$8 sps:$4 sm:$0xff]   ;;  %v5376_v12 = vld [vmem:[#allocation7 + $0x750] ss:$8 sps:$4 sm:$0xff]  }
 0x123   :  { %1804 = vmatprep.subr.bf16.mxu1 %v5288_v22  ;;  %v4701_v22 = vrot.slane %v1888_v15, 10  ;;  %v5385_v15 = vld [vmem:[#allocation7 + $0x6c0] ss:$8 sps:$4 sm:$0xff]   ;;  %v5396_v19 = vld [vmem:[#allocation7 + $0x724] ss:$8 sps:$4 sm:$0xff]  }
 0x124   :  { %1846 = vmatpush1.bf16.msra.mxu0 %v5283_v9  ;;  %v5324_v9 = vld [vmem:[#allocation7 + $0x564] ss:$8 sps:$4 sm:$0xff]  }
 0x125   :  { %1847 = vmatprep.subr.bf16.mxu0 %v5291_v10  ;;  %v1460_v10 = vsel %vm5946_vm5, %v1451_v28, %v1459_v56  ;;  %v5986_v21 = vsel %vm5894_vm1, %v4701_v22, %v1905_v17  ;;  %v5382_v28 = vld [vmem:[#allocation7 + $0x740] ss:$8 sps:$4 sm:$0xff]   ;;  %v5390_v56 = vld [vmem:[#allocation7 + $0x734] ss:$8 sps:$4 sm:$0xff]   ;;  %v5388_v17 = vld [vmem:[#allocation7 + $0x730] ss:$8 sps:$4 sm:$0xff]  }
 0x126   :  { %1805 = vmatpush1.bf16.msra.mxu1 %v5286_v13  ;;  %v5319_v13 = vld [vmem:[#allocation7 + $0x670] ss:$8 sps:$4 sm:$0xff]   ;;  %v5394_v22 = vld [vmem:[#allocation7 + $0x720] ss:$8 sps:$4 sm:$0xff]   ;;  %vm2905_vm1 = vcmask 257024   ;;  %vm2901_vm5 = vmor %vm6344_vm0, %vm6340_vm15  ;;  %vm4136_vm15 = vcmask 1041409  }
 0x127   :  { %1806 = vmatprep.subr.bf16.mxu1 %v5294_v23  ;;  %v4652_v23 = vcombine.low %v1460_v10, %v1496_v36  ;;  %v5399_v36 = vld [vmem:[#allocation7 + $0x6a4] ss:$8 sps:$4 sm:$0xff]   ;;  %v5397_v10 = vld [vmem:[#allocation7 + $0x6a0] ss:$8 sps:$4 sm:$0xff]   ;;  %vm2906_vm3 = vmand %vm2905_vm1, %vm2896_vm10  ;;  %vm5718_vm0 = vmmov 0   ;;  %vm4280_vm1 = vcmask 1040384  }
 0x128   :  { %1848 = vmatpush1.bf16.msra.mxu0 %v5289_v11  ;;  %v5327_v11 = vld [vmem:[#allocation7 + $0x664] ss:$8 sps:$4 sm:$0xff]   ;;  %vm6372_vm10 = vmand %vm2920_vm12, %vm2911_vm4 }
 0x129   :  { %1849 = vmatprep.subr.bf16.mxu0 %v5297_v24  ;;  %v4706_v24 = vcombine.high %v5986_v21, %v5980_v18 }
 0x12a   :  { %1807 = vmatpush1.bf16.msra.mxu1 %v5292_v25  ;;  %v5322_v25 = vld [vmem:[#allocation7 + $0x560] ss:$8 sps:$4 sm:$0xff]  }
 0x12b   :  { %1808 = vmatprep.subr.bf16.mxu1 %v5300_v27  ;;  %v5328_v27 = vld [vmem:[#allocation7 + $0x550] ss:$8 sps:$4 sm:$0xff]  }
 0x12c   :  { %1850 = vmatpush1.bf16.msra.mxu0 %v5295_v29  ;;  %v5331_v29 = vld [vmem:[#allocation7 + $0x650] ss:$8 sps:$4 sm:$0xff]  }
 0x12d   :  { %1851 = vmatprep.subr.bf16.mxu0 %v5303_v32  ;;  %v5342_v32 = vld [vmem:[#allocation7 + $0x534] ss:$8 sps:$4 sm:$0xff]  }
 0x12e   :  { %1809 = vmatpush1.bf16.msra.mxu1 %v5298_v3  ;;  %v5337_v3 = vld [vmem:[#allocation7 + $0x640] ss:$8 sps:$4 sm:$0xff]  }
 0x12f   :  { %1810 = vmatprep.subr.bf16.mxu1 %v5306_v52  ;;  %v5351_v52 = vld [vmem:[#allocation7 + $0x624] ss:$8 sps:$4 sm:$0xff]  }
 0x130   :  { %1852 = vmatpush1.bf16.msra.mxu0 %v5301_v40  ;;  %v5346_v40 = vld [vmem:[#allocation7 + $0x520] ss:$8 sps:$4 sm:$0xff]  }
 0x131   :  { %1853 = vmatprep.subr.bf16.mxu0 %v5309_v46  ;;  %v5360_v46 = vld [vmem:[#allocation7 + $0x504] ss:$8 sps:$4 sm:$0xff]  }
 0x132   :  { %1811 = vmatpush1.bf16.msra.mxu1 %v5304_v47  ;;  %v5355_v47 = vld [vmem:[#allocation7 + $0x610] ss:$8 sps:$4 sm:$0xff]  }
 0x133   :  { %1812 = vmatprep.subr.bf16.mxu1 %v5312_v53  ;;  %v5361_v53 = vld [vmem:[#allocation7 + $0x600] ss:$8 sps:$4 sm:$0xff]  }
 0x134   :  { %1854 = vmatpush1.bf16.msra.mxu0 %v5307_v35  ;;  %v5369_v35 = vld [vmem:[#allocation7 + $0x6f4] ss:$8 sps:$4 sm:$0xff]  }
 0x135   :  { %1855 = vmatprep.subr.bf16.mxu0 %v5315_v63  ;;  %v5367_v63 = vld [vmem:[#allocation7 + $0x6f0] ss:$8 sps:$4 sm:$0xff]  }
 0x136   :  { %1813 = vmatpush1.bf16.msra.mxu1 %v5310_v1  ;;  %v5375_v1 = vld [vmem:[#allocation7 + $0x6e4] ss:$8 sps:$4 sm:$0xff]  }
 0x137   :  { %1814 = vmatprep.subr.bf16.mxu1 %v5318_v7  ;;  %v5381_v7 = vld [vmem:[#allocation7 + $0x6d4] ss:$8 sps:$4 sm:$0xff]  }
 0x138   :  { %1856 = vmatpush1.bf16.msra.mxu0 %v5313_v14  ;;  %v5387_v14 = vld [vmem:[#allocation7 + $0x6c4] ss:$8 sps:$4 sm:$0xff]  }
 0x139   :  { %2220 = vmatprep.subr.bf16.mxu0 %v5321_v16  ;;  %v5393_v16 = vld [vmem:[#allocation7 + $0x6b4] ss:$8 sps:$4 sm:$0xff]  }
 0x13a   :  { %1815 = vmatpush2.bf16.msra.mxu1 %v5316_v20  ;;  %v5391_v20 = vld [vmem:[#allocation7 + $0x6b0] ss:$8 sps:$4 sm:$0xff]  }
 0x13b   :  { %1874 = vmatmul.mubr.bf16.vlgmr.msra.gmra.mxu0 %v4652_v23  ;;  %1816 = vmatprep.subr.bf16.mxu1 %v5324_v9  ;;  %v5402_v9 = vld [vmem:[#allocation7 + $0x714] ss:$8 sps:$4 sm:$0xff]   ;;  %v5400_v23 = vld [vmem:[#allocation7 + $0x710] ss:$8 sps:$4 sm:$0xff]  }
 0x13c   :  { %2221 = vmatpush1.bf16.msra.mxu0 %v5319_v13  ;;  %2252 = vmatprep.mubr.bf16.mxu0 %v4706_v24  ;;  %v5405_v13 = vld [vmem:[#allocation7 + $0x694] ss:$8 sps:$4 sm:$0xff]   ;;  %v5403_v24 = vld [vmem:[#allocation7 + $0x690] ss:$8 sps:$4 sm:$0xff]  }
 0x13d   :  { %2222 = vmatprep.subr.bf16.mxu0 %v5327_v11  ;;  %v5408_v11 = vld [vmem:[#allocation7 + $0x704] ss:$8 sps:$4 sm:$0xff]  }
 0x13e   :  { %1817 = vmatpush2.bf16.msra.mxu1 %v5322_v25  ;;  %v5411_v25 = vld [vmem:[#allocation7 + $0x684] ss:$8 sps:$4 sm:$0xff]  }
 0x13f   :  { %1818 = vmatprep.subr.bf16.mxu1 %v5330_v26  ;;  %v5406_v26 = vld [vmem:[#allocation7 + $0x700] ss:$8 sps:$4 sm:$0xff]  }
 0x140   :  { %2223 = vmatpush1.bf16.msra.mxu0 %v5325_v4  ;;  %v5409_v4 = vld [vmem:[#allocation7 + $0x680] ss:$8 sps:$4 sm:$0xff]  }
 0x141   :  { %2224 = vmatprep.subr.bf16.mxu0 %v5333_v62  ;;  %v4705_v62 = vcombine.low %v5986_v21, %v5980_v18  ;;  %v6030_v18 = vld [vmem:[%s6654_s9 + $0x68] sm:$0xff]  ;;  %v6037_v21 = vld [vmem:[%s6654_s9 + $0xe0] sm:$0xff] }
 0x142   :  { %1819 = vmatpush2.bf16.msra.mxu1 %v5328_v27  ;;  %v6001_v27 = vld [vmem:[%s6654_s9 + $0xf8] sm:$0xff] }
 0x143   :  { %1820 = vmatprep.subr.bf16.mxu1 %v5336_v41  ;;  %v6006_v41 = vld [vmem:[%s6654_s9 + $0x78] sm:$0xff] }
 0x144   :  { %2225 = vmatpush1.bf16.msra.mxu0 %v5331_v29  ;;  %v6042_v29 = vld [vmem:[%s6654_s9 + $0x60] sm:$0xff] }
 0x145   :  { %2226 = vmatprep.subr.bf16.mxu0 %v5339_v30  ;;  %v6049_v30 = vld [vmem:[%s6654_s9 + $0xd8] sm:$0xff] }
 0x146   :  { %1821 = vmatpush2.bf16.msra.mxu1 %v5334_v31  ;;  %v6054_v31 = vld [vmem:[%s6654_s9 + $0x58] sm:$0xff] }
 0x147   :  { %1822 = vmatprep.subr.bf16.mxu1 %v5342_v32  ;;  %v6059_v32 = vld [vmem:[%s6654_s9 + $0xd0] sm:$0xff] }
 0x148   :  { %2227 = vmatpush1.bf16.msra.mxu0 %v5337_v3  ;;  %v6065_v3 = vld [vmem:[%s6654_s9 + $0x50] sm:$0xff] }
 0x149   :  { %2228 = vmatprep.subr.bf16.mxu0 %v5345_v33  ;;  %v6071_v33 = vld [vmem:[%s6654_s9 + $0xc8] sm:$0xff] }
 0x14a   :  { %1823 = vmatpush2.bf16.msra.mxu1 %v5340_v37  ;;  %v6077_v37 = vld [vmem:[%s6654_s9 + $0x48] sm:$0xff] }
 0x14b   :  { %1824 = vmatprep.subr.bf16.mxu1 %v5348_v38  ;;  %v6083_v38 = vld [vmem:[%s6654_s9 + $0xc0] sm:$0xff] }
 0x14c   :  { %2229 = vmatpush1.bf16.msra.mxu0 %v5343_v39  ;;  %v6089_v39 = vld [vmem:[%s6654_s9 + $0x40] sm:$0xff] }
 0x14d   :  { %2230 = vmatprep.subr.bf16.mxu0 %v5351_v52  ;;  %v6095_v52 = vld [vmem:[%s6654_s9 + $0xb8] sm:$0xff] }
 0x14e   :  { %1825 = vmatpush2.bf16.msra.mxu1 %v5346_v40  ;;  %6696 = vst [vmem:[#allocation16_spill] sm:$0xff] %v6095_v52  ;;  %v6101_v40 = vld [vmem:[%s6654_s9 + $0x38] sm:$0xff] }
 0x14f   :  { %1826 = vmatprep.subr.bf16.mxu1 %v5354_v42  ;;  %6697 = vst [vmem:[#allocation17_spill] sm:$0xff] %v6101_v40  ;;  %v6107_v42 = vld [vmem:[%s6654_s9 + $0xb0] sm:$0xff] }
 0x150   :  { %2231 = vmatpush1.bf16.msra.mxu0 %v5349_v43  ;;  %6698 = vst [vmem:[#allocation18_spill] sm:$0xff] %v6107_v42  ;;  %v6113_v43 = vld [vmem:[%s6654_s9 + $0x30] sm:$0xff] }
 0x151   :  { %2232 = vmatprep.subr.bf16.mxu0 %v5357_v44  ;;  %6699 = vst [vmem:[#allocation19_spill] sm:$0xff] %v6113_v43  ;;  %v6119_v44 = vld [vmem:[%s6654_s9 + $0xa8] sm:$0xff] }
 0x152   :  { %1827 = vmatpush2.bf16.msra.mxu1 %v5352_v48  ;;  %6700 = vst [vmem:[#allocation20_spill] sm:$0xff] %v6119_v44  ;;  %v6125_v48 = vld [vmem:[%s6654_s9 + $0x28] sm:$0xff] }
 0x153   :  { %1828 = vmatprep.subr.bf16.mxu1 %v5360_v46  ;;  %6701 = vst [vmem:[#allocation21_spill] sm:$0xff] %v6125_v48  ;;  %v6131_v46 = vld [vmem:[%s6654_s9 + $0xa0] sm:$0xff] }
 0x154   :  { %2233 = vmatpush1.bf16.msra.mxu0 %v5355_v47  ;;  %6702 = vst [vmem:[#allocation22_spill] sm:$0xff] %v6131_v46  ;;  %v6137_v47 = vld [vmem:[%s6654_s9 + $0x20] sm:$0xff] }
 0x155   :  { %2234 = vmatprep.subr.bf16.mxu0 %v5363_v49  ;;  %6703 = vst [vmem:[#allocation23_spill] sm:$0xff] %v6137_v47  ;;  %v6142_v49 = vld [vmem:[%s6655_s10 + $0x38] sm:$0xff] }
 0x156   :  { %1829 = vmatpush2.bf16.msra.mxu1 %v5358_v50  ;;  %6704 = vst [vmem:[#allocation24_spill] sm:$0xff] %v6142_v49  ;;  %v6147_v50 = vld [vmem:[%s6655_s10 + $0x30] sm:$0xff] }
 0x157   :  { %2263 = vmatprep.subr.bf16.mxu1 %v5366_v51  ;;  %6705 = vst [vmem:[#allocation25_spill] sm:$0xff] %v6147_v50  ;;  %v6153_v51 = vld [vmem:[%s6654_s9 + $0x98] sm:$0xff] }
 0x158   :  { %2235 = vmatpush1.bf16.msra.mxu0 %v5361_v53  ;;  %6706 = vst [vmem:[#allocation26_spill] sm:$0xff] %v6153_v51  ;;  %v6160_v53 = vld [vmem:[%s6654_s9 + $0x18] sm:$0xff] }
 0x159   :  { %1831 = vmatmul.mubr.bf16.vlgmr.msra.gmra.mxu1 %v4650_v59  ;;  %2236 = vmatprep.subr.bf16.mxu0 %v5369_v35  ;;  %6707 = vst [vmem:[#allocation27_spill] sm:$0xff] %v6160_v53  ;;  %v6167_v35 = vld [vmem:[%s6654_s9 + $0x90] sm:$0xff]  ;;  %v6179_v59 = vld [vmem:[%s6654_s9 + $0x88] sm:$0xff] }
 0x15a   :  { %2264 = vmatpush1.bf16.msra.mxu1 %v5364_v54  ;;  %2295 = vmatprep.mubr.bf16.mxu1 %v6657_v0  ;;  %6708 = vst [vmem:[#allocation28_spill] sm:$0xff] %v6167_v35  ;;  %v6173_v54 = vld [vmem:[%s6654_s9 + $0x10] sm:$0xff]  ;;  %6710 = vst [vmem:[#allocation30_spill] sm:$0xff] %v6179_v59 }
 0x15b   :  { %2265 = vmatprep.subr.bf16.mxu1 %v5372_v61  ;;  %6709 = vst [vmem:[#allocation29_spill] sm:$0xff] %v6173_v54  ;;  %v6185_v61 = vld [vmem:[%s6654_s9 + $0x8] sm:$0xff] }
 0x15c   :  { %2237 = vmatpush2.bf16.msra.mxu0 %v5367_v63  ;;  %6711 = vst [vmem:[#allocation31_spill] sm:$0xff] %v6185_v61  ;;  %v6191_v63 = vld [vmem:[%s6654_s9 + $0x80] sm:$0xff] }
 0x15d   :  { %2238 = vmatprep.subr.bf16.mxu0 %v5375_v1  ;;  %6712 = vst [vmem:[#allocation32_spill] sm:$0xff] %v6191_v63  ;;  %v6197_v1 = vld [vmem:[%s6654_s9] sm:$0xff] }
 0x15e   :  { %2266 = vmatpush1.bf16.msra.mxu1 %v5370_v2  ;;  %6713 = vst [vmem:[#allocation33_spill] sm:$0xff] %v6197_v1 }
 0x15f   :  { %2267 = vmatprep.subr.bf16.mxu1 %v5378_v34 }
 0x160   :  { %2239 = vmatpush2.bf16.msra.mxu0 %v5373_v6 }
 0x161   :  { %2240 = vmatprep.subr.bf16.mxu0 %v5381_v7 }
 0x162   :  { %2268 = vmatpush1.bf16.msra.mxu1 %v5376_v12 }
 0x163   :  { %2269 = vmatprep.subr.bf16.mxu1 %v5384_v5 }
 0x164   :  { %2241 = vmatpush2.bf16.msra.mxu0 %v5379_v8 }
 0x165   :  { %2242 = vmatprep.subr.bf16.mxu0 %v5387_v14 }
 0x166   :  { %2270 = vmatpush1.bf16.msra.mxu1 %v5382_v28 }
 0x167   :  { %2271 = vmatprep.subr.bf16.mxu1 %v5390_v56 }
 0x168   :  { %2243 = vmatpush2.bf16.msra.mxu0 %v5385_v15 }
 0x169   :  { %2244 = vmatprep.subr.bf16.mxu0 %v5393_v16 }
 0x16a   :  { %2272 = vmatpush1.bf16.msra.mxu1 %v5388_v17 }
 0x16b   :  { %2273 = vmatprep.subr.bf16.mxu1 %v5396_v19 }
 0x16c   :  { %2245 = vmatpush2.bf16.msra.mxu0 %v5391_v20 }
 0x16d   :  { %2246 = vmatprep.subr.bf16.mxu0 %v5399_v36 }
 0x16e   :  { %2274 = vmatpush1.bf16.msra.mxu1 %v5394_v22 }
 0x16f   :  { %2275 = vmatprep.subr.bf16.mxu1 %v5402_v9 }
 0x170   :  { %2247 = vmatpush2.bf16.msra.mxu0 %v5397_v10 }
 0x171   :  { %2248 = vmatprep.subr.bf16.mxu0 %v5405_v13 }
 0x172   :  { %2276 = vmatpush1.bf16.msra.mxu1 %v5400_v23 }
 0x173   :  { %2277 = vmatprep.subr.bf16.mxu1 %v5408_v11 }
 0x174   :  { %2249 = vmatpush2.bf16.msra.mxu0 %v5403_v24 }
 0x175   :  { %2250 = vmatprep.subr.bf16.mxu0 %v5411_v25 }
 0x176   :  { %2278 = vmatpush1.bf16.msra.mxu1 %v5406_v26 }
 0x177   :  { %4911 = vmatprep.subr.mxu1 %v6001_v27 }
 0x178   :  { %2251 = vmatpush2.bf16.msra.mxu0 %v5409_v4 }
 0x179   :  { %2296 = vmatmul.mubr.bf16.vlgmr.msra.gmra.mxu1 %v4707_v58  ;;  %v6025_v58 = vld [vmem:[%s6654_s9 + $0xe8] sm:$0xff]  ;;  %2480 = vmatprep.subr.mxu0 %v6142_v49  ;;  %v645_v2 = vpop.f32.mrf.mxu1 }
 0x17a   :  { %4912 = vmatpush3.msra.mxu1 %v6006_v41 }
 0x17b   :  { %2253 = vmatmul.mubr.bf16.vlgmr.msra.gmra.mxu0 %v4705_v62  ;;  %4913 = vmatprep.subr.mxu1 %v6013_v55  ;;  %v602_v34 = vpop.f32.mrf.mxu0  ;;  %v647_v6 = vpop.f32.mrf.mxu1 }
 0x17c   :  { %4914 = vmatpush3.msra.mxu1 %v6018_v57  ;;  %2481 = vmatpush1.msra.mxu0 %v6147_v50  ;;  %v646_v45 = vadd.f32 %v645_v2, %v602_v34 }
 0x17d   :  { %4915 = vmatprep.subr.mxu1 %v6025_v58  ;;  %v604_v7 = vpop.f32.mrf.mxu0  ;;  %v649_v12 = vpop.f32.mrf.mxu1 }
 0x17e   :  { %4916 = vmatpush3.msra.mxu1 %v6030_v18  ;;  %v648_v50 = vadd.f32 %v647_v6, %v604_v7 }
 0x17f   :  { %4917 = vmatprep.subr.mxu1 %v6037_v21  ;;  %v606_v5 = vpop.f32.mrf.mxu0  ;;  %v651_v8 = vpop.f32.mrf.mxu1 }
 0x180   :  { %4918 = vmatpush3.msra.mxu1 %v6042_v29  ;;  %v650_v49 = vadd.f32 %v649_v12, %v606_v5 }
 0x181   :  { %4919 = vmatprep.subr.mxu1 %v6049_v30  ;;  %v608_v14 = vpop.f32.mrf.mxu0 }
 0x182   :  { %4920 = vmatpush3.msra.mxu1 %v6054_v31 }
 0x183   :  { %4921 = vmatprep.subr.mxu1 %v6059_v32 }
 0x184   :  { %4922 = vmatpush3.msra.mxu1 %v6065_v3 }
 0x185   :  { %4923 = vmatprep.subr.mxu1 %v6071_v33 }
 0x186   :  { %4924 = vmatpush3.msra.mxu1 %v6077_v37 }
 0x187   :  { %4925 = vmatprep.subr.mxu1 %v6083_v38 }
 0x188   :  { %4926 = vmatpush3.msra.mxu1 %v6089_v39 }
 0x189   :  { %4927 = vmatprep.subr.mxu1 %v6095_v52 }
 0x18a   :  { %4928 = vmatpush3.msra.mxu1 %v6101_v40 }
 0x18b   :  { %4929 = vmatprep.subr.mxu1 %v6107_v42 }
 0x18c   :  { %4930 = vmatpush3.msra.mxu1 %v6113_v43 }
 0x18d   :  { %4931 = vmatprep.subr.mxu1 %v6119_v44 }
 0x18e   :  { %4932 = vmatpush3.msra.mxu1 %v6125_v48 }
 0x18f   :  { %4933 = vmatprep.subr.mxu1 %v6131_v46 }
 0x190   :  { %4934 = vmatpush3.msra.mxu1 %v6137_v47 }
 0x191   :  { %4935 = vmatprep.subr.mxu1 %v6153_v51 }
 0x192   :  { %4936 = vmatpush3.msra.mxu1 %v6160_v53  ;;  %v6203_v53 = vshrl.u32 %v2312_v60, 7 }
 0x193   :  { %4937 = vmatprep.subr.mxu1 %v6167_v35 }
 0x194   :  { %4938 = vmatpush3.msra.mxu1 %v6173_v54 }
 0x195   :  { %4939 = vmatprep.subr.mxu1 %v6179_v59 }
 0x196   :  { %4940 = vmatpush3.msra.mxu1 %v6185_v61  ;;  %v652_v61 = vadd.f32 %v651_v8, %v608_v14 }
 0x197   :  { %4941 = vmatprep.subr.mxu1 %v6191_v63 }
 0x198   :  { %4942 = vmatpush3.msra.mxu1 %v6197_v1 }
 0x199   :  { %4946 = vmatprep.subr.mxu1 %v6001_v27 }
 0x19b   :  { %v987_v56 = vpop.f32.mrf.mxu0 }
 0x19d   :  { %v989_v16 = vpop.f32.mrf.mxu0 }
 0x19f   :  { %v991_v19 = vpop.f32.mrf.mxu0 }
 0x1a1   :  { %v993_v36 = vpop.f32.mrf.mxu0 }
 0x1b9   :  { %v944_v28 = vpop.f32.mrf.mxu1 }
 0x1ba   :  { %v945_v63 = vadd.f32 %v944_v28, %v646_v45  ;;  %v6206_v45 = vsub.s32 0, %v6203_v53 }
 0x1bb   :  { %v946_v15 = vpop.f32.mrf.mxu1 }
 0x1bc   :  { %v947_v59 = vadd.f32 %v946_v15, %v648_v50  ;;  %v988_v43 = vadd.f32 %v987_v56, %v945_v63 }
 0x1bd   :  { %v948_v17 = vpop.f32.mrf.mxu1 }
 0x1be   :  { %v949_v54 = vadd.f32 %v948_v17, %v650_v49  ;;  %v990_v52 = vadd.f32 %v989_v16, %v947_v59  ;;  %v6212_v59 = vsub.s32 1, %v6203_v53 }
 0x1bf   :  { %v950_v20 = vpop.f32.mrf.mxu1 }
 0x1c0   :  { %v951_v47 = vadd.f32 %v950_v20, %v652_v61  ;;  %v992_v2 = vadd.f32 %v991_v19, %v949_v54  ;;  %v2310_v61 = vld [vmem:[%s6647_s2] sm:$0x3] }
 0x1c2   :  { %v994_v5 = vadd.f32 %v993_v36, %v951_v47  ;;  %v2319_v47 = vrot.slane %v2310_v61, %v6212_v59 }
 0x1d9   :  { %v1405_v22 = vpop.f32.mrf.mxu1 }
 0x1db   :  { %v1362_v9 = vpop.f32.mrf.mxu0  ;;  %v1407_v10 = vpop.f32.mrf.mxu1 }
 0x1dc   :  { %v1406_v51 = vadd.f32 %v1405_v22, %v1362_v9 }
 0x1dd   :  { %v1364_v13 = vpop.f32.mrf.mxu0  ;;  %v1409_v23 = vpop.f32.mrf.mxu1 }
 0x1de   :  { %v1408_v46 = vadd.f32 %v1407_v10, %v1364_v13  ;;  %v1414_v49 = vadd.f32 %v1406_v51, %v988_v43  ;;  %v2315_v43 = vrot.slane %v2310_v61, %v6206_v45  ;;  %v6279_v61 = vld [vmem:[%s6655_s10 + $0x10] sm:$0xff] }
 0x1df   :  { %v1366_v11 = vpop.f32.mrf.mxu0  ;;  %v1411_v24 = vpop.f32.mrf.mxu1 }
 0x1e0   :  { %v1410_v42 = vadd.f32 %v1409_v23, %v1366_v11  ;;  %v1415_v63 = vadd.f32 %v1408_v46, %v990_v52 }
 0x1e1   :  { %v1368_v25 = vpop.f32.mrf.mxu0 }
 0x1e2   :  { %v1412_v34 = vadd.f32 %v1411_v24, %v1368_v25  ;;  %v1416_v14 = vadd.f32 %v1410_v42, %v992_v2 }
 0x1e4   :  { %v1417_v16 = vadd.f32 %v1412_v34, %v994_v5  ;;  %v6284_v5 = vld [vmem:[%s6655_s10 + $0x8] sm:$0xff] }
 0x1fb   :  { %v1875_v4 = vpop.f32.mrf.mxu0 }
 0x1fd   :  { %v1877_v27 = vpop.f32.mrf.mxu0 }
 0x1ff   :  { %v1879_v1 = vpop.f32.mrf.mxu0 }
 0x201   :  { %v1881_v48 = vpop.f32.mrf.mxu0 }
 0x219   :  { %v1832_v26 = vpop.f32.mrf.mxu1 }
 0x21a   :  { %v1876_v40 = vadd.f32 %v1875_v4, %v1832_v26 }
 0x21b   :  { %v1834_v62 = vpop.f32.mrf.mxu1 }
 0x21c   :  { %v1878_v7 = vadd.f32 %v1877_v27, %v1834_v62  ;;  %v1884_v28 = vadd.f32 %v1876_v40, %v1414_v49  ;;  %v6729_v49 = vld [vmem:[#allocation33_spill] sm:$0xff] }
 0x21d   :  { %v1836_v0 = vpop.f32.mrf.mxu1 }
 0x21e   :  { %v1880_v60 = vadd.f32 %v1879_v1, %v1836_v0 }
 0x21f   :  { %v1838_v35 = vpop.f32.mrf.mxu1 }
 0x220   :  { %v1882_v56 = vadd.f32 %v1881_v48, %v1838_v35  ;;  %v1886_v51 = vadd.f32 %v1880_v60, %v1416_v14  ;;  %v6267_v60 = vld [vmem:[%s6655_s10 + $0x20] sm:$0xff] }
 0x222   :  { %v1887_v19 = vadd.f32 %v1882_v56, %v1417_v16  ;;  %v6731_v16 = vld [vmem:[#allocation25_spill] sm:$0xff] }
 0x239   :  { %v2297_v44 = vpop.f32.mrf.mxu1 }
 0x23b   :  { %v2254_v6 = vpop.f32.mrf.mxu0  ;;  %v2299_v50 = vpop.f32.mrf.mxu1 }
 0x23c   :  { %v2298_v12 = vadd.f32 %v2297_v44, %v2254_v6  ;;  %v1885_v44 = vadd.f32 %v1878_v7, %v1415_v63  ;;  %v6262_v7 = vld [vmem:[%s6655_s10 + $0x28] sm:$0xff]  ;;  %v6290_v63 = vld [vmem:[%s6655_s10] sm:$0xff] }
 0x23d   :  { %v2256_v8 = vpop.f32.mrf.mxu0  ;;  %v2301_v54 = vpop.f32.mrf.mxu1  ;;  %2482 = vmatprep.subr.mxu0 %v6262_v7 }
 0x23e   :  { %v2300_v15 = vadd.f32 %v2299_v50, %v2256_v8  ;;  %v2306_v1 = vadd.f32 %v2298_v12, %v1884_v28  ;;  %2483 = vmatpush1.msra.mxu0 %v6267_v60  ;;  %v6274_v12 = vld [vmem:[%s6655_s10 + $0x18] sm:$0xff]  ;;  %v5716_v8 = vmov 0.0  }
 0x23f   :  { %v2258_v0 = vpop.f32.mrf.mxu0  ;;  %v2303_v52 = vpop.f32.mrf.mxu1  ;;  %2484 = vmatprep.subr.mxu0 %v6274_v12  ;;  %2520 = vmatprep.mubr.f32.mxu0 %v5716_v8 }
 0x240   :  { %v2302_v17 = vadd.f32 %v2301_v54, %v2258_v0  ;;  %v2307_v20 = vadd.f32 %v2300_v15, %v1885_v44  ;;  %v6216_v42 = vadd.f32 %v2315_v43, %v2306_v1  ;;  %2485 = vmatpush1.msra.mxu0 %v6279_v61  ;;  %v6730_v54 = vld [vmem:[#allocation24_spill] sm:$0xff] }
 0x241   :  { %v2260_v46 = vpop.f32.mrf.mxu0  ;;  %2486 = vmatprep.subr.mxu0 %v6284_v5 }
 0x242   :  { %v2308_v36 = vadd.f32 %v2302_v17, %v1886_v51  ;;  %v2304_v22 = vadd.f32 %v2303_v52, %v2260_v46  ;;  %v6220_v35 = vadd.f32 %v2319_v47, %v2307_v20  ;;  %2487 = vmatpush1.msra.mxu0 %v6290_v63 }
 0x243   :  { %2662 = vmatprep.subr.mxu0 %v6730_v54 }
 0x244   :  { %v6218_v40 = vadd.f32 %v2315_v43, %v2308_v36  ;;  %v2309_v48 = vadd.f32 %v2304_v22, %v1887_v19 }
 0x246   :  { %v2326_v9 = vadd.f32 %v6218_v40, %v6216_v42  ;;  %v6224_v10 = vadd.f32 %v2319_v47, %v2309_v48 }
 0x248   :  { %v2327_v13 = vrot.slane %v2326_v9, 4  ;;  %v2333_v23 = vadd.f32 %v6224_v10, %v6220_v35 }
 0x24a   :  { %v2328_v11 = vadd.f32 %v2327_v13, %v2326_v9  ;;  %v2334_v24 = vrot.slane %v2333_v23, 4 }
 0x24c   :  { %v2335_v25 = vadd.f32 %v2334_v24, %v2333_v23  ;;  %v2329_v26 = vrot.slane %v2328_v11, 2 }
 0x24e   :  { %v2336_v4 = vrot.slane %v2335_v25, 2  ;;  %v2330_v62 = vadd.f32 %v2329_v26, %v2328_v11 }
 0x250   :  { %v2337_v27 = vadd.f32 %v2336_v4, %v2335_v25  ;;  %v2331_v2 = vrot.slane %v2330_v62, 1 }
 0x252   :  { %v2338_v34 = vrot.slane %v2337_v27, 1  ;;  %v2332_v50 = vadd.f32 %v2331_v2, %v2330_v62 }
 0x254   :  { %v2339_v6 = vadd.f32 %v2338_v34, %v2337_v27 }
 0x256   :  { %2436 = vmatprep.mubr.f32.mxu1 %v2339_v6  ;;  %v6732_v6 = vmov 0  }
 0x257   :  { %2437 = vmatmul.mubr.f32.vlgmr.msra.gmra.mxu1 %v2332_v50  ;;  %2841 = vst.msk [vmem:[#allocation3 + $0x20] sm:$0xf] %vm2836_vm8, %v6732_v6  ;;  %2837 = vst.msk [vmem:[#allocation3 + $0x8] sm:$0xf] %vm2836_vm8, %v6732_v6  ;;  %vm2914_vm8 = vsmask.f32 4352 }
 0x258   :  { %4947 = vmatpush3.msra.mxu1 %v6006_v41  ;;  %v6714_v41 = vld [vmem:[#allocation16_spill] sm:$0xff]  ;;  %vm6358_vm13 = vmand %vm143_vm6, %vm2914_vm8  ;;  %vm6745_vm6 = vcmask 523264  }
 0x259   :  { %4948 = vmatprep.subr.mxu1 %v6013_v55  ;;  %v6715_v55 = vld [vmem:[#allocation17_spill] sm:$0xff] }
 0x25a   :  { %4949 = vmatpush3.msra.mxu1 %v6018_v57  ;;  %v6716_v57 = vld [vmem:[#allocation18_spill] sm:$0xff] }
 0x25b   :  { %4950 = vmatprep.subr.mxu1 %v6025_v58  ;;  %v6717_v58 = vld [vmem:[#allocation19_spill] sm:$0xff] }
 0x25c   :  { %4951 = vmatpush3.msra.mxu1 %v6030_v18  ;;  %v6718_v18 = vld [vmem:[#allocation20_spill] sm:$0xff] }
 0x25d   :  { %4952 = vmatprep.subr.mxu1 %v6037_v21  ;;  %v6719_v21 = vld [vmem:[#allocation21_spill] sm:$0xff] }
 0x25e   :  { %4953 = vmatpush3.msra.mxu1 %v6042_v29  ;;  %v6720_v29 = vld [vmem:[#allocation22_spill] sm:$0xff] }
 0x25f   :  { %4954 = vmatprep.subr.mxu1 %v6049_v30  ;;  %v6721_v30 = vld [vmem:[#allocation23_spill] sm:$0xff] }
 0x260   :  { %4955 = vmatpush3.msra.mxu1 %v6054_v31  ;;  %v6722_v31 = vld [vmem:[#allocation26_spill] sm:$0xff] }
 0x261   :  { %4956 = vmatprep.subr.mxu1 %v6059_v32  ;;  %v6723_v32 = vld [vmem:[#allocation27_spill] sm:$0xff] }
 0x262   :  { %4957 = vmatpush3.msra.mxu1 %v6065_v3  ;;  %v6724_v3 = vld [vmem:[#allocation28_spill] sm:$0xff] }
 0x263   :  { %4958 = vmatprep.subr.mxu1 %v6071_v33  ;;  %v6725_v33 = vld [vmem:[#allocation29_spill] sm:$0xff] }
 0x264   :  { %4959 = vmatpush3.msra.mxu1 %v6077_v37  ;;  %v6726_v37 = vld [vmem:[#allocation30_spill] sm:$0xff] }
 0x265   :  { %4960 = vmatprep.subr.mxu1 %v6083_v38  ;;  %v6727_v38 = vld [vmem:[#allocation31_spill] sm:$0xff] }
 0x266   :  { %4961 = vmatpush3.msra.mxu1 %v6089_v39  ;;  %v6728_v39 = vld [vmem:[#allocation32_spill] sm:$0xff] }
 0x267   :  { %4962 = vmatprep.subr.mxu1 %v6714_v41 }
 0x268   :  { %4963 = vmatpush3.msra.mxu1 %v6715_v55 }
 0x269   :  { %4964 = vmatprep.subr.mxu1 %v6716_v57 }
 0x26a   :  { %4965 = vmatpush3.msra.mxu1 %v6717_v58 }
 0x26b   :  { %4966 = vmatprep.subr.mxu1 %v6718_v18  ;;  %v2628_v18 = vld [vmem:[%s6648_s3] sm:$0x1]  ;;  %s5717_s3 = smov 32  }
 0x26c   :  { %4967 = vmatpush3.msra.mxu1 %v6719_v21 }
 0x26d   :  { %4968 = vmatprep.subr.mxu1 %v6720_v29 }
 0x26e   :  { %4969 = vmatpush3.msra.mxu1 %v6721_v30 }
 0x26f   :  { %4970 = vmatprep.subr.mxu1 %v6722_v31  ;;  %v2632_v31 = vld [vmem:[%s6649_s4] sm:$0x1] }
 0x270   :  { %4971 = vmatpush3.msra.mxu1 %v6723_v32 }
 0x271   :  { %4972 = vmatprep.subr.mxu1 %v6724_v3  ;;  %v5412_v3 = vld [vmem:[#allocation9 + $0x1b0] ss:$8 sps:$4 sm:$0xff]  }
 0x272   :  { %4973 = vmatpush3.msra.mxu1 %v6725_v33  ;;  %v5414_v33 = vld [vmem:[#allocation9 + $0x1b4] ss:$8 sps:$4 sm:$0xff]  }
 0x273   :  { %4974 = vmatprep.subr.mxu1 %v6726_v37  ;;  %v5417_v37 = vld [vmem:[#allocation9 + $0x1a4] ss:$8 sps:$4 sm:$0xff]  }
 0x274   :  { %4975 = vmatpush3.msra.mxu1 %v6727_v38  ;;  %v5415_v38 = vld [vmem:[#allocation9 + $0x1a0] ss:$8 sps:$4 sm:$0xff]  }
 0x275   :  { %4976 = vmatprep.subr.mxu1 %v6728_v39  ;;  %v5420_v39 = vld [vmem:[#allocation9 + $0x194] ss:$8 sps:$4 sm:$0xff]  }
 0x276   :  { %4977 = vmatpush3.msra.mxu1 %v6729_v49  ;;  %v5418_v49 = vld [vmem:[#allocation9 + $0x190] ss:$8 sps:$4 sm:$0xff]  }
 0x317   :  { %v4943_v14 = vpop.f32.mrf.mxu1 }
 0x319   :  { %v4944_v28 = vpop.f32.mrf.mxu1 }
 0x31a   :  { %v4945_v56 = vadd.f32 %v4944_v28, %v4943_v14  ;;  %v5430_v14 = vld [vmem:[#allocation9 + $0x150] ss:$8 sps:$4 sm:$0xff]   ;;  %v5435_v28 = vld [vmem:[#allocation9 + $0x144] ss:$8 sps:$4 sm:$0xff]  }
 0x31c   :  { %v2443_v15 = vmul.f32 0.0078125, %v4945_v56  ;;  %v5433_v56 = vld [vmem:[#allocation9 + $0x140] ss:$8 sps:$4 sm:$0xff]  }
 0x31e   :  { %4756 = vmatmul.mubr.msk.f32.vlgmr.msra.gmra.mxu0 %vm2452_vm7, %v2443_v15 }
 0x31f   :  { %2663 = vmatpush1.msra.mxu0 %v6731_v16  ;;  %2702 = vmatprep.mubr.f32.mxu0 %v5716_v8 }
 0x320   :  { %2664 = vmatprep.subr.mxu0 %v6262_v7 }
 0x321   :  { %2665 = vmatpush1.msra.mxu0 %v6267_v60 }
 0x322   :  { %2666 = vmatprep.subr.mxu0 %v6274_v12 }
 0x323   :  { %2667 = vmatpush1.msra.mxu0 %v6279_v61 }
 0x324   :  { %2668 = vmatprep.subr.mxu0 %v6284_v5 }
 0x325   :  { %2669 = vmatpush1.msra.mxu0 %v6290_v63 }
 0x326   :  { %2748 = vmatprep.subr.mxu0 %v6730_v54  ;;  %v5432_v54 = vld [vmem:[#allocation9 + $0x154] ss:$8 sps:$4 sm:$0xff]  }
 0x3de   :  { %v2522_v43 = vpop.f32.mrf.mxu0 }
 0x3df   :  { %v2530_v0 = vrot.slane %v2522_v43, %v6206_v45  ;;  %v5441_v43 = vld [vmem:[#allocation9 + $0x224] ss:$8 sps:$4 sm:$0xff]  }
 0x3e0   :  { %v2524_v44 = vpop.f32.mrf.mxu0 }
 0x3e1   :  { %v2535_v51 = vsub.f32 %v6216_v42, %v2530_v0  ;;  %v2537_v1 = vsub.f32 %v6218_v40, %v2530_v0  ;;  %v2534_v17 = vrot.slane %v2524_v44, %v6206_v45  ;;  %v5439_v0 = vld [vmem:[#allocation9 + $0x220] ss:$8 sps:$4 sm:$0xff]   ;;  %v5444_v44 = vld [vmem:[#allocation9 + $0x214] ss:$8 sps:$4 sm:$0xff]  }
 0x3e3   :  { %v2539_v47 = vmul.f32 %v2535_v51, %v2535_v51  ;;  %v2541_v52 = vmul.f32 %v2537_v1, %v2537_v1  ;;  %v2536_v46 = vsub.f32 %v6220_v35, %v2534_v17  ;;  %v2538_v19 = vsub.f32 %v6224_v10, %v2534_v17  ;;  %v5442_v51 = vld [vmem:[#allocation9 + $0x210] ss:$8 sps:$4 sm:$0xff]  }
 0x3e5   :  { %v2543_v20 = vadd.f32 %v2541_v52, %v2539_v47  ;;  %v2540_v36 = vmul.f32 %v2536_v46, %v2536_v46  ;;  %v2542_v22 = vmul.f32 %v2538_v19, %v2538_v19 }
 0x3e7   :  { %v2544_v48 = vrot.slane %v2543_v20, 4  ;;  %v2550_v9 = vadd.f32 %v2542_v22, %v2540_v36 }
 0x3e9   :  { %v2545_v13 = vadd.f32 %v2544_v48, %v2543_v20  ;;  %v2551_v23 = vrot.slane %v2550_v9, 4 }
 0x3eb   :  { %v2546_v11 = vrot.slane %v2545_v13, 2  ;;  %v2552_v24 = vadd.f32 %v2551_v23, %v2550_v9 }
 0x3ed   :  { %v2547_v25 = vadd.f32 %v2546_v11, %v2545_v13  ;;  %v2553_v26 = vrot.slane %v2552_v24, 2 }
 0x3ef   :  { %v2554_v4 = vadd.f32 %v2553_v26, %v2552_v24  ;;  %v2548_v62 = vrot.slane %v2547_v25, 1 }
 0x3f1   :  { %v2555_v27 = vrot.slane %v2554_v4, 1  ;;  %v2549_v34 = vadd.f32 %v2548_v62, %v2547_v25 }
 0x3f3   :  { %v2556_v2 = vadd.f32 %v2555_v27, %v2554_v4 }
 0x3f5   :  { %2621 = vmatprep.mubr.f32.mxu1 %v2556_v2 }
 0x3f6   :  { %2622 = vmatmul.mubr.f32.vlgmr.msra.gmra.mxu1 %v2549_v34 }
 0x3f7   :  { %3372 = vmatprep.mubr.bf16.mxu1 %v6732_v6 }
 0x4b6   :  { %v4978_v50 = vpop.f32.mrf.mxu1 }
 0x4b8   :  { %v4979_v41 = vpop.f32.mrf.mxu1 }
 0x4b9   :  { %v4980_v55 = vadd.f32 %v4979_v41, %v4978_v50 }
 0x4bb   :  { %v2627_v57 = vmul.f32 0.0078125, %v4980_v55 }
 0x4bd   :  { %v2629_v58 = vadd.f32 1e-05, %v2627_v57 }
 0x4bf   :  { %5595 = vrsqrt.f32 %v2629_v58 }
 0x4cc   :  { %v5596_v21 = vpop.eup %5595 }
 0x4cd   :  { %v2631_v29 = vmul.f32 %v5596_v21, %v2628_v18 }
 0x4cf   :  { %4757 = vmatmul.mubr.msk.f32.vlgmr.msra.gmra.mxu0 %vm2452_vm7, %v2631_v29  ;;  %v2633_v30 = vmul.f32 %v2631_v29, %v2443_v15  ;;  %v5438_v15 = vld [vmem:[#allocation9 + $0x234] ss:$8 sps:$4 sm:$0xff]  }
 0x4d0   :  { %2749 = vmatpush1.msra.mxu0 %v6731_v16  ;;  %2788 = vmatprep.mubr.f32.mxu0 %v5716_v8  ;;  %v5436_v16 = vld [vmem:[#allocation9 + $0x230] ss:$8 sps:$4 sm:$0xff]  }
 0x4d1   :  { %2750 = vmatprep.subr.mxu0 %v6262_v7  ;;  %v2634_v32 = vsub.f32 %v2632_v31, %v2633_v30  ;;  %v5423_v7 = vld [vmem:[#allocation9 + $0x184] ss:$8 sps:$4 sm:$0xff]  }
 0x4d2   :  { %2751 = vmatpush1.msra.mxu0 %v6267_v60  ;;  %v5421_v60 = vld [vmem:[#allocation9 + $0x180] ss:$8 sps:$4 sm:$0xff]  }
 0x4d3   :  { %2752 = vmatprep.subr.mxu0 %v6274_v12  ;;  %v5426_v12 = vld [vmem:[#allocation9 + $0x174] ss:$8 sps:$4 sm:$0xff]  }
 0x4d4   :  { %2753 = vmatpush1.msra.mxu0 %v6279_v61  ;;  %v5424_v61 = vld [vmem:[#allocation9 + $0x170] ss:$8 sps:$4 sm:$0xff]  }
 0x4d5   :  { %2754 = vmatprep.subr.mxu0 %v6284_v5  ;;  %v5429_v5 = vld [vmem:[#allocation9 + $0x164] ss:$8 sps:$4 sm:$0xff]  }
 0x4d6   :  { %2755 = vmatpush1.msra.mxu0 %v6290_v63  ;;  %v5427_v63 = vld [vmem:[#allocation9 + $0x160] ss:$8 sps:$4 sm:$0xff]  }
 0x4d7   :  { %4758 = vmatmul.mubr.msk.f32.vlgmr.msra.gmra.mxu0 %vm2452_vm7, %v2634_v32  ;;  %3297 = vmatprep.subr.bf16.mxu0 %v5414_v33  ;;  %v5447_v33 = vld [vmem:[#allocation9 + $0x204] ss:$8 sps:$4 sm:$0xff]  }
 0x4d8   :  { %3298 = vmatpush1.bf16.msra.mxu0 %v5412_v3  ;;  %v5445_v3 = vld [vmem:[#allocation9 + $0x200] ss:$8 sps:$4 sm:$0xff]  }
 0x4d9   :  { %3299 = vmatprep.subr.bf16.mxu0 %v5417_v37 }
 0x4dc   :  { %3300 = vmatpush1.bf16.msra.mxu0 %v5415_v38 }
 0x4dd   :  { %3301 = vmatprep.subr.bf16.mxu0 %v5420_v39 }
 0x4e0   :  { %3302 = vmatpush1.bf16.msra.mxu0 %v5418_v49 }
 0x4e1   :  { %3303 = vmatprep.subr.bf16.mxu0 %v5423_v7 }
 0x4e4   :  { %3304 = vmatpush1.bf16.msra.mxu0 %v5421_v60 }
 0x4e5   :  { %3305 = vmatprep.subr.bf16.mxu0 %v5426_v12 }
 0x4e8   :  { %3306 = vmatpush1.bf16.msra.mxu0 %v5424_v61  ;;  %v5448_v61 = vld [vmem:[#allocation9 + $0x270] ss:$8 sps:$4 sm:$0xff]  }
 0x4e9   :  { %3307 = vmatprep.subr.bf16.mxu0 %v5429_v5  ;;  %v5450_v5 = vld [vmem:[#allocation9 + $0x274] ss:$8 sps:$4 sm:$0xff]  }
 0x4ea   :  { %3348 = vmatprep.subr.bf16.mxu1 %v5450_v5 }
 0x4eb   :  { %3349 = vmatpush1.bf16.msra.mxu1 %v5448_v61 }
 0x4ec   :  { %3308 = vmatpush1.bf16.msra.mxu0 %v5427_v63 }
 0x4ed   :  { %3309 = vmatprep.subr.bf16.mxu0 %v5432_v54  ;;  %v5451_v54 = vld [vmem:[#allocation9 + $0x1f0] ss:$8 sps:$4 sm:$0xff]  }
 0x4f0   :  { %3310 = vmatpush1.bf16.msra.mxu0 %v5430_v14  ;;  %v5453_v14 = vld [vmem:[#allocation9 + $0x1f4] ss:$8 sps:$4 sm:$0xff]  }
 0x4f1   :  { %3311 = vmatprep.subr.bf16.mxu0 %v5435_v28 }
 0x4f4   :  { %3312 = vmatpush1.bf16.msra.mxu0 %v5433_v56  ;;  %v5456_v56 = vld [vmem:[#allocation9 + $0x264] ss:$8 sps:$4 sm:$0xff]  }
 0x4f5   :  { %3313 = vmatprep.subr.bf16.mxu0 %v5438_v15  ;;  %v5454_v15 = vld [vmem:[#allocation9 + $0x260] ss:$8 sps:$4 sm:$0xff]   ;;  %3350 = vmatprep.subr.bf16.mxu1 %v5456_v56 }
 0x4f6   :  { %3351 = vmatpush1.bf16.msra.mxu1 %v5454_v15 }
 0x4f8   :  { %3314 = vmatpush2.bf16.msra.mxu0 %v5436_v16  ;;  %v5459_v16 = vld [vmem:[#allocation9 + $0x1e4] ss:$8 sps:$4 sm:$0xff]  }
 0x4f9   :  { %3315 = vmatprep.subr.bf16.mxu0 %v5441_v43  ;;  %v5462_v43 = vld [vmem:[#allocation9 + $0x254] ss:$8 sps:$4 sm:$0xff]  }
 0x4fa   :  { %3352 = vmatprep.subr.bf16.mxu1 %v5462_v43 }
 0x4fc   :  { %3316 = vmatpush2.bf16.msra.mxu0 %v5439_v0 }
 0x4fd   :  { %3317 = vmatprep.subr.bf16.mxu0 %v5444_v44  ;;  %v5457_v44 = vld [vmem:[#allocation9 + $0x1e0] ss:$8 sps:$4 sm:$0xff]  }
 0x500   :  { %3318 = vmatpush2.bf16.msra.mxu0 %v5442_v51 }
 0x501   :  { %3319 = vmatprep.subr.bf16.mxu0 %v5447_v33 }
 0x504   :  { %3320 = vmatpush2.bf16.msra.mxu0 %v5445_v3 }
 0x505   :  { %3321 = vmatprep.subr.bf16.mxu0 %v5453_v14 }
 0x508   :  { %3322 = vmatpush2.bf16.msra.mxu0 %v5451_v54 }
 0x509   :  { %3323 = vmatprep.subr.bf16.mxu0 %v5459_v16 }
 0x50c   :  { %3324 = vmatpush2.bf16.msra.mxu0 %v5457_v44 }
 0x58f   :  { %v2704_v1 = vpop.f32.mrf.mxu0 }
 0x590   :  { %v2712_v47 = vrot.slane %v2704_v1, %v6206_v45  ;;  %v5465_v1 = vld [vmem:[#allocation9 + $0x1d4] ss:$8 sps:$4 sm:$0xff]  }
 0x591   :  { %v2706_v17 = vpop.f32.mrf.mxu0  ;;  %3325 = vmatprep.subr.bf16.mxu0 %v5465_v1 }
 0x592   :  { %v2716_v52 = vrot.slane %v2706_v17, %v6206_v45  ;;  %v2717_v19 = vmul.f32 %v2712_v47, %v6216_v42  ;;  %v2719_v20 = vmul.f32 %v2712_v47, %v6218_v40  ;;  %v5460_v17 = vld [vmem:[#allocation9 + $0x250] ss:$8 sps:$4 sm:$0xff]   ;;  %v5468_v47 = vld [vmem:[#allocation9 + $0x244] ss:$8 sps:$4 sm:$0xff]  }
 0x593   :  { %3353 = vmatpush1.bf16.msra.mxu1 %v5460_v17 }
 0x594   :  { %v2718_v22 = vmul.f32 %v2716_v52, %v6220_v35  ;;  %v2720_v9 = vmul.f32 %v2716_v52, %v6224_v10  ;;  %v5463_v52 = vld [vmem:[#allocation9 + $0x1d0] ss:$8 sps:$4 sm:$0xff]   ;;  %3354 = vmatprep.subr.bf16.mxu1 %v5468_v47 }
 0x595   :  { %3326 = vmatpush2.bf16.msra.mxu0 %v5463_v52 }
 0x597   :  { %v2790_v46 = vpop.f32.mrf.mxu0 }
 0x598   :  { %v2798_v36 = vrot.slane %v2790_v46, %v6206_v45  ;;  %v5471_v46 = vld [vmem:[#allocation9 + $0x1c4] ss:$8 sps:$4 sm:$0xff]  }
 0x599   :  { %v2792_v48 = vpop.f32.mrf.mxu0  ;;  %3327 = vmatprep.subr.bf16.mxu0 %v5471_v46 }
 0x59a   :  { %v2803_v13 = vadd.f32 %v2798_v36, %v2717_v19  ;;  %v2805_v23 = vadd.f32 %v2798_v36, %v2719_v20  ;;  %v2802_v11 = vrot.slane %v2792_v48, %v6206_v45  ;;  %v5466_v19 = vld [vmem:[#allocation9 + $0x240] ss:$8 sps:$4 sm:$0xff]   ;;  %v5474_v20 = vld [vmem:[#allocation9 + $0x74] ss:$8 sps:$4 sm:$0xff]  }
 0x59b   :  { %v5469_v36 = vld [vmem:[#allocation9 + $0x1c0] ss:$8 sps:$4 sm:$0xff]   ;;  %3355 = vmatpush1.bf16.msra.mxu1 %v5466_v19 }
 0x59c   :  { %v4759_v24 = vmul.f32 -1.442695, %v2803_v13  ;;  %v4761_v25 = vmul.f32 -1.442695, %v2805_v23  ;;  %v2804_v26 = vadd.f32 %v2802_v11, %v2718_v22  ;;  %v2806_v4 = vadd.f32 %v2802_v11, %v2720_v9  ;;  %v5477_v22 = vld [vmem:[#allocation9 + $0x134] ss:$8 sps:$4 sm:$0xff]   ;;  %3601 = vmatprep.subr.bf16.mxu1 %v5474_v20  ;;  %3328 = vmatpush2.bf16.msra.mxu0 %v5469_v36 }
 0x59d   :  { %3652 = vmatprep.subr.bf16.mxu0 %v5477_v22  ;;  %v2928_v11 = vld [vmem:[#allocation3 + $0x20] sm:$0xf] }
 0x59e   :  { %5597 = vpow2.f32 %v4759_v24  ;;  %v4760_v62 = vmul.f32 -1.442695, %v2804_v26  ;;  %v4762_v42 = vmul.f32 -1.442695, %v2806_v4 }
 0x59f   :  { %5599 = vpow2.f32 %v4761_v25 }
 0x5a0   :  { %5601 = vpow2.f32 %v4760_v62 }
 0x5a1   :  { %5603 = vpow2.f32 %v4762_v42 }
 0x5ab   :  { %v5598_v40 = vpop.eup %5597 }
 0x5ac   :  { %v5600_v27 = vpop.eup %5599  ;;  %v2819_v35 = vadd.f32 1.0, %v5598_v40 }
 0x5ad   :  { %v5602_v2 = vpop.eup %5601  ;;  %v2821_v34 = vadd.f32 1.0, %v5600_v27 }
 0x5ae   :  { %v5604_v10 = vpop.eup %5603  ;;  %5605 = vrcp.f32 %v2819_v35  ;;  %v2820_v50 = vadd.f32 1.0, %v5602_v2 }
 0x5af   :  { %5607 = vrcp.f32 %v2821_v34  ;;  %v2822_v41 = vadd.f32 1.0, %v5604_v10  ;;  %v2922_v10 = vld [vmem:[#allocation3 + $0x14] sm:$0x1] }
 0x5b0   :  { %5609 = vrcp.f32 %v2820_v50 }
 0x5b1   :  { %5611 = vrcp.f32 %v2822_v41 }
 0x5bb   :  { %v5606_v55 = vpop.eup %5605 }
 0x5bc   :  { %v5608_v57 = vpop.eup %5607  ;;  %v2831_v21 = vmul.f32 %v5606_v55, %v2803_v13  ;;  %v2907_v13 = vld [vmem:[#allocation3 + $0x8] sm:$0xf]  ;;  %v2934_v55 = vld [vmem:[#allocation3 + $0x2c] sm:$0x1] }
 0x5bd   :  { %v5610_v58 = vpop.eup %5609  ;;  %v2833_v30 = vmul.f32 %v5608_v57, %v2805_v23 }
 0x5be   :  { %v5612_v18 = vpop.eup %5611  ;;  %v2832_v29 = vmul.f32 %v5610_v58, %v2804_v26  ;;  %v2917_v58 = vld [vmem:[#allocation3 + $0xc] sm:$0x11] }
 0x5bf   :  { %v2834_v31 = vmul.f32 %v5612_v18, %v2806_v4 }
 0x5c0   :  { %v4909_v32 = vpack.c.bf16 %v2832_v29, %v2831_v21  ;;  %v2931_v21 = vld [vmem:[#allocation3 + $0x24] sm:$0x11] }
 0x5c1   :  { %v4910_v37 = vpack.c.bf16 %v2834_v31, %v2833_v30 }
 0x5c2   :  { %v2855_v38 = vshrl.u32 %v4909_v32, 16  ;;  %v2858_v7 = vshll.u32 %v4909_v32, 16 }
 0x5c3   :  { %v2863_v39 = vshrl.u32 %v4910_v37, 16  ;;  %v2866_v12 = vshll.u32 %v4910_v37, 16 }
 0x5c4   :  { %v2857_v49 = vrot.slane %v2855_v38, 7 }
 0x5c5   :  { %v2865_v60 = vrot.slane %v2863_v39, 7 }
 0x5c6   :  { %v2860_v63 = vor.u32 %v2858_v7, %v2857_v49  ;;  %v2861_v0 = vrot.slane %v2857_v49, 4 }
 0x5c7   :  { %v2868_v28 = vor.u32 %v2866_v12, %v2865_v60  ;;  %v2869_v51 = vrot.slane %v2865_v60, 4 }
 0x5c8   :  { %2870 = vrot.lane.b32.xlu0 %v2860_v63, %s5717_s3 }
 0x5c9   :  { %2874 = vrot.lane.b32.xlu1 %v2868_v28, %s5717_s3 }
 0x5cc   :  { %2872 = vrot.lane.b32.xlu0 %v2861_v0, %s5717_s3 }
 0x5cd   :  { %2876 = vrot.lane.b32.xlu1 %v2869_v51, %s5717_s3 }
 0x63a   :  { %v2871_v23 = vpop.permute.xlu0 %2870 }
 0x63b   :  { %v2875_v24 = vpop.permute.xlu1 %2874  ;;  %v2878_v25 = vrot.slane %v2871_v23, 4 }
 0x63c   :  { %v2880_v4 = vrot.slane %v2875_v24, 4 }
 0x63d   :  { %v2883_v42 = vsel %vm2452_vm7, %v2878_v25, %v2871_v23  ;;  %v2908_v40 = vsel %vm2906_vm3, %v2878_v25, %v2907_v13 }
 0x63e   :  { %v2885_v27 = vsel %vm2452_vm7, %v2880_v4, %v2875_v24  ;;  %v2929_v35 = vsel %vm2906_vm3, %v2880_v4, %v2928_v11  ;;  %v6369_v2 = vsel %vm2901_vm5, %v2883_v42, 0  ;;  %2909 = vst [vmem:[#allocation3 + $0x8] sm:$0xf] %v2908_v40  ;;  %v2873_v50 = vpop.permute.xlu0 %2872  ;;  %vm2916_vm3 = vmor %vm6358_vm13, %vm6353_vm9 }
 0x63f   :  { %v6381_v41 = vsel %vm2901_vm5, %v2885_v27, 0  ;;  %2930 = vst [vmem:[#allocation3 + $0x20] sm:$0xf] %v2929_v35  ;;  %2904 = vst [vmem:[#allocation3] sm:$0xff] %v6369_v2  ;;  %v2877_v57 = vpop.permute.xlu1 %2876  ;;  %v2879_v18 = vrot.slane %v2873_v50, 4  ;;  %v2986_v30 = vshrl.u32 %v6369_v2, 16 }
 0x640   :  { %2927 = vst [vmem:[#allocation3 + $0x18] sm:$0xff] %v6381_v41  ;;  %v2881_v29 = vrot.slane %v2877_v57, 4  ;;  %v2989_v3 = vshll.u32 %v6369_v2, 16  ;;  %v3014_v33 = vshrl.u32 %v6381_v41, 16  ;;  %v3017_v49 = vshll.u32 %v6381_v41, 16 }
 0x641   :  { %v2884_v31 = vsel %vm2452_vm7, %v2879_v18, %v2873_v50  ;;  %v2923_v32 = vsel %vm6372_vm10, %v2879_v18, %v2922_v10  ;;  %v4809_v60 = vcombine.low %v6369_v2, %v6381_v41  ;;  %v2988_v61 = vrot.slane %v2986_v30, 4  ;;  %v5515_v27 = vld [vmem:[#allocation9] ss:$8 sps:$4 sm:$0xff]   ;;  %v5538_v30 = vld [vmem:[#allocation9 + $0x294] ss:$8 sps:$4 sm:$0xff]  }
 0x642   :  { %v2886_v37 = vsel %vm2452_vm7, %v2881_v29, %v2877_v57  ;;  %v2935_v38 = vsel %vm6372_vm10, %v2881_v29, %v2934_v55  ;;  %v2918_v39 = vsel %vm2916_vm3, %v2884_v31, %v2917_v58  ;;  %2924 = vst [vmem:[#allocation3 + $0x14] sm:$0x1] %v2923_v32  ;;  %v2991_v5 = vrot.slane %v2989_v3, 5  ;;  %v5472_v55 = vld [vmem:[#allocation9 + $0x70] ss:$8 sps:$4 sm:$0xff]  }
 0x643   :  { %v2932_v7 = vsel %vm2916_vm3, %v2886_v37, %v2931_v21  ;;  %2936 = vst [vmem:[#allocation3 + $0x2c] sm:$0x1] %v2935_v38  ;;  %2919 = vst [vmem:[#allocation3 + $0xc] sm:$0x11] %v2918_v39  ;;  %v3016_v28 = vrot.slane %v3014_v33, 4  ;;  %v3019_v56 = vrot.slane %v3017_v49, 5  ;;  %v4810_v39 = vcombine.high %v6369_v2, %v6381_v41 }
 0x644   :  { %2933 = vst [vmem:[#allocation3 + $0x24] sm:$0x11] %v2932_v7  ;;  %v2992_v17 = vor.u32 %v2991_v5, %v2988_v61  ;;  %v5475_v37 = vld [vmem:[#allocation9 + $0x130] ss:$8 sps:$4 sm:$0xff]   ;;  %v5480_v38 = vld [vmem:[#allocation9 + $0x64] ss:$8 sps:$4 sm:$0xff]  }
 0x645   :  { %v6411_v12 = vld [vmem:[#allocation3 + $0x8] sm:$0xf]  ;;  %v3020_v20 = vor.u32 %v3019_v56, %v3016_v28  ;;  %v5483_v49 = vld [vmem:[#allocation9 + $0x124] ss:$8 sps:$4 sm:$0xff]   ;;  %v5478_v61 = vld [vmem:[#allocation9 + $0x60] ss:$8 sps:$4 sm:$0xff]  }
 0x646   :  { %v6413_v63 = vld [vmem:[#allocation3 + $0x20] sm:$0xf]  ;;  %v3000_v54 = vshrl.u32 %v6411_v12, 16  ;;  %v3003_v14 = vshll.u32 %v6411_v12, 16  ;;  %v3688_v13 = vld [vmem:[#allocation3 + $0x8] sm:$0xe] }
 0x647   :  { %v3028_v15 = vshrl.u32 %v6413_v63, 16  ;;  %v3031_v16 = vshll.u32 %v6413_v63, 16  ;;  %v3690_v25 = vld [vmem:[#allocation3 + $0x20] sm:$0xe]  ;;  %v2993_v42 = vrot.slane %v2992_v17, 4  ;;  %v3021_v34 = vrot.slane %v3020_v20, 4 }
 0x648   :  { %v3002_v43 = vrot.slane %v3000_v54, 4  ;;  %v3005_v0 = vrot.slane %v3003_v14, 5  ;;  %v4854_v50 = vrot.slane %v3688_v13, 9  ;;  %v4856_v18 = vrot.slane %v3690_v25, 9  ;;  %v5486_v54 = vld [vmem:[#allocation9 + $0x54] ss:$8 sps:$4 sm:$0xff]  }
 0x649   :  { %v2982_v44 = vld [vmem:[#allocation3 + $0x14] sm:$0x1]  ;;  %v3030_v51 = vrot.slane %v3028_v15, 4  ;;  %v3033_v1 = vrot.slane %v3031_v16, 5  ;;  %v5481_v14 = vld [vmem:[#allocation9 + $0x120] ss:$8 sps:$4 sm:$0xff]  }
 0x64a   :  { %v2984_v47 = vld [vmem:[#allocation3 + $0x2c] sm:$0x1]  ;;  %v3006_v52 = vor.u32 %v3005_v0, %v3002_v43  ;;  %v3009_v46 = vshll.u32 %v2982_v44, 16  ;;  %v3705_v26 = vrot.slane %v2982_v44, 5  ;;  %v5484_v56 = vld [vmem:[#allocation9 + $0x50] ss:$8 sps:$4 sm:$0xff]  }
 0x64b   :  { %v6419_v19 = vld [vmem:[#allocation3 + $0xc] sm:$0x11]  ;;  %v3034_v36 = vor.u32 %v3033_v1, %v3030_v51  ;;  %v3037_v22 = vshll.u32 %v2984_v47, 16  ;;  %v6421_v48 = vld [vmem:[#allocation3 + $0x24] sm:$0x11]  ;;  %v3713_v32 = vrot.slane %v2984_v47, 5 }
 0x64c   :  { %v2995_v9 = vshll.u32 %v6419_v19, 16  ;;  %v3007_v23 = vrot.slane %v3006_v52, 4  ;;  %v3011_v11 = vrot.slane %v3009_v46, 5  ;;  %v3023_v24 = vshll.u32 %v6421_v48, 16  ;;  %v5489_v28 = vld [vmem:[#allocation9 + $0x114] ss:$8 sps:$4 sm:$0xff]  }
 0x64d   :  { %v3035_v4 = vrot.slane %v3034_v36, 4  ;;  %v3039_v62 = vrot.slane %v3037_v22, 5  ;;  %v6435_v31 = vsel %vm5867_vm14, %v4854_v50, %v3705_v26  ;;  %v6442_v7 = vsel %vm5867_vm14, %v4856_v18, %v3713_v32  ;;  %v5492_v15 = vld [vmem:[#allocation9 + $0x44] ss:$8 sps:$4 sm:$0xff]   ;;  %v5487_v16 = vld [vmem:[#allocation9 + $0x110] ss:$8 sps:$4 sm:$0xff]  }
 0x64e   :  { %v2997_v40 = vrot.slane %v2995_v9, 5  ;;  %v3012_v35 = vsel %vm5852_vm11, %v3007_v23, %v3011_v11  ;;  %v3025_v10 = vrot.slane %v3023_v24, 5  ;;  %v4859_v5 = vcombine.low %v6435_v31, %v6442_v7  ;;  %v5495_v43 = vld [vmem:[#allocation9 + $0x104] ss:$8 sps:$4 sm:$0xff]   ;;  %v5490_v0 = vld [vmem:[#allocation9 + $0x40] ss:$8 sps:$4 sm:$0xff]  }
 0x64f   :  { %v3040_v57 = vsel %vm5852_vm11, %v3035_v4, %v3039_v62  ;;  %v3687_v44 = vld [vmem:[#allocation3] sm:$0xee]  ;;  %v3689_v51 = vld [vmem:[#allocation3 + $0x18] sm:$0xee]  ;;  %v3701_v17 = vrot.slane %v6419_v19, 5  ;;  %v3709_v47 = vrot.slane %v6421_v48, 5  ;;  %v4811_v23 = vcombine.low %v6411_v12, %v6413_v63 }
 0x650   :  { %v2998_v58 = vsel %vm5852_vm11, %v2993_v42, %v2997_v40  ;;  %v4767_v21 = vcombine.low %v3012_v35, %v3040_v57  ;;  %v3026_v29 = vsel %vm5852_vm11, %v3021_v34, %v3025_v10  ;;  %v5498_v1 = vld [vmem:[#allocation9 + $0x34] ss:$8 sps:$4 sm:$0xff]   ;;  %v5493_v52 = vld [vmem:[#allocation9 + $0x100] ss:$8 sps:$4 sm:$0xff]   ;;  %v4853_v20 = vrot.slane %v3687_v44, 9  ;;  %vm6746_vm11 = vmmov %vm6745_vm6 }
 0x651   :  { %v4765_v3 = vcombine.low %v2998_v58, %v3026_v29  ;;  %v4766_v33 = vcombine.high %v2998_v58, %v3026_v29  ;;  %v5502_v46 = vld [vmem:[#allocation9 + $0x2f4] ss:$8 sps:$4 sm:$0xff]   ;;  %v4855_v36 = vrot.slane %v3689_v51, 9  ;;  %v5496_v22 = vld [vmem:[#allocation9 + $0x30] ss:$8 sps:$4 sm:$0xff]   ;;  %v4129_v7 = vld [vmem:[%s6654_s9 + $0xe8] sm:$0xff] }
 0x652   :  { %4808 = vmatmul.mubr.msk.bf16.vlgmr.msra.gmra.mxu1 %vm6745_vm6, %v4767_v21  ;;  %v6451_v9 = vsel %vm5867_vm14, %v4853_v20, %v3701_v17  ;;  %v5505_v19 = vld [vmem:[#allocation9 + $0x24] ss:$8 sps:$4 sm:$0xff]   ;;  %v5500_v48 = vld [vmem:[#allocation9 + $0x2f0] ss:$8 sps:$4 sm:$0xff]   ;;  %v5503_v25 = vld [vmem:[#allocation9 + $0x20] ss:$8 sps:$4 sm:$0xff]  }
 0x653   :  { %3602 = vmatpush1.bf16.msra.mxu1 %v5472_v55  ;;  %3329 = vmatprep.mubr.bf16.mxu0 %v4766_v33  ;;  %v6455_v13 = vsel %vm5867_vm14, %v4855_v36, %v3709_v47  ;;  %v5508_v11 = vld [vmem:[#allocation9 + $0x2e4] ss:$8 sps:$4 sm:$0xff]   ;;  %v5511_v26 = vld [vmem:[#allocation9 + $0x14] ss:$8 sps:$4 sm:$0xff]   ;;  %v5506_v4 = vld [vmem:[#allocation9 + $0x2e0] ss:$8 sps:$4 sm:$0xff]  }
 0x654   :  { %3633 = vmatprep.mubr.bf16.mxu1 %v4810_v39  ;;  %3330 = vmatmul.mubr.bf16.vlgmr.msra.gmra.mxu0 %v4765_v3  ;;  %v4858_v24 = vcombine.high %v6451_v9, %v6455_v13  ;;  %v5514_v62 = vld [vmem:[#allocation9 + $0x2d4] ss:$8 sps:$4 sm:$0xff]   ;;  %v5509_v42 = vld [vmem:[#allocation9 + $0x10] ss:$8 sps:$4 sm:$0xff]   ;;  %v5517_v12 = vld [vmem:[#allocation9 + $0x4] ss:$8 sps:$4 sm:$0xff]  }
 0x655   :  { %3653 = vmatpush1.bf16.msra.mxu0 %v5475_v37  ;;  %3603 = vmatprep.subr.bf16.mxu1 %v5480_v38  ;;  %v5512_v63 = vld [vmem:[#allocation9 + $0x2d0] ss:$8 sps:$4 sm:$0xff]   ;;  %v5520_v40 = vld [vmem:[#allocation9 + $0x2c4] ss:$8 sps:$4 sm:$0xff]   ;;  %v5523_v35 = vld [vmem:[#allocation9 + $0xf4] ss:$8 sps:$4 sm:$0xff]  }
 0x656   :  { %3654 = vmatprep.subr.bf16.mxu0 %v5483_v49  ;;  %3676 = vmatprep.mubr.bf16.mxu0 %v6732_v6  ;;  %v5518_v34 = vld [vmem:[#allocation9 + $0x2c0] ss:$8 sps:$4 sm:$0xff]   ;;  %v5526_v10 = vld [vmem:[#allocation9 + $0x2b4] ss:$8 sps:$4 sm:$0xff]   ;;  %v5521_v50 = vld [vmem:[#allocation9 + $0xf0] ss:$8 sps:$4 sm:$0xff]  }
 0x657   :  { %3604 = vmatpush1.bf16.msra.mxu1 %v5478_v61  ;;  %v5529_v55 = vld [vmem:[#allocation9 + $0xe4] ss:$8 sps:$4 sm:$0xff]   ;;  %v5524_v57 = vld [vmem:[#allocation9 + $0x2b0] ss:$8 sps:$4 sm:$0xff]   ;;  %v5527_v18 = vld [vmem:[#allocation9 + $0xe0] ss:$8 sps:$4 sm:$0xff]  }
 0x658   :  { %3605 = vmatprep.subr.bf16.mxu1 %v5486_v54  ;;  %v5532_v58 = vld [vmem:[#allocation9 + $0x2a4] ss:$8 sps:$4 sm:$0xff]   ;;  %v5535_v21 = vld [vmem:[#allocation9 + $0xd4] ss:$8 sps:$4 sm:$0xff]   ;;  %v5530_v29 = vld [vmem:[#allocation9 + $0x2a0] ss:$8 sps:$4 sm:$0xff]  }
 0x659   :  { %3655 = vmatpush1.bf16.msra.mxu0 %v5481_v14  ;;  %v5533_v32 = vld [vmem:[#allocation9 + $0xd0] ss:$8 sps:$4 sm:$0xff]   ;;  %v5541_v3 = vld [vmem:[#allocation9 + $0xc4] ss:$8 sps:$4 sm:$0xff]   ;;  %v5539_v38 = vld [vmem:[#allocation9 + $0xc0] ss:$8 sps:$4 sm:$0xff]  }
 0x65a   :  { %3656 = vmatprep.subr.bf16.mxu0 %v5489_v28  ;;  %v5536_v33 = vld [vmem:[#allocation9 + $0x290] ss:$8 sps:$4 sm:$0xff]   ;;  %v5544_v37 = vld [vmem:[#allocation9 + $0x284] ss:$8 sps:$4 sm:$0xff]   ;;  %v5547_v39 = vld [vmem:[#allocation9 + $0xb4] ss:$8 sps:$4 sm:$0xff]  }
 0x65b   :  { %3606 = vmatpush1.bf16.msra.mxu1 %v5484_v56  ;;  %v5542_v49 = vld [vmem:[#allocation9 + $0x280] ss:$8 sps:$4 sm:$0xff]   ;;  %v5550_v61 = vld [vmem:[#allocation9 + $0x374] ss:$8 sps:$4 sm:$0xff]   ;;  %v5545_v54 = vld [vmem:[#allocation9 + $0xb0] ss:$8 sps:$4 sm:$0xff]  }
 0x65c   :  { %3607 = vmatprep.subr.bf16.mxu1 %v5492_v15  ;;  %v5553_v14 = vld [vmem:[#allocation9 + $0xa4] ss:$8 sps:$4 sm:$0xff]   ;;  %v5548_v28 = vld [vmem:[#allocation9 + $0x370] ss:$8 sps:$4 sm:$0xff]   ;;  %v5551_v15 = vld [vmem:[#allocation9 + $0xa0] ss:$8 sps:$4 sm:$0xff]  }
 0x65d   :  { %3657 = vmatpush1.bf16.msra.mxu0 %v5487_v16  ;;  %v5556_v56 = vld [vmem:[#allocation9 + $0x364] ss:$8 sps:$4 sm:$0xff]   ;;  %v5559_v16 = vld [vmem:[#allocation9 + $0x94] ss:$8 sps:$4 sm:$0xff]   ;;  %v5557_v44 = vld [vmem:[#allocation9 + $0x90] ss:$8 sps:$4 sm:$0xff]  }
 0x65e   :  { %3658 = vmatprep.subr.bf16.mxu0 %v5495_v43  ;;  %v5554_v43 = vld [vmem:[#allocation9 + $0x360] ss:$8 sps:$4 sm:$0xff]   ;;  %v5565_v51 = vld [vmem:[#allocation9 + $0x84] ss:$8 sps:$4 sm:$0xff]   ;;  %v5574_v20 = vld [vmem:[#allocation9 + $0x334] ss:$8 sps:$4 sm:$0xff]  }
 0x65f   :  { %3608 = vmatpush1.bf16.msra.mxu1 %v5490_v0  ;;  %v5562_v0 = vld [vmem:[#allocation9 + $0x354] ss:$8 sps:$4 sm:$0xff]   ;;  %v5568_v17 = vld [vmem:[#allocation9 + $0x344] ss:$8 sps:$4 sm:$0xff]   ;;  %v5563_v47 = vld [vmem:[#allocation9 + $0x80] ss:$8 sps:$4 sm:$0xff]  }
 0x660   :  { %3609 = vmatprep.subr.bf16.mxu1 %v5498_v1  ;;  %v5560_v1 = vld [vmem:[#allocation9 + $0x350] ss:$8 sps:$4 sm:$0xff]   ;;  %v5592_v2 = vld [vmem:[#allocation9 + $0x304] ss:$8 sps:$4 sm:$0xff]   ;;  %v5587_v41 = vld [vmem:[#allocation9 + $0x380] ss:$8 sps:$4 sm:$0xff]  }
 0x661   :  { %3659 = vmatpush1.bf16.msra.mxu0 %v5493_v52  ;;  %v5571_v52 = vld [vmem:[#allocation9 + $0x3b4] ss:$8 sps:$4 sm:$0xff]   ;;  %v5569_v36 = vld [vmem:[#allocation9 + $0x3b0] ss:$8 sps:$4 sm:$0xff]   ;;  %vm6747_vm14 = vmmov %vm6745_vm6 }
 0x662   :  { %3970 = vmatprep.subr.bf16.mxu0 %v5502_v46  ;;  %v5566_v46 = vld [vmem:[#allocation9 + $0x340] ss:$8 sps:$4 sm:$0xff]   ;;  %v4114_v31 = vld [vmem:[%s6654_s9 + $0x70] sm:$0xff] }
 0x663   :  { %3610 = vmatpush1.bf16.msra.mxu1 %v5496_v22  ;;  %v5577_v22 = vld [vmem:[#allocation9 + $0x3a4] ss:$8 sps:$4 sm:$0xff]  }
 0x664   :  { %4852 = vmatmul.mubr.msk.bf16.vlgmr.msra.gmra.mxu0 %vm6746_vm11, %v4811_v23  ;;  %3611 = vmatprep.subr.bf16.mxu1 %v5505_v19  ;;  %v5572_v19 = vld [vmem:[#allocation9 + $0x330] ss:$8 sps:$4 sm:$0xff]   ;;  %v5575_v23 = vld [vmem:[#allocation9 + $0x3a0] ss:$8 sps:$4 sm:$0xff]  }
 0x665   :  { %3971 = vmatpush1.bf16.msra.mxu0 %v5500_v48  ;;  %4002 = vmatprep.mubr.bf16.mxu0 %v4858_v24  ;;  %v5580_v48 = vld [vmem:[#allocation9 + $0x324] ss:$8 sps:$4 sm:$0xff]   ;;  %v5578_v24 = vld [vmem:[#allocation9 + $0x320] ss:$8 sps:$4 sm:$0xff]  }
 0x666   :  { %3972 = vmatprep.subr.bf16.mxu0 %v5508_v11  ;;  %v5583_v11 = vld [vmem:[#allocation9 + $0x394] ss:$8 sps:$4 sm:$0xff]  }
 0x667   :  { %3612 = vmatpush1.bf16.msra.mxu1 %v5503_v25  ;;  %v5586_v25 = vld [vmem:[#allocation9 + $0x314] ss:$8 sps:$4 sm:$0xff]  }
 0x668   :  { %3613 = vmatprep.subr.bf16.mxu1 %v5511_v26  ;;  %v5581_v26 = vld [vmem:[#allocation9 + $0x390] ss:$8 sps:$4 sm:$0xff]  }
 0x669   :  { %3973 = vmatpush1.bf16.msra.mxu0 %v5506_v4  ;;  %v5589_v4 = vld [vmem:[#allocation9 + $0x384] ss:$8 sps:$4 sm:$0xff]  }
 0x66a   :  { %3974 = vmatprep.subr.bf16.mxu0 %v5514_v62  ;;  %v5584_v62 = vld [vmem:[#allocation9 + $0x310] ss:$8 sps:$4 sm:$0xff]  }
 0x66b   :  { %3614 = vmatpush1.bf16.msra.mxu1 %v5509_v42  ;;  %v4131_v42 = vld [vmem:[%s6654_s9 + $0xf8] sm:$0xff] }
 0x66c   :  { %3615 = vmatprep.subr.bf16.mxu1 %v5517_v12  ;;  %v4115_v12 = vld [vmem:[%s6654_s9 + $0x78] sm:$0xff] }
 0x66d   :  { %3975 = vmatpush1.bf16.msra.mxu0 %v5512_v63  ;;  %v4112_v63 = vld [vmem:[%s6654_s9 + $0x60] sm:$0xff] }
 0x66e   :  { %3976 = vmatprep.subr.bf16.mxu0 %v5520_v40  ;;  %v4127_v40 = vld [vmem:[%s6654_s9 + $0xd8] sm:$0xff] }
 0x66f   :  { %3616 = vmatpush1.bf16.msra.mxu1 %v5515_v27  ;;  %v4111_v27 = vld [vmem:[%s6654_s9 + $0x58] sm:$0xff] }
 0x670   :  { %3617 = vmatprep.subr.bf16.mxu1 %v5523_v35  ;;  %v4126_v35 = vld [vmem:[%s6654_s9 + $0xd0] sm:$0xff] }
 0x671   :  { %3977 = vmatpush1.bf16.msra.mxu0 %v5518_v34  ;;  %v4110_v34 = vld [vmem:[%s6654_s9 + $0x50] sm:$0xff] }
 0x672   :  { %3978 = vmatprep.subr.bf16.mxu0 %v5526_v10  ;;  %v4125_v10 = vld [vmem:[%s6654_s9 + $0xc8] sm:$0xff] }
 0x673   :  { %3618 = vmatpush2.bf16.msra.mxu1 %v5521_v50  ;;  %v4109_v50 = vld [vmem:[%s6654_s9 + $0x48] sm:$0xff] }
 0x674   :  { %3619 = vmatprep.subr.bf16.mxu1 %v5529_v55  ;;  %v4124_v55 = vld [vmem:[%s6654_s9 + $0xc0] sm:$0xff] }
 0x675   :  { %3979 = vmatpush1.bf16.msra.mxu0 %v5524_v57  ;;  %v4108_v57 = vld [vmem:[%s6654_s9 + $0x40] sm:$0xff] }
 0x676   :  { %3980 = vmatprep.subr.bf16.mxu0 %v5532_v58  ;;  %v4123_v58 = vld [vmem:[%s6654_s9 + $0xb8] sm:$0xff] }
 0x677   :  { %3620 = vmatpush2.bf16.msra.mxu1 %v5527_v18  ;;  %v4107_v18 = vld [vmem:[%s6654_s9 + $0x38] sm:$0xff] }
 0x678   :  { %3621 = vmatprep.subr.bf16.mxu1 %v5535_v21  ;;  %v4122_v21 = vld [vmem:[%s6654_s9 + $0xb0] sm:$0xff] }
 0x679   :  { %3981 = vmatpush1.bf16.msra.mxu0 %v5530_v29  ;;  %v4106_v29 = vld [vmem:[%s6654_s9 + $0x30] sm:$0xff] }
 0x67a   :  { %3982 = vmatprep.subr.bf16.mxu0 %v5538_v30  ;;  %v4121_v30 = vld [vmem:[%s6654_s9 + $0xa8] sm:$0xff] }
 0x67b   :  { %3622 = vmatpush2.bf16.msra.mxu1 %v5533_v32  ;;  %v4105_v32 = vld [vmem:[%s6654_s9 + $0x28] sm:$0xff] }
 0x67c   :  { %3623 = vmatprep.subr.bf16.mxu1 %v5541_v3  ;;  %v4120_v3 = vld [vmem:[%s6654_s9 + $0xa0] sm:$0xff] }
 0x67d   :  { %3983 = vmatpush1.bf16.msra.mxu0 %v5536_v33  ;;  %v4104_v33 = vld [vmem:[%s6654_s9 + $0x20] sm:$0xff] }
 0x67e   :  { %3984 = vmatprep.subr.bf16.mxu0 %v5544_v37  ;;  %v4119_v37 = vld [vmem:[%s6654_s9 + $0x98] sm:$0xff] }
 0x67f   :  { %3624 = vmatpush2.bf16.msra.mxu1 %v5539_v38  ;;  %v4103_v38 = vld [vmem:[%s6654_s9 + $0x18] sm:$0xff] }
 0x680   :  { %3625 = vmatprep.subr.bf16.mxu1 %v5547_v39  ;;  %v4118_v39 = vld [vmem:[%s6654_s9 + $0x90] sm:$0xff] }
 0x681   :  { %3985 = vmatpush1.bf16.msra.mxu0 %v5542_v49  ;;  %v4102_v49 = vld [vmem:[%s6654_s9 + $0x10] sm:$0xff] }
 0x682   :  { %3986 = vmatprep.subr.bf16.mxu0 %v5550_v61  ;;  %v4117_v61 = vld [vmem:[%s6654_s9 + $0x88] sm:$0xff] }
 0x683   :  { %3626 = vmatpush2.bf16.msra.mxu1 %v5545_v54  ;;  %v4101_v54 = vld [vmem:[%s6654_s9 + $0x8] sm:$0xff] }
 0x684   :  { %3627 = vmatprep.subr.bf16.mxu1 %v5553_v14  ;;  %v4116_v14 = vld [vmem:[%s6654_s9 + $0x80] sm:$0xff] }
 0x685   :  { %3987 = vmatpush2.bf16.msra.mxu0 %v5548_v28  ;;  %v4100_v28 = vld [vmem:[%s6654_s9] sm:$0xff] }
 0x686   :  { %3988 = vmatprep.subr.bf16.mxu0 %v5556_v56 }
 0x687   :  { %3628 = vmatpush2.bf16.msra.mxu1 %v5551_v15 }
 0x688   :  { %3629 = vmatprep.subr.bf16.mxu1 %v5559_v16 }
 0x689   :  { %3989 = vmatpush2.bf16.msra.mxu0 %v5554_v43 }
 0x68a   :  { %3990 = vmatprep.subr.bf16.mxu0 %v5562_v0 }
 0x68b   :  { %3630 = vmatpush2.bf16.msra.mxu1 %v5557_v44 }
 0x68c   :  { %3631 = vmatprep.subr.bf16.mxu1 %v5565_v51 }
 0x68d   :  { %3991 = vmatpush2.bf16.msra.mxu0 %v5560_v1 }
 0x68e   :  { %3992 = vmatprep.subr.bf16.mxu0 %v5568_v17 }
 0x68f   :  { %3632 = vmatpush2.bf16.msra.mxu1 %v5563_v47 }
 0x690   :  { %4021 = vmatprep.subr.bf16.mxu1 %v5571_v52 }
 0x691   :  { %3993 = vmatpush2.bf16.msra.mxu0 %v5566_v46 }
 0x692   :  { %3634 = vmatmul.mubr.bf16.vlgmr.msra.gmra.mxu1 %v4809_v60  ;;  %3994 = vmatprep.subr.bf16.mxu0 %v5574_v20  ;;  %v5590_v60 = vld [vmem:[#allocation9 + $0x300] ss:$8 sps:$4 sm:$0xff]  }
 0x693   :  { %4022 = vmatpush1.bf16.msra.mxu1 %v5569_v36  ;;  %4045 = vmatprep.mubr.bf16.mxu1 %v6732_v6  ;;  %v4857_v6 = vcombine.low %v6451_v9, %v6455_v13  ;;  %v4130_v9 = vld [vmem:[%s6654_s9 + $0xf0] sm:$0xff]  ;;  %v4128_v13 = vld [vmem:[%s6654_s9 + $0xe0] sm:$0xff] }
 0x694   :  { %4023 = vmatprep.subr.bf16.mxu1 %v5577_v22 }
 0x695   :  { %3995 = vmatpush2.bf16.msra.mxu0 %v5572_v19 }
 0x696   :  { %3996 = vmatprep.subr.bf16.mxu0 %v5580_v48 }
 0x697   :  { %4024 = vmatpush1.bf16.msra.mxu1 %v5575_v23 }
 0x698   :  { %4025 = vmatprep.subr.bf16.mxu1 %v5583_v11 }
 0x699   :  { %3997 = vmatpush2.bf16.msra.mxu0 %v5578_v24 }
 0x69a   :  { %3998 = vmatprep.subr.bf16.mxu0 %v5586_v25  ;;  %v4060_v25 = vld [vmem:[%s6651_s6] sm:$0x3] }
 0x69b   :  { %4026 = vmatpush1.bf16.msra.mxu1 %v5581_v26 }
 0x69c   :  { %4027 = vmatprep.subr.bf16.mxu1 %v5589_v4 }
 0x69d   :  { %3999 = vmatpush2.bf16.msra.mxu0 %v5584_v62 }
 0x69e   :  { %4000 = vmatprep.subr.bf16.mxu0 %v5592_v2 }
 0x69f   :  { %4028 = vmatpush1.bf16.msra.mxu1 %v5587_v41 }
 0x6a0   :  { %4981 = vmatprep.subr.mxu1 %v4131_v42 }
 0x6a1   :  { %4001 = vmatpush2.bf16.msra.mxu0 %v5590_v60 }
 0x6a2   :  { %4900 = vmatmul.mubr.msk.bf16.vlgmr.msra.gmra.mxu1 %vm6747_vm14, %v4859_v5  ;;  %5029 = vmatprep.subr.bf16.mxu0 %v5716_v8  ;;  %v4113_v5 = vld [vmem:[%s6654_s9 + $0x68] sm:$0xff] }
 0x6a3   :  { %4982 = vmatpush3.msra.mxu1 %v4115_v12  ;;  %v4065_v12 = vrot.slane %v4060_v25, %v6206_v45 }
 0x6a4   :  { %4003 = vmatmul.mubr.bf16.vlgmr.msra.gmra.mxu0 %v4857_v6  ;;  %4983 = vmatprep.subr.mxu1 %v4130_v9 }
 0x6a5   :  { %4984 = vmatpush3.msra.mxu1 %v4114_v31  ;;  %5031 = vmatprep.mubr.msk.bf16.mxu0 %vm5718_vm0, %v5716_v8 }
 0x6a6   :  { %4985 = vmatprep.subr.mxu1 %v4129_v7 }
 0x6a7   :  { %4986 = vmatpush3.msra.mxu1 %v4113_v5 }
 0x6a8   :  { %4987 = vmatprep.subr.mxu1 %v4128_v13 }
 0x6a9   :  { %4988 = vmatpush3.msra.mxu1 %v4112_v63 }
 0x6aa   :  { %4989 = vmatprep.subr.mxu1 %v4127_v40  ;;  %v4069_v40 = vrot.slane %v4060_v25, %v6212_v59 }
 0x6ab   :  { %4990 = vmatpush3.msra.mxu1 %v4111_v27 }
 0x6ac   :  { %4991 = vmatprep.subr.mxu1 %v4126_v35 }
 0x6ad   :  { %4992 = vmatpush3.msra.mxu1 %v4110_v34 }
 0x6ae   :  { %4993 = vmatprep.subr.mxu1 %v4125_v10 }
 0x6af   :  { %4994 = vmatpush3.msra.mxu1 %v4109_v50 }
 0x6b0   :  { %4995 = vmatprep.subr.mxu1 %v4124_v55 }
 0x6b1   :  { %4996 = vmatpush3.msra.mxu1 %v4108_v57 }
 0x6b2   :  { %4997 = vmatprep.subr.mxu1 %v4123_v58 }
 0x6b3   :  { %4998 = vmatpush3.msra.mxu1 %v4107_v18 }
 0x6b4   :  { %4999 = vmatprep.subr.mxu1 %v4122_v21 }
 0x6b5   :  { %5000 = vmatpush3.msra.mxu1 %v4106_v29 }
 0x6b6   :  { %5001 = vmatprep.subr.mxu1 %v4121_v30 }
 0x6b7   :  { %5002 = vmatpush3.msra.mxu1 %v4105_v32 }
 0x6b8   :  { %5003 = vmatprep.subr.mxu1 %v4120_v3 }
 0x6b9   :  { %5004 = vmatpush3.msra.mxu1 %v4104_v33 }
 0x6ba   :  { %5005 = vmatprep.subr.mxu1 %v4119_v37 }
 0x6bb   :  { %5006 = vmatpush3.msra.mxu1 %v4103_v38 }
 0x6bc   :  { %5007 = vmatprep.subr.mxu1 %v4118_v39 }
 0x6bd   :  { %5008 = vmatpush3.msra.mxu1 %v4102_v49 }
 0x6be   :  { %5009 = vmatprep.subr.mxu1 %v4117_v61 }
 0x6bf   :  { %5010 = vmatpush3.msra.mxu1 %v4101_v54 }
 0x6c0   :  { %5011 = vmatprep.subr.mxu1 %v4116_v14 }
 0x6c1   :  { %5012 = vmatpush3.msra.mxu1 %v4100_v28 }
 0x6c2   :  { %5021 = vmatprep.subr.bf16.mxu1 %v5716_v8 }
 0x712   :  { %v3374_v56 = vpop.f32.mrf.mxu1 }
 0x714   :  { %v3331_v15 = vpop.f32.mrf.mxu0  ;;  %v3376_v16 = vpop.f32.mrf.mxu1 }
 0x715   :  { %v3375_v22 = vadd.f32 %v3374_v56, %v3331_v15 }
 0x716   :  { %v3333_v43 = vpop.f32.mrf.mxu0  ;;  %v3378_v0 = vpop.f32.mrf.mxu1 }
 0x717   :  { %v3377_v48 = vadd.f32 %v3376_v16, %v3333_v43 }
 0x718   :  { %v3335_v44 = vpop.f32.mrf.mxu0  ;;  %v3380_v51 = vpop.f32.mrf.mxu1 }
 0x719   :  { %v3379_v26 = vadd.f32 %v3378_v0, %v3335_v44 }
 0x71a   :  { %v3337_v1 = vpop.f32.mrf.mxu0 }
 0x71b   :  { %v3381_v62 = vadd.f32 %v3380_v51, %v3337_v1 }
 0x724   :  { %v3678_v47 = vpop.f32.mrf.mxu0 }
 0x726   :  { %v3680_v46 = vpop.f32.mrf.mxu0 }
 0x728   :  { %v3682_v36 = vpop.f32.mrf.mxu0 }
 0x72a   :  { %v3684_v11 = vpop.f32.mrf.mxu0 }
 0x752   :  { %v3635_v17 = vpop.f32.mrf.mxu1 }
 0x753   :  { %v3636_v23 = vadd.f32 %v3635_v17, %v3375_v22 }
 0x754   :  { %v3637_v52 = vpop.f32.mrf.mxu1 }
 0x755   :  { %v3638_v4 = vadd.f32 %v3637_v52, %v3377_v48  ;;  %v3679_v60 = vadd.f32 %v3678_v47, %v3636_v23  ;;  %v5593_v23 = vld [vmem:[%s6652_s7 + $0x8] sm:$0xff]  }
 0x756   :  { %v3639_v20 = vpop.f32.mrf.mxu1 }
 0x757   :  { %v3640_v6 = vadd.f32 %v3639_v20, %v3379_v26  ;;  %v3681_v5 = vadd.f32 %v3680_v46, %v3638_v4 }
 0x758   :  { %v3641_v19 = vpop.f32.mrf.mxu1 }
 0x759   :  { %v3642_v9 = vadd.f32 %v3641_v19, %v3381_v62  ;;  %v3683_v35 = vadd.f32 %v3682_v36, %v3640_v6 }
 0x75b   :  { %v3685_v55 = vadd.f32 %v3684_v11, %v3642_v9  ;;  %v5594_v11 = vld [vmem:[%s6652_s7] sm:$0xff]  }
 0x762   :  { %v4047_v24 = vpop.f32.mrf.mxu1 }
 0x764   :  { %v4004_v2 = vpop.f32.mrf.mxu0  ;;  %v4049_v41 = vpop.f32.mrf.mxu1 }
 0x765   :  { %v4048_v42 = vadd.f32 %v4047_v24, %v4004_v2  ;;  %v4275_v24 = vld [vmem:[%s6653_s8] sm:$0x1] }
 0x766   :  { %v4006_v31 = vpop.f32.mrf.mxu0  ;;  %v4051_v7 = vpop.f32.mrf.mxu1  ;;  %v4282_v25 = vsel %vm4280_vm1, %v4275_v24, 0 }
 0x767   :  { %v4056_v13 = vadd.f32 %v4048_v42, %v3679_v60  ;;  %v4050_v63 = vadd.f32 %v4049_v41, %v4006_v31  ;;  %5030 = vmatpush3.bf16.msra.mxu0 %v4282_v25 }
 0x768   :  { %v4008_v27 = vpop.f32.mrf.mxu0  ;;  %v4053_v57 = vpop.f32.mrf.mxu1 }
 0x769   :  { %v6575_v34 = vadd.f32 %v4065_v12, %v4056_v13  ;;  %v4057_v10 = vadd.f32 %v4050_v63, %v3681_v5  ;;  %v4052_v50 = vadd.f32 %v4051_v7, %v4008_v27  ;;  %v4337_v7 = vld [vmem:[%s6655_s10 + $0x38] sm:$0xff]  ;;  %v4336_v5 = vld [vmem:[%s6655_s10 + $0x30] sm:$0xff]  ;;  %v4334_v13 = vld [vmem:[%s6655_s10 + $0x20] sm:$0xff] }
 0x76a   :  { %v4010_v58 = vpop.f32.mrf.mxu0  ;;  %v4333_v63 = vld [vmem:[%s6655_s10 + $0x18] sm:$0xff]  ;;  %v4331_v27 = vld [vmem:[%s6655_s10 + $0x8] sm:$0xff] }
 0x76b   :  { %v4076_v18 = vrot.slane %v6575_v34, 4  ;;  %v6578_v21 = vadd.f32 %v4069_v40, %v4057_v10  ;;  %v4058_v29 = vadd.f32 %v4052_v50, %v3683_v35  ;;  %v4054_v30 = vadd.f32 %v4053_v57, %v4010_v58  ;;  %v4330_v35 = vld [vmem:[%s6655_s10] sm:$0xff] }
 0x76d   :  { %v4077_v32 = vadd.f32 %v4076_v18, %v6575_v34  ;;  %v4082_v3 = vrot.slane %v6578_v21, 4  ;;  %v6582_v33 = vadd.f32 %v4065_v12, %v4058_v29  ;;  %v4059_v37 = vadd.f32 %v4054_v30, %v3685_v55 }
 0x76f   :  { %v4083_v38 = vadd.f32 %v4082_v3, %v6578_v21  ;;  %v4088_v39 = vrot.slane %v6582_v33, 4  ;;  %v6586_v49 = vadd.f32 %v4069_v40, %v4059_v37  ;;  %v4078_v61 = vrot.slane %v4077_v32, 2  ;;  %v4332_v40 = vld [vmem:[%s6655_s10 + $0x10] sm:$0xff] }
 0x771   :  { %v4089_v54 = vadd.f32 %v4088_v39, %v6582_v33  ;;  %v4094_v14 = vrot.slane %v6586_v49, 4  ;;  %v4084_v28 = vrot.slane %v4083_v38, 2  ;;  %v4079_v43 = vadd.f32 %v4078_v61, %v4077_v32 }
 0x772   :  { %v5719_v32 = vmov 1966171168  }
 0x773   :  { %v4090_v56 = vrot.slane %v4089_v54, 2  ;;  %v4095_v15 = vadd.f32 %v4094_v14, %v6586_v49  ;;  %v4085_v16 = vadd.f32 %v4084_v28, %v4083_v38  ;;  %v4080_v47 = vrot.slane %v4079_v43, 1 }
 0x774   :  { %v4416_v3 = vunpack.c.l.s4 %v5719_v32 }
 0x775   :  { %v4096_v0 = vrot.slane %v4095_v15, 2  ;;  %v4091_v44 = vadd.f32 %v4090_v56, %v4089_v54  ;;  %v4086_v51 = vrot.slane %v4085_v16, 1  ;;  %v4081_v22 = vadd.f32 %v4080_v47, %v4079_v43 }
 0x776   :  { %v4417_v37 = vunpack.c.0.s8 %v4416_v3 }
 0x777   :  { %v4097_v1 = vadd.f32 %v4096_v0, %v4095_v15  ;;  %v4092_v17 = vrot.slane %v4091_v44, 1  ;;  %v4087_v20 = vadd.f32 %v4086_v51, %v4085_v16 }
 0x778   :  { %v4420_v39 = vsub.s32 %v4417_v37, %v6203_v53 }
 0x779   :  { %v4098_v52 = vrot.slane %v4097_v1, 1  ;;  %v4093_v46 = vadd.f32 %v4092_v17, %v4091_v44 }
 0x77b   :  { %v4099_v36 = vadd.f32 %v4098_v52, %v4097_v1  ;;  %v4137_v48 = vsel %vm4136_vm15, %v4093_v46, %v4081_v22 }
 0x77d   :  { %v4138_v19 = vsel %vm4136_vm15, %v4099_v36, %v4087_v20  ;;  %v5617_v36 = vld [vmem:[#allocation4] sm:$0xff] }
 0x77e   :  { %4205 = vmatprep.mubr.f32.mxu1 %v4138_v19  ;;  %v5618_v19 = vld [vmem:[#allocation4 + $0x8] sm:$0xff] }
 0x77f   :  { %4206 = vmatmul.mubr.f32.vlgmr.msra.gmra.mxu1 %v4137_v48  ;;  %v5619_v48 = vld [vmem:[#allocation4 + $0x10] sm:$0xff] }
 0x780   :  { %5025 = vmatprep.mubr.msk.bf16.mxu1 %vm5718_vm0, %v5716_v8  ;;  %5022 = vmatpush3.bf16.msra.mxu1 %v5593_v23  ;;  %v5620_v23 = vld [vmem:[#allocation4 + $0x18] sm:$0xff] }
 0x781   :  { %5023 = vmatprep.subr.bf16.mxu1 %v5716_v8 }
 0x784   :  { %5024 = vmatpush3.bf16.msra.mxu1 %v5594_v11 }
 0x785   :  { %4365 = vmatprep.subr.mxu1 %v4337_v7 }
 0x83f   :  { %v5013_v26 = vpop.f32.mrf.mxu1 }
 0x841   :  { %v5014_v4 = vpop.f32.mrf.mxu1 }
 0x842   :  { %v5015_v62 = vadd.f32 %v5014_v4, %v5013_v26 }
 0x844   :  { %v4212_v2 = vmul.f32 0.015625, %v5015_v62 }
 0x846   :  { %v4213_v41 = vpack.c.bf16 %v4212_v2, %v4212_v2 }
 0x848   :  { %5026 = vmatmul.mubr.msk.bf16.vlgmr.msra.gmra.mxu1 %vm2452_vm7, %v4213_v41 }
 0x849   :  { %4405 = vmatprep.mubr.f32.mxu1 %v5716_v8  ;;  %v4335_v8 = vld [vmem:[%s6655_s10 + $0x28] sm:$0xff]  ;;  %4366 = vmatpush1.msra.mxu1 %v4336_v5  ;;  %s5720_s10 = smov [#allocation10]  }
 0x84a   :  { %4367 = vmatprep.subr.mxu1 %v4335_v8  ;;  %s4478_s15 = sshll.u32 %s5720_s10, 4  ;;  %s4479_s15 = int_to_ptr.vmem [resolvable:$true] %s4478_s15 }
 0x84b   :  { %4368 = vmatpush1.msra.mxu1 %v4334_v13  ;;  %s5681_s0 = scalar_lea.vmem %s4479_s15, 512  ;;  %p5686_p2 = scmp.lt.s32.totalorder %s4479_s15, %s4479_s15 }
 0x84c   :  { %4369 = vmatprep.subr.mxu1 %v4333_v63  ;;  %p5682_p1 = scmp.ne.s32.totalorder %s4479_s15, %s5681_s0  ;;  %p5687_p3 = scmp.lt.s32.totalorder %s5681_s0, %s5681_s0 }
 0x84d   :  { %4370 = vmatpush1.msra.mxu1 %v4332_v40 }
 0x84e   :  { %4371 = vmatprep.subr.mxu1 %v4331_v27  ;;  %p5688_p4 = por %p5687_p3, %p5686_p2 }
 0x84f   :  { %4372 = vmatpush1.msra.mxu1 %v4330_v35 }
 0x850   :  { %p5689_p5 = pnand %p5688_p4, %p5682_p1 }
 0x908   :  { %v4267_v60 = vpop.f32.mrf.mxu1 }
 0x909   :  { %v4273_v6 = vmax.f32 %v4267_v60, 0.0 }
 0x90a   :  { %v5027_v42 = vpop.f32.mrf.mxu1 }
 0x90b   :  { %v4274_v12 = vpack.c.bf16 %v4273_v6, %v4273_v6 }
 0x90c   :  { %v4270_v9 = vpop.f32.mrf.mxu1 }
 0x90d   :  { %5032 = vmatmul.mubr.msk.bf16.vlgmr.msra.gmra.mxu0 %vm4276_vm2, %v4274_v12 }
 0x90e   :  { %v5028_v31 = vpop.f32.mrf.mxu1 }
 0x9cd   :  { %v4318_v10 = vpop.f32.mrf.mxu0 }
 0x9ce   :  { %v4905_v50 = vmul.f32 -1.442695, %v4318_v10 }
 0x9cf   :  { %v5033_v55 = vpop.f32.mrf.mxu0 }
 0x9d0   :  { %5613 = vpow2.f32 %v4905_v50 }
 0x9d1   :  { %v4321_v57 = vpop.f32.mrf.mxu0 }
 0x9d3   :  { %v5034_v58 = vpop.f32.mrf.mxu0 }
 0x9dd   :  { %v5614_v18 = vpop.eup %5613 }
 0x9de   :  { %v4327_v29 = vadd.f32 1.0, %v5614_v18 }
 0x9e0   :  { %5615 = vrcp.f32 %v4327_v29 }
 0x9ed   :  { %v5616_v30 = vpop.eup %5615 }
 0x9ee   :  { %4906 = vmatmul.mubr.msk.f32.vlgmr.msra.gmra.mxu1 %vm2452_vm7, %v5616_v30 }
 0xaae   :  { %v4407_v38 = vpop.f32.mrf.mxu1 }
 0xab0   :  { %v4409_v61 = vpop.f32.mrf.mxu1 }
 0xab1   :  { %v4414_v54 = vcombine.low %v4407_v38, %v4409_v61 }
 0xab3   :  { %v4421_v14 = vrot.slane %v4414_v54, %v4420_v39 }
 0xab5   :  { %v4422_v28 = vcombine.high %v4421_v14, %v4421_v14  ;;  %v4429_v56 = vrot.slane %v4421_v14, %v4420_v39 }
 0xab7   :  { %v4436_v15 = vrot.slane %v4422_v28, %v4420_v39  ;;  %v4440_v16 = vrot.slane %v4429_v56, %v6206_v45  ;;  %v4444_v43 = vrot.slane %v4429_v56, %v6212_v59 }
 0xab9   :  { %v4448_v0 = vrot.slane %v4436_v15, %v6206_v45  ;;  %v4452_v44 = vrot.slane %v4436_v15, %v6212_v59  ;;  %v4457_v51 = vmul.f32 %v4440_v16, %v6575_v34  ;;  %v4458_v1 = vmul.f32 %v4444_v43, %v6578_v21 }
 0xabb   :  { %v4459_v53 = vmul.f32 %v4448_v0, %v6582_v33  ;;  %v4460_v17 = vmul.f32 %v4452_v44, %v6586_v49  ;;  %v4461_v47 = vmul.f32 0.1, %v4457_v51  ;;  %v4462_v52 = vmul.f32 0.1, %v4458_v1 }
 0xabd   :  { %v4463_v46 = vmul.f32 0.1, %v4459_v53  ;;  %v4464_v20 = vmul.f32 0.1, %v4460_v17  ;;  %v4465_v22 = vadd.f32 %v5617_v36, %v4461_v47  ;;  %v4466_v45 = vadd.f32 %v5618_v19, %v4462_v52 }
 0xabf   :  { %v4467_v59 = vadd.f32 %v5619_v48, %v4463_v46  ;;  %v4468_v34 = vadd.f32 %v5620_v23, %v4464_v20  ;;  %4469 = vst [vmem:[#allocation10] sm:$0xff] %v4465_v22  ;;  %4470 = vst [vmem:[#allocation10 + $0x8] sm:$0xff] %v4466_v45 }
 0xac1   :  { %4471 = vst [vmem:[#allocation10 + $0x10] sm:$0xff] %v4467_v59  ;;  %4472 = vst [vmem:[#allocation10 + $0x18] sm:$0xff] %v4468_v34 }
 0xac2   :  { %5692 = shalt.err (!%p5689_p5)
}
 0xac3   :  { %4484 = dma.vmem_to_hbm [thread:$0]  %s4479_s15, 512, %s6656_s11, [#allocation6], %s5711_s27, %s5711_s27, %s5712_s28  }
 0xac4   :  { %5705 = dma.done.wait [#allocation6], 512  }
 0xac5   :  { %5706 = vsyncadd [#allocation6], 4294966784 }
 0xac6   :  { %4488 = vsyncpa [#allocation5], 1 }
 0xac7   :  { %4489 = vsyncpa [#allocation8], 1 }
 0xac8   :  { %4490 = vsyncpa [#allocation6], 1 }

</bundles_post_ra>
